<compile_context>
chip_gen: v7x
topology: tpu7x:2x2x1
jax: 0.10.0
libtpu: 0.0.40
codegen_flags: <defaults>
</compile_context>

<pallas_src>
import jax
import jax.numpy as jnp
from jax.experimental import pallas as pl
from jax.experimental.pallas import tpu as pltpu


ACT_FNS = {
    "Tanh": jnp.tanh,
    "ReLU": lambda x: jnp.maximum(x, 0.0),
    "Softplus": jax.nn.softplus,
}


def make_neural_ode_kernel(n_hidden_layers, n_substeps, n_times, act_type,
                           substep_unroll):
    """Builds the Pallas kernel body (layer count / substeps / T are static)."""
    act = ACT_FNS[act_type]
    nl = n_hidden_layers

    def kernel(ts_ref,            # scalar-prefetch: (T,) f32 in SMEM
               z0_ref,            # (TB, D)
               *refs):
        if nl > 0:
            (w_in_ref, b_in_ref,          # (D, H), (1, H)
             w_hid_ref, b_hid_ref,        # (NL, H, H), (NL, 1, H)
             w_out_ref, b_out_ref,        # (H, D), (1, D)
             out_ref) = refs              # (T, TB, D) resident block
        else:
            (w_in_ref, b_in_ref,
             w_out_ref, b_out_ref,
             out_ref) = refs
            w_hid_ref = b_hid_ref = None

        tb, d = z0_ref.shape
        h_dim = w_in_ref.shape[1]
        mxu_dtype = w_in_ref.dtype     # weights arrive pre-cast from wrapper

        # --- hoisted ONCE per batch block (not per timestep / stage / substep)
        w_in = w_in_ref[...]
        b_in = jnp.broadcast_to(b_in_ref[...].astype(jnp.float32), (tb, h_dim))
        w_hid = [w_hid_ref[l] for l in range(nl)]
        b_hid = [jnp.broadcast_to(b_hid_ref[l].astype(jnp.float32),
                                  (tb, h_dim)) for l in range(nl)]
        w_out = w_out_ref[...]
        b_out = jnp.broadcast_to(b_out_ref[...].astype(jnp.float32), (tb, d))

        def ode_func(x):
            # h = act(x @ W_in + b_in)
            hh = act(jnp.dot(x.astype(mxu_dtype), w_in,
                             preferred_element_type=jnp.float32) + b_in)
            for l in range(nl):           # static unroll over hidden layers
                hh = act(jnp.dot(hh.astype(mxu_dtype), w_hid[l],
                                 preferred_element_type=jnp.float32)
                         + b_hid[l])
            return (jnp.dot(hh.astype(mxu_dtype), w_out,
                            preferred_element_type=jnp.float32) + b_out)

        # Initial state: trajectory at ts[0] is z0 itself.
        z0 = z0_ref[...].astype(jnp.float32)
        out_ref[0] = z0.astype(out_ref.dtype)

        inv_sub = jnp.float32(1.0 / n_substeps)

        def integrate_interval(t, z):
            # dt for this observation interval, read from SMEM.
            dt = (ts_ref[t] - ts_ref[t - 1]) * inv_sub

            def rk4_step(_, zz):
                # Accumulator-form RK4: only zz, acc and one k live at a time
                # (keeps vreg pressure bounded when TB/H are scaled up).
                k = ode_func(zz)
                acc = zz + (dt * (1.0 / 6.0)) * k
                y = zz + (0.5 * dt) * k
                k = ode_func(y)
                acc = acc + (dt * (1.0 / 3.0)) * k
                y = zz + (0.5 * dt) * k
                k = ode_func(y)
                acc = acc + (dt * (1.0 / 3.0)) * k
                y = zz + dt * k
                k = ode_func(y)
                return acc + (dt * (1.0 / 6.0)) * k

            z = jax.lax.fori_loop(0, n_substeps, rk4_step, z,
                                  unroll=substep_unroll)
            out_ref[t] = z.astype(out_ref.dtype)   # resident VMEM block store
            return z

        jax.lax.fori_loop(1, n_times, integrate_interval, z0)

    return kernel


def _default_batch_tile(B):
    """Pick a batch tile: fill the MXU M dim but keep >=2 blocks when B>=16.

    v5e MXU is 4x128x128, v6e/v7x 2x256x256 -> target up to 256 rows, but
    never fewer than 2 batch blocks for B >= 16 so v7x's two TensorCores
    (fed via the 'parallel' grid axis) both get work.
    """
    if B < 16:
        return B                       # single block; small batch, TB == B ok
    tile = min(256, B // 2)
    tile = (tile // 8) * 8             # sublane alignment
    while tile >= 8 and B % tile != 0:
        tile -= 8
    return tile if tile >= 8 else B


def neural_ode_forward(z0, ts, params, *, n_substeps=16, act_type="Tanh",
                       batch_tile=None, mxu_dtype=jnp.float32,
                       substep_unroll=None, single_buffer_weights=False,
                       vmem_limit_bytes=None):
    """Pallas NeuralODE forward. Returns (B, T, D) like the PyTorch module.

    batch_tile:  rows per matmul / per-core batch block. Default auto-sizes
                 toward 128 (v5e) / 256 (v6e/v7x) MXU rows while keeping
                 >= 2 blocks when B >= 16 (both v7x TensorCores busy).
    mxu_dtype:   dtype of the matmul *weight* operands (e.g. jnp.bfloat16 on
                 v6e/v7x). Weights are cast ONCE here in the wrapper; biases,
                 RK4 state and elementwise work stay f32. bf16 changes RK4
                 operand precision — gate on a tolerance test before enabling.
    substep_unroll: unroll factor of the RK4-substep loop. Default: full
                 unroll for small batch tiles, capped at 4 for TB > 64
                 (protects the 64-vreg file).
    single_buffer_weights: add pipeline_mode=pl.Buffered(1) to the
                 loop-invariant weight/bias inputs (useful for large H/NL on
                 v7x's 64 MiB VMEM; off by default).
    """
    w_in, b_in, w_hid, b_hid, w_out, b_out = params
    B, D = z0.shape
    T = ts.shape[0]
    H = w_in.shape[1]
    NL = 0 if w_hid is None else w_hid.shape[0]

    TB = _default_batch_tile(B) if batch_tile is None else batch_tile
    assert B % TB == 0, (B, TB)
    assert TB == B or TB % 8 == 0, "batch tile must be the full batch or 8-aligned"

    if substep_unroll is None:
        substep_unroll = n_substeps if TB <= 64 else min(4, n_substeps)

    # Pre-cast weights ONCE here (never per grid step in-kernel); biases f32.
    w_in = w_in.astype(mxu_dtype)
    w_out = w_out.astype(mxu_dtype)
    b_in = b_in.astype(jnp.float32)
    b_out = b_out.astype(jnp.float32)
    if NL > 0:
        w_hid = w_hid.astype(mxu_dtype)
        b_hid = b_hid.astype(jnp.float32)

    kernel = make_neural_ode_kernel(NL, n_substeps, T, act_type, substep_unroll)

    def const_spec(shape):
        # Loop-invariant operand: constant index map; optionally single-buffer.
        idx = lambda b, ts, _n=len(shape): (0,) * _n
        if single_buffer_weights:
            return pl.BlockSpec(shape, idx, pipeline_mode=pl.Buffered(1))
        return pl.BlockSpec(shape, idx)

    in_specs = [pl.BlockSpec((TB, D), lambda b, ts: (b, 0)),      # z0
                const_spec((D, H)),                               # W_in
                const_spec((1, H))]                               # b_in
    operands = [z0, w_in, b_in]
    if NL > 0:   # guard: NL == 0 would give zero-extent blocks -> skip them
        in_specs += [const_spec((NL, H, H)), const_spec((NL, 1, H))]
        operands += [w_hid, b_hid]
    in_specs += [const_spec((H, D)), const_spec((1, D))]          # W_out, b_out
    operands += [w_out, b_out]

    cp_kwargs = dict(dimension_semantics=("parallel",))
    if vmem_limit_bytes is not None:
        cp_kwargs["vmem_limit_bytes"] = vmem_limit_bytes

    grid_spec = pltpu.PrefetchScalarGridSpec(
        num_scalar_prefetch=1,                     # ts -> SMEM scalar reads
        grid=(B // TB,),                           # batch blocks only
        in_specs=in_specs,
        # Output block resident across the whole in-kernel time loop.
        out_specs=pl.BlockSpec((T, TB, D), lambda b, ts: (0, b, 0)),
    )

    traj = pl.pallas_call(
        kernel,
        out_shape=jax.ShapeDtypeStruct((T, B, D), jnp.float32),
        grid_spec=grid_spec,
        compiler_params=pltpu.CompilerParams(**cp_kwargs),
    )(ts, *operands)

    # odeint output is (T, B, D); match z.permute(1, 0, 2) -> (B, T, D)
    return jnp.transpose(traj, (1, 0, 2))


def neural_ode_reference(z0, ts, params, n_substeps, act_type):
    """Pure-JAX fixed-step RK4 reference (same semantics as the kernel)."""
    w_in, b_in, w_hid, b_hid, w_out, b_out = params
    act = ACT_FNS[act_type]
    nl = 0 if w_hid is None else w_hid.shape[0]
    hp = jax.lax.Precision.HIGHEST

    def f(x):
        h = act(jnp.dot(x, w_in, precision=hp) + b_in)
        for l in range(nl):
            h = act(jnp.dot(h, w_hid[l], precision=hp) + b_hid[l])
        return jnp.dot(h, w_out, precision=hp) + b_out

    T = ts.shape[0]
    zs = [z0]
    z = z0
    for t in range(1, T):
        dt = (ts[t] - ts[t - 1]) / n_substeps
        for _ in range(n_substeps):
            k1 = f(z)
            k2 = f(z + 0.5 * dt * k1)
            k3 = f(z + 0.5 * dt * k2)
            k4 = f(z + dt * k3)
            z = z + (dt / 6.0) * (k1 + 2.0 * k2 + 2.0 * k3 + k4)
        zs.append(z)
    return jnp.stack(zs, axis=1)   # (B, T, D)


def init_params(key, input_dim, n_hidden, n_layer):
    """PyTorch-style uniform(-1/sqrt(fan_in), 1/sqrt(fan_in)) init.

    Weights are returned as (in, out) so the kernel computes x @ W + b.
    """
    NL = n_layer - 1
    ks = jax.random.split(key, 6)

    def u(k, shape, fan_in):
        bound = 1.0 / jnp.sqrt(jnp.float32(fan_in))
        return jax.random.uniform(k, shape, jnp.float32, -bound, bound)

    w_in = u(ks[0], (input_dim, n_hidden), input_dim)
    b_in = u(ks[1], (1, n_hidden), input_dim)
    if NL > 0:
        w_hid = u(ks[2], (NL, n_hidden, n_hidden), n_hidden)
        b_hid = u(ks[3], (NL, 1, n_hidden), n_hidden)
    else:
        w_hid = None
        b_hid = None
    w_out = u(ks[4], (n_hidden, input_dim), n_hidden)
    b_out = u(ks[5], (1, input_dim), n_hidden)
    return w_in, b_in, w_hid, b_hid, w_out, b_out


if __name__ == "__main__":
    # Small shapes: batch=8, input_dim=16, n_hidden=32, n_layer=2, T=8, Tanh.
    B, D, H, n_layer, T = 8, 16, 32, 2, 8
    n_substeps = 16

    key = jax.random.PRNGKey(0)
    k_z0, k_params = jax.random.split(key)

    z0 = jax.random.normal(k_z0, (B, D), dtype=jnp.float32)
    ts = jnp.linspace(0.0, 1.0, T, dtype=jnp.float32)
    params = init_params(k_params, D, H, n_layer)

    out = neural_ode_forward(z0, ts, params, n_substeps=n_substeps,
                             act_type="Tanh")
    out = jax.block_until_ready(out)

    assert out.shape == (B, T, D), out.shape
    assert bool(jnp.all(jnp.isfinite(out)))
    # trajectory at t=ts[0] must equal the initial state
    assert bool(jnp.allclose(out[:, 0, :], z0, atol=1e-6))
    # match the pure-JAX fixed-step RK4 reference
    ref = jax.jit(lambda z, t: neural_ode_reference(z, t, params,
                                                    n_substeps, "Tanh"))(z0, ts)
    ref = jax.block_until_ready(ref)
    assert bool(jnp.allclose(out, ref, atol=5e-3, rtol=5e-3))

    print("KERNEL_OK")
</pallas_src>

<mosaic_0001>
module attributes {stable_mosaic.version = 11 : i64} {
  func.func @kernel(%arg0: i32, %arg1: memref<8xf32, #tpu.memory_space<smem>>, %arg2: memref<8x16xf32, #tpu.memory_space<vmem>>, %arg3: memref<16x32xf32, #tpu.memory_space<vmem>>, %arg4: memref<1x32xf32, #tpu.memory_space<vmem>>, %arg5: memref<1x32x32xf32, #tpu.memory_space<vmem>>, %arg6: memref<1x1x32xf32, #tpu.memory_space<vmem>>, %arg7: memref<32x16xf32, #tpu.memory_space<vmem>>, %arg8: memref<1x16xf32, #tpu.memory_space<vmem>>, %arg9: memref<8x8x16xf32, #tpu.memory_space<vmem>>) attributes {dimension_semantics = [#tpu.dimension_semantics<parallel>], iteration_bounds = array<i64: 1>, scalar_prefetch = 1 : i64, scratch_operands = 0 : i64, tpu.core_type = #tpu.core_type<tc>, window_params = [{transform_indices = @transform_0, window_bounds = array<i64: 8, 16>}, {pipeline_mode = #tpu.pipeline_mode<synchronous>, transform_indices = @transform_1, window_bounds = array<i64: 16, 32>}, {pipeline_mode = #tpu.pipeline_mode<synchronous>, transform_indices = @transform_2, window_bounds = array<i64: 1, 32>}, {pipeline_mode = #tpu.pipeline_mode<synchronous>, transform_indices = @transform_3, window_bounds = array<i64: 1, 32, 32>}, {pipeline_mode = #tpu.pipeline_mode<synchronous>, transform_indices = @transform_4, window_bounds = array<i64: 1, 1, 32>}, {pipeline_mode = #tpu.pipeline_mode<synchronous>, transform_indices = @transform_5, window_bounds = array<i64: 32, 16>}, {pipeline_mode = #tpu.pipeline_mode<synchronous>, transform_indices = @transform_6, window_bounds = array<i64: 1, 16>}, {transform_indices = @transform_7, window_bounds = array<i64: 8, 8, 16>}]} {
    %c0 = arith.constant 0 : index
    %c0_0 = arith.constant 0 : index
    %0 = vector.load %arg3[%c0, %c0_0] : memref<16x32xf32, #tpu.memory_space<vmem>>, vector<16x32xf32>
    %c0_1 = arith.constant 0 : index
    %c0_2 = arith.constant 0 : index
    %1 = vector.load %arg4[%c0_1, %c0_2] : memref<1x32xf32, #tpu.memory_space<vmem>>, vector<1x32xf32>
    %2 = vector.shape_cast %1 : vector<1x32xf32> to vector<1x32xf32>
    %3 = vector.broadcast %2 : vector<1x32xf32> to vector<8x32xf32>
    %c0_3 = arith.constant 0 : index
    %c0_4 = arith.constant 0 : index
    %c0_5 = arith.constant 0 : index
    %4 = vector.load %arg5[%c0_3, %c0_4, %c0_5] : memref<1x32x32xf32, #tpu.memory_space<vmem>>, vector<1x32x32xf32>
    %5 = vector.shape_cast %4 : vector<1x32x32xf32> to vector<32x32xf32>
    %c0_6 = arith.constant 0 : index
    %c0_7 = arith.constant 0 : index
    %c0_8 = arith.constant 0 : index
    %6 = vector.load %arg6[%c0_6, %c0_7, %c0_8] : memref<1x1x32xf32, #tpu.memory_space<vmem>>, vector<1x1x32xf32>
    %7 = vector.shape_cast %6 : vector<1x1x32xf32> to vector<1x32xf32>
    %8 = vector.shape_cast %7 : vector<1x32xf32> to vector<1x32xf32>
    %9 = vector.broadcast %8 : vector<1x32xf32> to vector<8x32xf32>
    %c0_9 = arith.constant 0 : index
    %c0_10 = arith.constant 0 : index
    %10 = vector.load %arg7[%c0_9, %c0_10] : memref<32x16xf32, #tpu.memory_space<vmem>>, vector<32x16xf32>
    %c0_11 = arith.constant 0 : index
    %c0_12 = arith.constant 0 : index
    %11 = vector.load %arg8[%c0_11, %c0_12] : memref<1x16xf32, #tpu.memory_space<vmem>>, vector<1x16xf32>
    %12 = vector.shape_cast %11 : vector<1x16xf32> to vector<1x16xf32>
    %13 = vector.broadcast %12 : vector<1x16xf32> to vector<8x16xf32>
    %c0_13 = arith.constant 0 : index
    %c0_14 = arith.constant 0 : index
    %14 = vector.load %arg2[%c0_13, %c0_14] : memref<8x16xf32, #tpu.memory_space<vmem>>, vector<8x16xf32>
    %c0_15 = arith.constant 0 : index
    %c0_16 = arith.constant 0 : index
    %c0_17 = arith.constant 0 : index
    %15 = vector.load %arg9[%c0_15, %c0_16, %c0_17] : memref<8x8x16xf32, #tpu.memory_space<vmem>>, vector<1x8x16xf32>
    %16 = vector.shape_cast %15 : vector<1x8x16xf32> to vector<8x16xf32>
    %17 = vector.shape_cast %14 : vector<8x16xf32> to vector<1x8x16xf32>
    tpu.vector_store %arg9[%c0_15, %c0_16, %c0_17], %17 {strides = array<i32>} : memref<8x8x16xf32, #tpu.memory_space<vmem>>, vector<1x8x16xf32>,
    %cst = arith.constant 6.250000e-02 : f32
    %c1_i32 = arith.constant 1 : i32
    %c7_i32 = arith.constant 7 : i32
    %18 = arith.addi %c1_i32, %c7_i32 : i32
    %c1_i32_18 = arith.constant 1 : i32
    %19 = scf.for %arg10 = %c1_i32 to %18 step %c1_i32_18 iter_args(%arg11 = %14) -> (vector<8x16xf32>)  : i32 {
      %20 = arith.index_cast %arg10 : i32 to index
      %21 = memref.load %arg1[%20] : memref<8xf32, #tpu.memory_space<smem>>
      %c1_i32_20 = arith.constant 1 : i32
      %22 = arith.subi %arg10, %c1_i32_20 : i32
      %23 = arith.index_cast %22 : i32 to index
      %24 = memref.load %arg1[%23] : memref<8xf32, #tpu.memory_space<smem>>
      %25 = arith.subf %21, %24 : f32
      %26 = arith.mulf %25, %cst : f32
      %c0_i32 = arith.constant 0 : i32
      %cst_21 = arith.constant dense<0.000000e+00> : vector<8x32xf32>
      %27 = tpu.matmul %arg11, %0, %cst_21 {dimension_numbers = #tpu.dot_dimension_numbers<[1], [0], [0], [1], [0, 0, 1, 1], [], []>} : vector<8x16xf32>, vector<16x32xf32>, vector<8x32xf32> -> vector<8x32xf32>
      %28 = arith.addf %27, %3 : vector<8x32xf32>
      %29 = math.tanh %28 : vector<8x32xf32>
      %cst_22 = arith.constant dense<0.000000e+00> : vector<8x32xf32>
      %30 = tpu.matmul %29, %5, %cst_22 {dimension_numbers = #tpu.dot_dimension_numbers<[1], [0], [0], [1], [0, 0, 1, 1], [], []>} : vector<8x32xf32>, vector<32x32xf32>, vector<8x32xf32> -> vector<8x32xf32>
      %31 = arith.addf %30, %9 : vector<8x32xf32>
      %32 = math.tanh %31 : vector<8x32xf32>
      %cst_23 = arith.constant dense<0.000000e+00> : vector<8x16xf32>
      %33 = tpu.matmul %32, %10, %cst_23 {dimension_numbers = #tpu.dot_dimension_numbers<[1], [0], [0], [1], [0, 0, 1, 1], [], []>} : vector<8x32xf32>, vector<32x16xf32>, vector<8x16xf32> -> vector<8x16xf32>
      %34 = arith.addf %33, %13 : vector<8x16xf32>
      %cst_24 = arith.constant 0.166666672 : f32
      %35 = arith.mulf %26, %cst_24 : f32
      %36 = vector.broadcast %35 : f32 to vector<8x16xf32>
      %37 = arith.mulf %36, %34 : vector<8x16xf32>
      %38 = arith.addf %arg11, %37 : vector<8x16xf32>
      %cst_25 = arith.constant 5.000000e-01 : f32
      %39 = arith.mulf %cst_25, %26 : f32
      %40 = vector.broadcast %39 : f32 to vector<8x16xf32>
      %41 = arith.mulf %40, %34 : vector<8x16xf32>
      %42 = arith.addf %arg11, %41 : vector<8x16xf32>
      %cst_26 = arith.constant dense<0.000000e+00> : vector<8x32xf32>
      %43 = tpu.matmul %42, %0, %cst_26 {dimension_numbers = #tpu.dot_dimension_numbers<[1], [0], [0], [1], [0, 0, 1, 1], [], []>} : vector<8x16xf32>, vector<16x32xf32>, vector<8x32xf32> -> vector<8x32xf32>
      %44 = arith.addf %43, %3 : vector<8x32xf32>
      %45 = math.tanh %44 : vector<8x32xf32>
      %cst_27 = arith.constant dense<0.000000e+00> : vector<8x32xf32>
      %46 = tpu.matmul %45, %5, %cst_27 {dimension_numbers = #tpu.dot_dimension_numbers<[1], [0], [0], [1], [0, 0, 1, 1], [], []>} : vector<8x32xf32>, vector<32x32xf32>, vector<8x32xf32> -> vector<8x32xf32>
      %47 = arith.addf %46, %9 : vector<8x32xf32>
      %48 = math.tanh %47 : vector<8x32xf32>
      %cst_28 = arith.constant dense<0.000000e+00> : vector<8x16xf32>
      %49 = tpu.matmul %48, %10, %cst_28 {dimension_numbers = #tpu.dot_dimension_numbers<[1], [0], [0], [1], [0, 0, 1, 1], [], []>} : vector<8x32xf32>, vector<32x16xf32>, vector<8x16xf32> -> vector<8x16xf32>
      %50 = arith.addf %49, %13 : vector<8x16xf32>
      %cst_29 = arith.constant 0.333333343 : f32
      %51 = arith.mulf %26, %cst_29 : f32
      %52 = vector.broadcast %51 : f32 to vector<8x16xf32>
      %53 = arith.mulf %52, %50 : vector<8x16xf32>
      %54 = arith.addf %38, %53 : vector<8x16xf32>
      %cst_30 = arith.constant 5.000000e-01 : f32
      %55 = arith.mulf %cst_30, %26 : f32
      %56 = vector.broadcast %55 : f32 to vector<8x16xf32>
      %57 = arith.mulf %56, %50 : vector<8x16xf32>
      %58 = arith.addf %arg11, %57 : vector<8x16xf32>
      %cst_31 = arith.constant dense<0.000000e+00> : vector<8x32xf32>
      %59 = tpu.matmul %58, %0, %cst_31 {dimension_numbers = #tpu.dot_dimension_numbers<[1], [0], [0], [1], [0, 0, 1, 1], [], []>} : vector<8x16xf32>, vector<16x32xf32>, vector<8x32xf32> -> vector<8x32xf32>
      %60 = arith.addf %59, %3 : vector<8x32xf32>
      %61 = math.tanh %60 : vector<8x32xf32>
      %cst_32 = arith.constant dense<0.000000e+00> : vector<8x32xf32>
      %62 = tpu.matmul %61, %5, %cst_32 {dimension_numbers = #tpu.dot_dimension_numbers<[1], [0], [0], [1], [0, 0, 1, 1], [], []>} : vector<8x32xf32>, vector<32x32xf32>, vector<8x32xf32> -> vector<8x32xf32>
      %63 = arith.addf %62, %9 : vector<8x32xf32>
      %64 = math.tanh %63 : vector<8x32xf32>
      %cst_33 = arith.constant dense<0.000000e+00> : vector<8x16xf32>
      %65 = tpu.matmul %64, %10, %cst_33 {dimension_numbers = #tpu.dot_dimension_numbers<[1], [0], [0], [1], [0, 0, 1, 1], [], []>} : vector<8x32xf32>, vector<32x16xf32>, vector<8x16xf32> -> vector<8x16xf32>
      %66 = arith.addf %65, %13 : vector<8x16xf32>
      %cst_34 = arith.constant 0.333333343 : f32
      %67 = arith.mulf %26, %cst_34 : f32
      %68 = vector.broadcast %67 : f32 to vector<8x16xf32>
      %69 = arith.mulf %68, %66 : vector<8x16xf32>
      %70 = arith.addf %54, %69 : vector<8x16xf32>
      %71 = vector.broadcast %26 : f32 to vector<8x16xf32>
      %72 = arith.mulf %71, %66 : vector<8x16xf32>
      %73 = arith.addf %arg11, %72 : vector<8x16xf32>
      %cst_35 = arith.constant dense<0.000000e+00> : vector<8x32xf32>
      %74 = tpu.matmul %73, %0, %cst_35 {dimension_numbers = #tpu.dot_dimension_numbers<[1], [0], [0], [1], [0, 0, 1, 1], [], []>} : vector<8x16xf32>, vector<16x32xf32>, vector<8x32xf32> -> vector<8x32xf32>
      %75 = arith.addf %74, %3 : vector<8x32xf32>
      %76 = math.tanh %75 : vector<8x32xf32>
      %cst_36 = arith.constant dense<0.000000e+00> : vector<8x32xf32>
      %77 = tpu.matmul %76, %5, %cst_36 {dimension_numbers = #tpu.dot_dimension_numbers<[1], [0], [0], [1], [0, 0, 1, 1], [], []>} : vector<8x32xf32>, vector<32x32xf32>, vector<8x32xf32> -> vector<8x32xf32>
      %78 = arith.addf %77, %9 : vector<8x32xf32>
      %79 = math.tanh %78 : vector<8x32xf32>
      %cst_37 = arith.constant dense<0.000000e+00> : vector<8x16xf32>
      %80 = tpu.matmul %79, %10, %cst_37 {dimension_numbers = #tpu.dot_dimension_numbers<[1], [0], [0], [1], [0, 0, 1, 1], [], []>} : vector<8x32xf32>, vector<32x16xf32>, vector<8x16xf32> -> vector<8x16xf32>
      %81 = arith.addf %80, %13 : vector<8x16xf32>
      %cst_38 = arith.constant 0.166666672 : f32
      %82 = arith.mulf %26, %cst_38 : f32
      %83 = vector.broadcast %82 : f32 to vector<8x16xf32>
      %84 = arith.mulf %83, %81 : vector<8x16xf32>
      %85 = arith.addf %70, %84 : vector<8x16xf32>
      %c1_i32_39 = arith.constant 1 : i32
      %cst_40 = arith.constant dense<0.000000e+00> : vector<8x32xf32>
      %86 = tpu.matmul %85, %0, %cst_40 {dimension_numbers = #tpu.dot_dimension_numbers<[1], [0], [0], [1], [0, 0, 1, 1], [], []>} : vector<8x16xf32>, vector<16x32xf32>, vector<8x32xf32> -> vector<8x32xf32>
      %87 = arith.addf %86, %3 : vector<8x32xf32>
      %88 = math.tanh %87 : vector<8x32xf32>
      %cst_41 = arith.constant dense<0.000000e+00> : vector<8x32xf32>
      %89 = tpu.matmul %88, %5, %cst_41 {dimension_numbers = #tpu.dot_dimension_numbers<[1], [0], [0], [1], [0, 0, 1, 1], [], []>} : vector<8x32xf32>, vector<32x32xf32>, vector<8x32xf32> -> vector<8x32xf32>
      %90 = arith.addf %89, %9 : vector<8x32xf32>
      %91 = math.tanh %90 : vector<8x32xf32>
      %cst_42 = arith.constant dense<0.000000e+00> : vector<8x16xf32>
      %92 = tpu.matmul %91, %10, %cst_42 {dimension_numbers = #tpu.dot_dimension_numbers<[1], [0], [0], [1], [0, 0, 1, 1], [], []>} : vector<8x32xf32>, vector<32x16xf32>, vector<8x16xf32> -> vector<8x16xf32>
      %93 = arith.addf %92, %13 : vector<8x16xf32>
      %cst_43 = arith.constant 0.166666672 : f32
      %94 = arith.mulf %26, %cst_43 : f32
      %95 = vector.broadcast %94 : f32 to vector<8x16xf32>
      %96 = arith.mulf %95, %93 : vector<8x16xf32>
      %97 = arith.addf %85, %96 : vector<8x16xf32>
      %cst_44 = arith.constant 5.000000e-01 : f32
      %98 = arith.mulf %cst_44, %26 : f32
      %99 = vector.broadcast %98 : f32 to vector<8x16xf32>
      %100 = arith.mulf %99, %93 : vector<8x16xf32>
      %101 = arith.addf %85, %100 : vector<8x16xf32>
      %cst_45 = arith.constant dense<0.000000e+00> : vector<8x32xf32>
      %102 = tpu.matmul %101, %0, %cst_45 {dimension_numbers = #tpu.dot_dimension_numbers<[1], [0], [0], [1], [0, 0, 1, 1], [], []>} : vector<8x16xf32>, vector<16x32xf32>, vector<8x32xf32> -> vector<8x32xf32>
      %103 = arith.addf %102, %3 : vector<8x32xf32>
      %104 = math.tanh %103 : vector<8x32xf32>
      %cst_46 = arith.constant dense<0.000000e+00> : vector<8x32xf32>
      %105 = tpu.matmul %104, %5, %cst_46 {dimension_numbers = #tpu.dot_dimension_numbers<[1], [0], [0], [1], [0, 0, 1, 1], [], []>} : vector<8x32xf32>, vector<32x32xf32>, vector<8x32xf32> -> vector<8x32xf32>
      %106 = arith.addf %105, %9 : vector<8x32xf32>
      %107 = math.tanh %106 : vector<8x32xf32>
      %cst_47 = arith.constant dense<0.000000e+00> : vector<8x16xf32>
      %108 = tpu.matmul %107, %10, %cst_47 {dimension_numbers = #tpu.dot_dimension_numbers<[1], [0], [0], [1], [0, 0, 1, 1], [], []>} : vector<8x32xf32>, vector<32x16xf32>, vector<8x16xf32> -> vector<8x16xf32>
      %109 = arith.addf %108, %13 : vector<8x16xf32>
      %cst_48 = arith.constant 0.333333343 : f32
      %110 = arith.mulf %26, %cst_48 : f32
      %111 = vector.broadcast %110 : f32 to vector<8x16xf32>
      %112 = arith.mulf %111, %109 : vector<8x16xf32>
      %113 = arith.addf %97, %112 : vector<8x16xf32>
      %cst_49 = arith.constant 5.000000e-01 : f32
      %114 = arith.mulf %cst_49, %26 : f32
      %115 = vector.broadcast %114 : f32 to vector<8x16xf32>
      %116 = arith.mulf %115, %109 : vector<8x16xf32>
      %117 = arith.addf %85, %116 : vector<8x16xf32>
      %cst_50 = arith.constant dense<0.000000e+00> : vector<8x32xf32>
      %118 = tpu.matmul %117, %0, %cst_50 {dimension_numbers = #tpu.dot_dimension_numbers<[1], [0], [0], [1], [0, 0, 1, 1], [], []>} : vector<8x16xf32>, vector<16x32xf32>, vector<8x32xf32> -> vector<8x32xf32>
      %119 = arith.addf %118, %3 : vector<8x32xf32>
      %120 = math.tanh %119 : vector<8x32xf32>
      %cst_51 = arith.constant dense<0.000000e+00> : vector<8x32xf32>
      %121 = tpu.matmul %120, %5, %cst_51 {dimension_numbers = #tpu.dot_dimension_numbers<[1], [0], [0], [1], [0, 0, 1, 1], [], []>} : vector<8x32xf32>, vector<32x32xf32>, vector<8x32xf32> -> vector<8x32xf32>
      %122 = arith.addf %121, %9 : vector<8x32xf32>
      %123 = math.tanh %122 : vector<8x32xf32>
      %cst_52 = arith.constant dense<0.000000e+00> : vector<8x16xf32>
      %124 = tpu.matmul %123, %10, %cst_52 {dimension_numbers = #tpu.dot_dimension_numbers<[1], [0], [0], [1], [0, 0, 1, 1], [], []>} : vector<8x32xf32>, vector<32x16xf32>, vector<8x16xf32> -> vector<8x16xf32>
      %125 = arith.addf %124, %13 : vector<8x16xf32>
      %cst_53 = arith.constant 0.333333343 : f32
      %126 = arith.mulf %26, %cst_53 : f32
      %127 = vector.broadcast %126 : f32 to vector<8x16xf32>
      %128 = arith.mulf %127, %125 : vector<8x16xf32>
      %129 = arith.addf %113, %128 : vector<8x16xf32>
      %130 = vector.broadcast %26 : f32 to vector<8x16xf32>
      %131 = arith.mulf %130, %125 : vector<8x16xf32>
      %132 = arith.addf %85, %131 : vector<8x16xf32>
      %cst_54 = arith.constant dense<0.000000e+00> : vector<8x32xf32>
      %133 = tpu.matmul %132, %0, %cst_54 {dimension_numbers = #tpu.dot_dimension_numbers<[1], [0], [0], [1], [0, 0, 1, 1], [], []>} : vector<8x16xf32>, vector<16x32xf32>, vector<8x32xf32> -> vector<8x32xf32>
      %134 = arith.addf %133, %3 : vector<8x32xf32>
      %135 = math.tanh %134 : vector<8x32xf32>
      %cst_55 = arith.constant dense<0.000000e+00> : vector<8x32xf32>
      %136 = tpu.matmul %135, %5, %cst_55 {dimension_numbers = #tpu.dot_dimension_numbers<[1], [0], [0], [1], [0, 0, 1, 1], [], []>} : vector<8x32xf32>, vector<32x32xf32>, vector<8x32xf32> -> vector<8x32xf32>
      %137 = arith.addf %136, %9 : vector<8x32xf32>
      %138 = math.tanh %137 : vector<8x32xf32>
      %cst_56 = arith.constant dense<0.000000e+00> : vector<8x16xf32>
      %139 = tpu.matmul %138, %10, %cst_56 {dimension_numbers = #tpu.dot_dimension_numbers<[1], [0], [0], [1], [0, 0, 1, 1], [], []>} : vector<8x32xf32>, vector<32x16xf32>, vector<8x16xf32> -> vector<8x16xf32>
      %140 = arith.addf %139, %13 : vector<8x16xf32>
      %cst_57 = arith.constant 0.166666672 : f32
      %141 = arith.mulf %26, %cst_57 : f32
      %142 = vector.broadcast %141 : f32 to vector<8x16xf32>
      %143 = arith.mulf %142, %140 : vector<8x16xf32>
      %144 = arith.addf %129, %143 : vector<8x16xf32>
      %c2_i32 = arith.constant 2 : i32
      %cst_58 = arith.constant dense<0.000000e+00> : vector<8x32xf32>
      %145 = tpu.matmul %144, %0, %cst_58 {dimension_numbers = #tpu.dot_dimension_numbers<[1], [0], [0], [1], [0, 0, 1, 1], [], []>} : vector<8x16xf32>, vector<16x32xf32>, vector<8x32xf32> -> vector<8x32xf32>
      %146 = arith.addf %145, %3 : vector<8x32xf32>
      %147 = math.tanh %146 : vector<8x32xf32>
      %cst_59 = arith.constant dense<0.000000e+00> : vector<8x32xf32>
      %148 = tpu.matmul %147, %5, %cst_59 {dimension_numbers = #tpu.dot_dimension_numbers<[1], [0], [0], [1], [0, 0, 1, 1], [], []>} : vector<8x32xf32>, vector<32x32xf32>, vector<8x32xf32> -> vector<8x32xf32>
      %149 = arith.addf %148, %9 : vector<8x32xf32>
      %150 = math.tanh %149 : vector<8x32xf32>
      %cst_60 = arith.constant dense<0.000000e+00> : vector<8x16xf32>
      %151 = tpu.matmul %150, %10, %cst_60 {dimension_numbers = #tpu.dot_dimension_numbers<[1], [0], [0], [1], [0, 0, 1, 1], [], []>} : vector<8x32xf32>, vector<32x16xf32>, vector<8x16xf32> -> vector<8x16xf32>
      %152 = arith.addf %151, %13 : vector<8x16xf32>
      %cst_61 = arith.constant 0.166666672 : f32
      %153 = arith.mulf %26, %cst_61 : f32
      %154 = vector.broadcast %153 : f32 to vector<8x16xf32>
      %155 = arith.mulf %154, %152 : vector<8x16xf32>
      %156 = arith.addf %144, %155 : vector<8x16xf32>
      %cst_62 = arith.constant 5.000000e-01 : f32
      %157 = arith.mulf %cst_62, %26 : f32
      %158 = vector.broadcast %157 : f32 to vector<8x16xf32>
      %159 = arith.mulf %158, %152 : vector<8x16xf32>
      %160 = arith.addf %144, %159 : vector<8x16xf32>
      %cst_63 = arith.constant dense<0.000000e+00> : vector<8x32xf32>
      %161 = tpu.matmul %160, %0, %cst_63 {dimension_numbers = #tpu.dot_dimension_numbers<[1], [0], [0], [1], [0, 0, 1, 1], [], []>} : vector<8x16xf32>, vector<16x32xf32>, vector<8x32xf32> -> vector<8x32xf32>
      %162 = arith.addf %161, %3 : vector<8x32xf32>
      %163 = math.tanh %162 : vector<8x32xf32>
      %cst_64 = arith.constant dense<0.000000e+00> : vector<8x32xf32>
      %164 = tpu.matmul %163, %5, %cst_64 {dimension_numbers = #tpu.dot_dimension_numbers<[1], [0], [0], [1], [0, 0, 1, 1], [], []>} : vector<8x32xf32>, vector<32x32xf32>, vector<8x32xf32> -> vector<8x32xf32>
      %165 = arith.addf %164, %9 : vector<8x32xf32>
      %166 = math.tanh %165 : vector<8x32xf32>
      %cst_65 = arith.constant dense<0.000000e+00> : vector<8x16xf32>
      %167 = tpu.matmul %166, %10, %cst_65 {dimension_numbers = #tpu.dot_dimension_numbers<[1], [0], [0], [1], [0, 0, 1, 1], [], []>} : vector<8x32xf32>, vector<32x16xf32>, vector<8x16xf32> -> vector<8x16xf32>
      %168 = arith.addf %167, %13 : vector<8x16xf32>
      %cst_66 = arith.constant 0.333333343 : f32
      %169 = arith.mulf %26, %cst_66 : f32
      %170 = vector.broadcast %169 : f32 to vector<8x16xf32>
      %171 = arith.mulf %170, %168 : vector<8x16xf32>
      %172 = arith.addf %156, %171 : vector<8x16xf32>
      %cst_67 = arith.constant 5.000000e-01 : f32
      %173 = arith.mulf %cst_67, %26 : f32
      %174 = vector.broadcast %173 : f32 to vector<8x16xf32>
      %175 = arith.mulf %174, %168 : vector<8x16xf32>
      %176 = arith.addf %144, %175 : vector<8x16xf32>
      %cst_68 = arith.constant dense<0.000000e+00> : vector<8x32xf32>
      %177 = tpu.matmul %176, %0, %cst_68 {dimension_numbers = #tpu.dot_dimension_numbers<[1], [0], [0], [1], [0, 0, 1, 1], [], []>} : vector<8x16xf32>, vector<16x32xf32>, vector<8x32xf32> -> vector<8x32xf32>
      %178 = arith.addf %177, %3 : vector<8x32xf32>
      %179 = math.tanh %178 : vector<8x32xf32>
      %cst_69 = arith.constant dense<0.000000e+00> : vector<8x32xf32>
      %180 = tpu.matmul %179, %5, %cst_69 {dimension_numbers = #tpu.dot_dimension_numbers<[1], [0], [0], [1], [0, 0, 1, 1], [], []>} : vector<8x32xf32>, vector<32x32xf32>, vector<8x32xf32> -> vector<8x32xf32>
      %181 = arith.addf %180, %9 : vector<8x32xf32>
      %182 = math.tanh %181 : vector<8x32xf32>
      %cst_70 = arith.constant dense<0.000000e+00> : vector<8x16xf32>
      %183 = tpu.matmul %182, %10, %cst_70 {dimension_numbers = #tpu.dot_dimension_numbers<[1], [0], [0], [1], [0, 0, 1, 1], [], []>} : vector<8x32xf32>, vector<32x16xf32>, vector<8x16xf32> -> vector<8x16xf32>
      %184 = arith.addf %183, %13 : vector<8x16xf32>
      %cst_71 = arith.constant 0.333333343 : f32
      %185 = arith.mulf %26, %cst_71 : f32
      %186 = vector.broadcast %185 : f32 to vector<8x16xf32>
      %187 = arith.mulf %186, %184 : vector<8x16xf32>
      %188 = arith.addf %172, %187 : vector<8x16xf32>
      %189 = vector.broadcast %26 : f32 to vector<8x16xf32>
      %190 = arith.mulf %189, %184 : vector<8x16xf32>
      %191 = arith.addf %144, %190 : vector<8x16xf32>
      %cst_72 = arith.constant dense<0.000000e+00> : vector<8x32xf32>
      %192 = tpu.matmul %191, %0, %cst_72 {dimension_numbers = #tpu.dot_dimension_numbers<[1], [0], [0], [1], [0, 0, 1, 1], [], []>} : vector<8x16xf32>, vector<16x32xf32>, vector<8x32xf32> -> vector<8x32xf32>
      %193 = arith.addf %192, %3 : vector<8x32xf32>
      %194 = math.tanh %193 : vector<8x32xf32>
      %cst_73 = arith.constant dense<0.000000e+00> : vector<8x32xf32>
      %195 = tpu.matmul %194, %5, %cst_73 {dimension_numbers = #tpu.dot_dimension_numbers<[1], [0], [0], [1], [0, 0, 1, 1], [], []>} : vector<8x32xf32>, vector<32x32xf32>, vector<8x32xf32> -> vector<8x32xf32>
      %196 = arith.addf %195, %9 : vector<8x32xf32>
      %197 = math.tanh %196 : vector<8x32xf32>
      %cst_74 = arith.constant dense<0.000000e+00> : vector<8x16xf32>
      %198 = tpu.matmul %197, %10, %cst_74 {dimension_numbers = #tpu.dot_dimension_numbers<[1], [0], [0], [1], [0, 0, 1, 1], [], []>} : vector<8x32xf32>, vector<32x16xf32>, vector<8x16xf32> -> vector<8x16xf32>
      %199 = arith.addf %198, %13 : vector<8x16xf32>
      %cst_75 = arith.constant 0.166666672 : f32
      %200 = arith.mulf %26, %cst_75 : f32
      %201 = vector.broadcast %200 : f32 to vector<8x16xf32>
      %202 = arith.mulf %201, %199 : vector<8x16xf32>
      %203 = arith.addf %188, %202 : vector<8x16xf32>
      %c3_i32 = arith.constant 3 : i32
      %cst_76 = arith.constant dense<0.000000e+00> : vector<8x32xf32>
      %204 = tpu.matmul %203, %0, %cst_76 {dimension_numbers = #tpu.dot_dimension_numbers<[1], [0], [0], [1], [0, 0, 1, 1], [], []>} : vector<8x16xf32>, vector<16x32xf32>, vector<8x32xf32> -> vector<8x32xf32>
      %205 = arith.addf %204, %3 : vector<8x32xf32>
      %206 = math.tanh %205 : vector<8x32xf32>
      %cst_77 = arith.constant dense<0.000000e+00> : vector<8x32xf32>
      %207 = tpu.matmul %206, %5, %cst_77 {dimension_numbers = #tpu.dot_dimension_numbers<[1], [0], [0], [1], [0, 0, 1, 1], [], []>} : vector<8x32xf32>, vector<32x32xf32>, vector<8x32xf32> -> vector<8x32xf32>
      %208 = arith.addf %207, %9 : vector<8x32xf32>
      %209 = math.tanh %208 : vector<8x32xf32>
      %cst_78 = arith.constant dense<0.000000e+00> : vector<8x16xf32>
      %210 = tpu.matmul %209, %10, %cst_78 {dimension_numbers = #tpu.dot_dimension_numbers<[1], [0], [0], [1], [0, 0, 1, 1], [], []>} : vector<8x32xf32>, vector<32x16xf32>, vector<8x16xf32> -> vector<8x16xf32>
      %211 = arith.addf %210, %13 : vector<8x16xf32>
      %cst_79 = arith.constant 0.166666672 : f32
      %212 = arith.mulf %26, %cst_79 : f32
      %213 = vector.broadcast %212 : f32 to vector<8x16xf32>
      %214 = arith.mulf %213, %211 : vector<8x16xf32>
      %215 = arith.addf %203, %214 : vector<8x16xf32>
      %cst_80 = arith.constant 5.000000e-01 : f32
      %216 = arith.mulf %cst_80, %26 : f32
      %217 = vector.broadcast %216 : f32 to vector<8x16xf32>
      %218 = arith.mulf %217, %211 : vector<8x16xf32>
      %219 = arith.addf %203, %218 : vector<8x16xf32>
      %cst_81 = arith.constant dense<0.000000e+00> : vector<8x32xf32>
      %220 = tpu.matmul %219, %0, %cst_81 {dimension_numbers = #tpu.dot_dimension_numbers<[1], [0], [0], [1], [0, 0, 1, 1], [], []>} : vector<8x16xf32>, vector<16x32xf32>, vector<8x32xf32> -> vector<8x32xf32>
      %221 = arith.addf %220, %3 : vector<8x32xf32>
      %222 = math.tanh %221 : vector<8x32xf32>
      %cst_82 = arith.constant dense<0.000000e+00> : vector<8x32xf32>
      %223 = tpu.matmul %222, %5, %cst_82 {dimension_numbers = #tpu.dot_dimension_numbers<[1], [0], [0], [1], [0, 0, 1, 1], [], []>} : vector<8x32xf32>, vector<32x32xf32>, vector<8x32xf32> -> vector<8x32xf32>
      %224 = arith.addf %223, %9 : vector<8x32xf32>
      %225 = math.tanh %224 : vector<8x32xf32>
      %cst_83 = arith.constant dense<0.000000e+00> : vector<8x16xf32>
      %226 = tpu.matmul %225, %10, %cst_83 {dimension_numbers = #tpu.dot_dimension_numbers<[1], [0], [0], [1], [0, 0, 1, 1], [], []>} : vector<8x32xf32>, vector<32x16xf32>, vector<8x16xf32> -> vector<8x16xf32>
      %227 = arith.addf %226, %13 : vector<8x16xf32>
      %cst_84 = arith.constant 0.333333343 : f32
      %228 = arith.mulf %26, %cst_84 : f32
      %229 = vector.broadcast %228 : f32 to vector<8x16xf32>
      %230 = arith.mulf %229, %227 : vector<8x16xf32>
      %231 = arith.addf %215, %230 : vector<8x16xf32>
      %cst_85 = arith.constant 5.000000e-01 : f32
      %232 = arith.mulf %cst_85, %26 : f32
      %233 = vector.broadcast %232 : f32 to vector<8x16xf32>
      %234 = arith.mulf %233, %227 : vector<8x16xf32>
      %235 = arith.addf %203, %234 : vector<8x16xf32>
      %cst_86 = arith.constant dense<0.000000e+00> : vector<8x32xf32>
      %236 = tpu.matmul %235, %0, %cst_86 {dimension_numbers = #tpu.dot_dimension_numbers<[1], [0], [0], [1], [0, 0, 1, 1], [], []>} : vector<8x16xf32>, vector<16x32xf32>, vector<8x32xf32> -> vector<8x32xf32>
      %237 = arith.addf %236, %3 : vector<8x32xf32>
      %238 = math.tanh %237 : vector<8x32xf32>
      %cst_87 = arith.constant dense<0.000000e+00> : vector<8x32xf32>
      %239 = tpu.matmul %238, %5, %cst_87 {dimension_numbers = #tpu.dot_dimension_numbers<[1], [0], [0], [1], [0, 0, 1, 1], [], []>} : vector<8x32xf32>, vector<32x32xf32>, vector<8x32xf32> -> vector<8x32xf32>
      %240 = arith.addf %239, %9 : vector<8x32xf32>
      %241 = math.tanh %240 : vector<8x32xf32>
      %cst_88 = arith.constant dense<0.000000e+00> : vector<8x16xf32>
      %242 = tpu.matmul %241, %10, %cst_88 {dimension_numbers = #tpu.dot_dimension_numbers<[1], [0], [0], [1], [0, 0, 1, 1], [], []>} : vector<8x32xf32>, vector<32x16xf32>, vector<8x16xf32> -> vector<8x16xf32>
      %243 = arith.addf %242, %13 : vector<8x16xf32>
      %cst_89 = arith.constant 0.333333343 : f32
      %244 = arith.mulf %26, %cst_89 : f32
      %245 = vector.broadcast %244 : f32 to vector<8x16xf32>
      %246 = arith.mulf %245, %243 : vector<8x16xf32>
      %247 = arith.addf %231, %246 : vector<8x16xf32>
      %248 = vector.broadcast %26 : f32 to vector<8x16xf32>
      %249 = arith.mulf %248, %243 : vector<8x16xf32>
      %250 = arith.addf %203, %249 : vector<8x16xf32>
      %cst_90 = arith.constant dense<0.000000e+00> : vector<8x32xf32>
      %251 = tpu.matmul %250, %0, %cst_90 {dimension_numbers = #tpu.dot_dimension_numbers<[1], [0], [0], [1], [0, 0, 1, 1], [], []>} : vector<8x16xf32>, vector<16x32xf32>, vector<8x32xf32> -> vector<8x32xf32>
      %252 = arith.addf %251, %3 : vector<8x32xf32>
      %253 = math.tanh %252 : vector<8x32xf32>
      %cst_91 = arith.constant dense<0.000000e+00> : vector<8x32xf32>
      %254 = tpu.matmul %253, %5, %cst_91 {dimension_numbers = #tpu.dot_dimension_numbers<[1], [0], [0], [1], [0, 0, 1, 1], [], []>} : vector<8x32xf32>, vector<32x32xf32>, vector<8x32xf32> -> vector<8x32xf32>
      %255 = arith.addf %254, %9 : vector<8x32xf32>
      %256 = math.tanh %255 : vector<8x32xf32>
      %cst_92 = arith.constant dense<0.000000e+00> : vector<8x16xf32>
      %257 = tpu.matmul %256, %10, %cst_92 {dimension_numbers = #tpu.dot_dimension_numbers<[1], [0], [0], [1], [0, 0, 1, 1], [], []>} : vector<8x32xf32>, vector<32x16xf32>, vector<8x16xf32> -> vector<8x16xf32>
      %258 = arith.addf %257, %13 : vector<8x16xf32>
      %cst_93 = arith.constant 0.166666672 : f32
      %259 = arith.mulf %26, %cst_93 : f32
      %260 = vector.broadcast %259 : f32 to vector<8x16xf32>
      %261 = arith.mulf %260, %258 : vector<8x16xf32>
      %262 = arith.addf %247, %261 : vector<8x16xf32>
      %c4_i32 = arith.constant 4 : i32
      %cst_94 = arith.constant dense<0.000000e+00> : vector<8x32xf32>
      %263 = tpu.matmul %262, %0, %cst_94 {dimension_numbers = #tpu.dot_dimension_numbers<[1], [0], [0], [1], [0, 0, 1, 1], [], []>} : vector<8x16xf32>, vector<16x32xf32>, vector<8x32xf32> -> vector<8x32xf32>
      %264 = arith.addf %263, %3 : vector<8x32xf32>
      %265 = math.tanh %264 : vector<8x32xf32>
      %cst_95 = arith.constant dense<0.000000e+00> : vector<8x32xf32>
      %266 = tpu.matmul %265, %5, %cst_95 {dimension_numbers = #tpu.dot_dimension_numbers<[1], [0], [0], [1], [0, 0, 1, 1], [], []>} : vector<8x32xf32>, vector<32x32xf32>, vector<8x32xf32> -> vector<8x32xf32>
      %267 = arith.addf %266, %9 : vector<8x32xf32>
      %268 = math.tanh %267 : vector<8x32xf32>
      %cst_96 = arith.constant dense<0.000000e+00> : vector<8x16xf32>
      %269 = tpu.matmul %268, %10, %cst_96 {dimension_numbers = #tpu.dot_dimension_numbers<[1], [0], [0], [1], [0, 0, 1, 1], [], []>} : vector<8x32xf32>, vector<32x16xf32>, vector<8x16xf32> -> vector<8x16xf32>
      %270 = arith.addf %269, %13 : vector<8x16xf32>
      %cst_97 = arith.constant 0.166666672 : f32
      %271 = arith.mulf %26, %cst_97 : f32
      %272 = vector.broadcast %271 : f32 to vector<8x16xf32>
      %273 = arith.mulf %272, %270 : vector<8x16xf32>
      %274 = arith.addf %262, %273 : vector<8x16xf32>
      %cst_98 = arith.constant 5.000000e-01 : f32
      %275 = arith.mulf %cst_98, %26 : f32
      %276 = vector.broadcast %275 : f32 to vector<8x16xf32>
      %277 = arith.mulf %276, %270 : vector<8x16xf32>
      %278 = arith.addf %262, %277 : vector<8x16xf32>
      %cst_99 = arith.constant dense<0.000000e+00> : vector<8x32xf32>
      %279 = tpu.matmul %278, %0, %cst_99 {dimension_numbers = #tpu.dot_dimension_numbers<[1], [0], [0], [1], [0, 0, 1, 1], [], []>} : vector<8x16xf32>, vector<16x32xf32>, vector<8x32xf32> -> vector<8x32xf32>
      %280 = arith.addf %279, %3 : vector<8x32xf32>
      %281 = math.tanh %280 : vector<8x32xf32>
      %cst_100 = arith.constant dense<0.000000e+00> : vector<8x32xf32>
      %282 = tpu.matmul %281, %5, %cst_100 {dimension_numbers = #tpu.dot_dimension_numbers<[1], [0], [0], [1], [0, 0, 1, 1], [], []>} : vector<8x32xf32>, vector<32x32xf32>, vector<8x32xf32> -> vector<8x32xf32>
      %283 = arith.addf %282, %9 : vector<8x32xf32>
      %284 = math.tanh %283 : vector<8x32xf32>
      %cst_101 = arith.constant dense<0.000000e+00> : vector<8x16xf32>
      %285 = tpu.matmul %284, %10, %cst_101 {dimension_numbers = #tpu.dot_dimension_numbers<[1], [0], [0], [1], [0, 0, 1, 1], [], []>} : vector<8x32xf32>, vector<32x16xf32>, vector<8x16xf32> -> vector<8x16xf32>
      %286 = arith.addf %285, %13 : vector<8x16xf32>
      %cst_102 = arith.constant 0.333333343 : f32
      %287 = arith.mulf %26, %cst_102 : f32
      %288 = vector.broadcast %287 : f32 to vector<8x16xf32>
      %289 = arith.mulf %288, %286 : vector<8x16xf32>
      %290 = arith.addf %274, %289 : vector<8x16xf32>
      %cst_103 = arith.constant 5.000000e-01 : f32
      %291 = arith.mulf %cst_103, %26 : f32
      %292 = vector.broadcast %291 : f32 to vector<8x16xf32>
      %293 = arith.mulf %292, %286 : vector<8x16xf32>
      %294 = arith.addf %262, %293 : vector<8x16xf32>
      %cst_104 = arith.constant dense<0.000000e+00> : vector<8x32xf32>
      %295 = tpu.matmul %294, %0, %cst_104 {dimension_numbers = #tpu.dot_dimension_numbers<[1], [0], [0], [1], [0, 0, 1, 1], [], []>} : vector<8x16xf32>, vector<16x32xf32>, vector<8x32xf32> -> vector<8x32xf32>
      %296 = arith.addf %295, %3 : vector<8x32xf32>
      %297 = math.tanh %296 : vector<8x32xf32>
      %cst_105 = arith.constant dense<0.000000e+00> : vector<8x32xf32>
      %298 = tpu.matmul %297, %5, %cst_105 {dimension_numbers = #tpu.dot_dimension_numbers<[1], [0], [0], [1], [0, 0, 1, 1], [], []>} : vector<8x32xf32>, vector<32x32xf32>, vector<8x32xf32> -> vector<8x32xf32>
      %299 = arith.addf %298, %9 : vector<8x32xf32>
      %300 = math.tanh %299 : vector<8x32xf32>
      %cst_106 = arith.constant dense<0.000000e+00> : vector<8x16xf32>
      %301 = tpu.matmul %300, %10, %cst_106 {dimension_numbers = #tpu.dot_dimension_numbers<[1], [0], [0], [1], [0, 0, 1, 1], [], []>} : vector<8x32xf32>, vector<32x16xf32>, vector<8x16xf32> -> vector<8x16xf32>
      %302 = arith.addf %301, %13 : vector<8x16xf32>
      %cst_107 = arith.constant 0.333333343 : f32
      %303 = arith.mulf %26, %cst_107 : f32
      %304 = vector.broadcast %303 : f32 to vector<8x16xf32>
      %305 = arith.mulf %304, %302 : vector<8x16xf32>
      %306 = arith.addf %290, %305 : vector<8x16xf32>
      %307 = vector.broadcast %26 : f32 to vector<8x16xf32>
      %308 = arith.mulf %307, %302 : vector<8x16xf32>
      %309 = arith.addf %262, %308 : vector<8x16xf32>
      %cst_108 = arith.constant dense<0.000000e+00> : vector<8x32xf32>
      %310 = tpu.matmul %309, %0, %cst_108 {dimension_numbers = #tpu.dot_dimension_numbers<[1], [0], [0], [1], [0, 0, 1, 1], [], []>} : vector<8x16xf32>, vector<16x32xf32>, vector<8x32xf32> -> vector<8x32xf32>
      %311 = arith.addf %310, %3 : vector<8x32xf32>
      %312 = math.tanh %311 : vector<8x32xf32>
      %cst_109 = arith.constant dense<0.000000e+00> : vector<8x32xf32>
      %313 = tpu.matmul %312, %5, %cst_109 {dimension_numbers = #tpu.dot_dimension_numbers<[1], [0], [0], [1], [0, 0, 1, 1], [], []>} : vector<8x32xf32>, vector<32x32xf32>, vector<8x32xf32> -> vector<8x32xf32>
      %314 = arith.addf %313, %9 : vector<8x32xf32>
      %315 = math.tanh %314 : vector<8x32xf32>
      %cst_110 = arith.constant dense<0.000000e+00> : vector<8x16xf32>
      %316 = tpu.matmul %315, %10, %cst_110 {dimension_numbers = #tpu.dot_dimension_numbers<[1], [0], [0], [1], [0, 0, 1, 1], [], []>} : vector<8x32xf32>, vector<32x16xf32>, vector<8x16xf32> -> vector<8x16xf32>
      %317 = arith.addf %316, %13 : vector<8x16xf32>
      %cst_111 = arith.constant 0.166666672 : f32
      %318 = arith.mulf %26, %cst_111 : f32
      %319 = vector.broadcast %318 : f32 to vector<8x16xf32>
      %320 = arith.mulf %319, %317 : vector<8x16xf32>
      %321 = arith.addf %306, %320 : vector<8x16xf32>
      %c5_i32 = arith.constant 5 : i32
      %cst_112 = arith.constant dense<0.000000e+00> : vector<8x32xf32>
      %322 = tpu.matmul %321, %0, %cst_112 {dimension_numbers = #tpu.dot_dimension_numbers<[1], [0], [0], [1], [0, 0, 1, 1], [], []>} : vector<8x16xf32>, vector<16x32xf32>, vector<8x32xf32> -> vector<8x32xf32>
      %323 = arith.addf %322, %3 : vector<8x32xf32>
      %324 = math.tanh %323 : vector<8x32xf32>
      %cst_113 = arith.constant dense<0.000000e+00> : vector<8x32xf32>
      %325 = tpu.matmul %324, %5, %cst_113 {dimension_numbers = #tpu.dot_dimension_numbers<[1], [0], [0], [1], [0, 0, 1, 1], [], []>} : vector<8x32xf32>, vector<32x32xf32>, vector<8x32xf32> -> vector<8x32xf32>
      %326 = arith.addf %325, %9 : vector<8x32xf32>
      %327 = math.tanh %326 : vector<8x32xf32>
      %cst_114 = arith.constant dense<0.000000e+00> : vector<8x16xf32>
      %328 = tpu.matmul %327, %10, %cst_114 {dimension_numbers = #tpu.dot_dimension_numbers<[1], [0], [0], [1], [0, 0, 1, 1], [], []>} : vector<8x32xf32>, vector<32x16xf32>, vector<8x16xf32> -> vector<8x16xf32>
      %329 = arith.addf %328, %13 : vector<8x16xf32>
      %cst_115 = arith.constant 0.166666672 : f32
      %330 = arith.mulf %26, %cst_115 : f32
      %331 = vector.broadcast %330 : f32 to vector<8x16xf32>
      %332 = arith.mulf %331, %329 : vector<8x16xf32>
      %333 = arith.addf %321, %332 : vector<8x16xf32>
      %cst_116 = arith.constant 5.000000e-01 : f32
      %334 = arith.mulf %cst_116, %26 : f32
      %335 = vector.broadcast %334 : f32 to vector<8x16xf32>
      %336 = arith.mulf %335, %329 : vector<8x16xf32>
      %337 = arith.addf %321, %336 : vector<8x16xf32>
      %cst_117 = arith.constant dense<0.000000e+00> : vector<8x32xf32>
      %338 = tpu.matmul %337, %0, %cst_117 {dimension_numbers = #tpu.dot_dimension_numbers<[1], [0], [0], [1], [0, 0, 1, 1], [], []>} : vector<8x16xf32>, vector<16x32xf32>, vector<8x32xf32> -> vector<8x32xf32>
      %339 = arith.addf %338, %3 : vector<8x32xf32>
      %340 = math.tanh %339 : vector<8x32xf32>
      %cst_118 = arith.constant dense<0.000000e+00> : vector<8x32xf32>
      %341 = tpu.matmul %340, %5, %cst_118 {dimension_numbers = #tpu.dot_dimension_numbers<[1], [0], [0], [1], [0, 0, 1, 1], [], []>} : vector<8x32xf32>, vector<32x32xf32>, vector<8x32xf32> -> vector<8x32xf32>
      %342 = arith.addf %341, %9 : vector<8x32xf32>
      %343 = math.tanh %342 : vector<8x32xf32>
      %cst_119 = arith.constant dense<0.000000e+00> : vector<8x16xf32>
      %344 = tpu.matmul %343, %10, %cst_119 {dimension_numbers = #tpu.dot_dimension_numbers<[1], [0], [0], [1], [0, 0, 1, 1], [], []>} : vector<8x32xf32>, vector<32x16xf32>, vector<8x16xf32> -> vector<8x16xf32>
      %345 = arith.addf %344, %13 : vector<8x16xf32>
      %cst_120 = arith.constant 0.333333343 : f32
      %346 = arith.mulf %26, %cst_120 : f32
      %347 = vector.broadcast %346 : f32 to vector<8x16xf32>
      %348 = arith.mulf %347, %345 : vector<8x16xf32>
      %349 = arith.addf %333, %348 : vector<8x16xf32>
      %cst_121 = arith.constant 5.000000e-01 : f32
      %350 = arith.mulf %cst_121, %26 : f32
      %351 = vector.broadcast %350 : f32 to vector<8x16xf32>
      %352 = arith.mulf %351, %345 : vector<8x16xf32>
      %353 = arith.addf %321, %352 : vector<8x16xf32>
      %cst_122 = arith.constant dense<0.000000e+00> : vector<8x32xf32>
      %354 = tpu.matmul %353, %0, %cst_122 {dimension_numbers = #tpu.dot_dimension_numbers<[1], [0], [0], [1], [0, 0, 1, 1], [], []>} : vector<8x16xf32>, vector<16x32xf32>, vector<8x32xf32> -> vector<8x32xf32>
      %355 = arith.addf %354, %3 : vector<8x32xf32>
      %356 = math.tanh %355 : vector<8x32xf32>
      %cst_123 = arith.constant dense<0.000000e+00> : vector<8x32xf32>
      %357 = tpu.matmul %356, %5, %cst_123 {dimension_numbers = #tpu.dot_dimension_numbers<[1], [0], [0], [1], [0, 0, 1, 1], [], []>} : vector<8x32xf32>, vector<32x32xf32>, vector<8x32xf32> -> vector<8x32xf32>
      %358 = arith.addf %357, %9 : vector<8x32xf32>
      %359 = math.tanh %358 : vector<8x32xf32>
      %cst_124 = arith.constant dense<0.000000e+00> : vector<8x16xf32>
      %360 = tpu.matmul %359, %10, %cst_124 {dimension_numbers = #tpu.dot_dimension_numbers<[1], [0], [0], [1], [0, 0, 1, 1], [], []>} : vector<8x32xf32>, vector<32x16xf32>, vector<8x16xf32> -> vector<8x16xf32>
      %361 = arith.addf %360, %13 : vector<8x16xf32>
      %cst_125 = arith.constant 0.333333343 : f32
      %362 = arith.mulf %26, %cst_125 : f32
      %363 = vector.broadcast %362 : f32 to vector<8x16xf32>
      %364 = arith.mulf %363, %361 : vector<8x16xf32>
      %365 = arith.addf %349, %364 : vector<8x16xf32>
      %366 = vector.broadcast %26 : f32 to vector<8x16xf32>
      %367 = arith.mulf %366, %361 : vector<8x16xf32>
      %368 = arith.addf %321, %367 : vector<8x16xf32>
      %cst_126 = arith.constant dense<0.000000e+00> : vector<8x32xf32>
      %369 = tpu.matmul %368, %0, %cst_126 {dimension_numbers = #tpu.dot_dimension_numbers<[1], [0], [0], [1], [0, 0, 1, 1], [], []>} : vector<8x16xf32>, vector<16x32xf32>, vector<8x32xf32> -> vector<8x32xf32>
      %370 = arith.addf %369, %3 : vector<8x32xf32>
      %371 = math.tanh %370 : vector<8x32xf32>
      %cst_127 = arith.constant dense<0.000000e+00> : vector<8x32xf32>
      %372 = tpu.matmul %371, %5, %cst_127 {dimension_numbers = #tpu.dot_dimension_numbers<[1], [0], [0], [1], [0, 0, 1, 1], [], []>} : vector<8x32xf32>, vector<32x32xf32>, vector<8x32xf32> -> vector<8x32xf32>
      %373 = arith.addf %372, %9 : vector<8x32xf32>
      %374 = math.tanh %373 : vector<8x32xf32>
      %cst_128 = arith.constant dense<0.000000e+00> : vector<8x16xf32>
      %375 = tpu.matmul %374, %10, %cst_128 {dimension_numbers = #tpu.dot_dimension_numbers<[1], [0], [0], [1], [0, 0, 1, 1], [], []>} : vector<8x32xf32>, vector<32x16xf32>, vector<8x16xf32> -> vector<8x16xf32>
      %376 = arith.addf %375, %13 : vector<8x16xf32>
      %cst_129 = arith.constant 0.166666672 : f32
      %377 = arith.mulf %26, %cst_129 : f32
      %378 = vector.broadcast %377 : f32 to vector<8x16xf32>
      %379 = arith.mulf %378, %376 : vector<8x16xf32>
      %380 = arith.addf %365, %379 : vector<8x16xf32>
      %c6_i32 = arith.constant 6 : i32
      %cst_130 = arith.constant dense<0.000000e+00> : vector<8x32xf32>
      %381 = tpu.matmul %380, %0, %cst_130 {dimension_numbers = #tpu.dot_dimension_numbers<[1], [0], [0], [1], [0, 0, 1, 1], [], []>} : vector<8x16xf32>, vector<16x32xf32>, vector<8x32xf32> -> vector<8x32xf32>
      %382 = arith.addf %381, %3 : vector<8x32xf32>
      %383 = math.tanh %382 : vector<8x32xf32>
      %cst_131 = arith.constant dense<0.000000e+00> : vector<8x32xf32>
      %384 = tpu.matmul %383, %5, %cst_131 {dimension_numbers = #tpu.dot_dimension_numbers<[1], [0], [0], [1], [0, 0, 1, 1], [], []>} : vector<8x32xf32>, vector<32x32xf32>, vector<8x32xf32> -> vector<8x32xf32>
      %385 = arith.addf %384, %9 : vector<8x32xf32>
      %386 = math.tanh %385 : vector<8x32xf32>
      %cst_132 = arith.constant dense<0.000000e+00> : vector<8x16xf32>
      %387 = tpu.matmul %386, %10, %cst_132 {dimension_numbers = #tpu.dot_dimension_numbers<[1], [0], [0], [1], [0, 0, 1, 1], [], []>} : vector<8x32xf32>, vector<32x16xf32>, vector<8x16xf32> -> vector<8x16xf32>
      %388 = arith.addf %387, %13 : vector<8x16xf32>
      %cst_133 = arith.constant 0.166666672 : f32
      %389 = arith.mulf %26, %cst_133 : f32
      %390 = vector.broadcast %389 : f32 to vector<8x16xf32>
      %391 = arith.mulf %390, %388 : vector<8x16xf32>
      %392 = arith.addf %380, %391 : vector<8x16xf32>
      %cst_134 = arith.constant 5.000000e-01 : f32
      %393 = arith.mulf %cst_134, %26 : f32
      %394 = vector.broadcast %393 : f32 to vector<8x16xf32>
      %395 = arith.mulf %394, %388 : vector<8x16xf32>
      %396 = arith.addf %380, %395 : vector<8x16xf32>
      %cst_135 = arith.constant dense<0.000000e+00> : vector<8x32xf32>
      %397 = tpu.matmul %396, %0, %cst_135 {dimension_numbers = #tpu.dot_dimension_numbers<[1], [0], [0], [1], [0, 0, 1, 1], [], []>} : vector<8x16xf32>, vector<16x32xf32>, vector<8x32xf32> -> vector<8x32xf32>
      %398 = arith.addf %397, %3 : vector<8x32xf32>
      %399 = math.tanh %398 : vector<8x32xf32>
      %cst_136 = arith.constant dense<0.000000e+00> : vector<8x32xf32>
      %400 = tpu.matmul %399, %5, %cst_136 {dimension_numbers = #tpu.dot_dimension_numbers<[1], [0], [0], [1], [0, 0, 1, 1], [], []>} : vector<8x32xf32>, vector<32x32xf32>, vector<8x32xf32> -> vector<8x32xf32>
      %401 = arith.addf %400, %9 : vector<8x32xf32>
      %402 = math.tanh %401 : vector<8x32xf32>
      %cst_137 = arith.constant dense<0.000000e+00> : vector<8x16xf32>
      %403 = tpu.matmul %402, %10, %cst_137 {dimension_numbers = #tpu.dot_dimension_numbers<[1], [0], [0], [1], [0, 0, 1, 1], [], []>} : vector<8x32xf32>, vector<32x16xf32>, vector<8x16xf32> -> vector<8x16xf32>
      %404 = arith.addf %403, %13 : vector<8x16xf32>
      %cst_138 = arith.constant 0.333333343 : f32
      %405 = arith.mulf %26, %cst_138 : f32
      %406 = vector.broadcast %405 : f32 to vector<8x16xf32>
      %407 = arith.mulf %406, %404 : vector<8x16xf32>
      %408 = arith.addf %392, %407 : vector<8x16xf32>
      %cst_139 = arith.constant 5.000000e-01 : f32
      %409 = arith.mulf %cst_139, %26 : f32
      %410 = vector.broadcast %409 : f32 to vector<8x16xf32>
      %411 = arith.mulf %410, %404 : vector<8x16xf32>
      %412 = arith.addf %380, %411 : vector<8x16xf32>
      %cst_140 = arith.constant dense<0.000000e+00> : vector<8x32xf32>
      %413 = tpu.matmul %412, %0, %cst_140 {dimension_numbers = #tpu.dot_dimension_numbers<[1], [0], [0], [1], [0, 0, 1, 1], [], []>} : vector<8x16xf32>, vector<16x32xf32>, vector<8x32xf32> -> vector<8x32xf32>
      %414 = arith.addf %413, %3 : vector<8x32xf32>
      %415 = math.tanh %414 : vector<8x32xf32>
      %cst_141 = arith.constant dense<0.000000e+00> : vector<8x32xf32>
      %416 = tpu.matmul %415, %5, %cst_141 {dimension_numbers = #tpu.dot_dimension_numbers<[1], [0], [0], [1], [0, 0, 1, 1], [], []>} : vector<8x32xf32>, vector<32x32xf32>, vector<8x32xf32> -> vector<8x32xf32>
      %417 = arith.addf %416, %9 : vector<8x32xf32>
      %418 = math.tanh %417 : vector<8x32xf32>
      %cst_142 = arith.constant dense<0.000000e+00> : vector<8x16xf32>
      %419 = tpu.matmul %418, %10, %cst_142 {dimension_numbers = #tpu.dot_dimension_numbers<[1], [0], [0], [1], [0, 0, 1, 1], [], []>} : vector<8x32xf32>, vector<32x16xf32>, vector<8x16xf32> -> vector<8x16xf32>
      %420 = arith.addf %419, %13 : vector<8x16xf32>
      %cst_143 = arith.constant 0.333333343 : f32
      %421 = arith.mulf %26, %cst_143 : f32
      %422 = vector.broadcast %421 : f32 to vector<8x16xf32>
      %423 = arith.mulf %422, %420 : vector<8x16xf32>
      %424 = arith.addf %408, %423 : vector<8x16xf32>
      %425 = vector.broadcast %26 : f32 to vector<8x16xf32>
      %426 = arith.mulf %425, %420 : vector<8x16xf32>
      %427 = arith.addf %380, %426 : vector<8x16xf32>
      %cst_144 = arith.constant dense<0.000000e+00> : vector<8x32xf32>
      %428 = tpu.matmul %427, %0, %cst_144 {dimension_numbers = #tpu.dot_dimension_numbers<[1], [0], [0], [1], [0, 0, 1, 1], [], []>} : vector<8x16xf32>, vector<16x32xf32>, vector<8x32xf32> -> vector<8x32xf32>
      %429 = arith.addf %428, %3 : vector<8x32xf32>
      %430 = math.tanh %429 : vector<8x32xf32>
      %cst_145 = arith.constant dense<0.000000e+00> : vector<8x32xf32>
      %431 = tpu.matmul %430, %5, %cst_145 {dimension_numbers = #tpu.dot_dimension_numbers<[1], [0], [0], [1], [0, 0, 1, 1], [], []>} : vector<8x32xf32>, vector<32x32xf32>, vector<8x32xf32> -> vector<8x32xf32>
      %432 = arith.addf %431, %9 : vector<8x32xf32>
      %433 = math.tanh %432 : vector<8x32xf32>
      %cst_146 = arith.constant dense<0.000000e+00> : vector<8x16xf32>
      %434 = tpu.matmul %433, %10, %cst_146 {dimension_numbers = #tpu.dot_dimension_numbers<[1], [0], [0], [1], [0, 0, 1, 1], [], []>} : vector<8x32xf32>, vector<32x16xf32>, vector<8x16xf32> -> vector<8x16xf32>
      %435 = arith.addf %434, %13 : vector<8x16xf32>
      %cst_147 = arith.constant 0.166666672 : f32
      %436 = arith.mulf %26, %cst_147 : f32
      %437 = vector.broadcast %436 : f32 to vector<8x16xf32>
      %438 = arith.mulf %437, %435 : vector<8x16xf32>
      %439 = arith.addf %424, %438 : vector<8x16xf32>
      %c7_i32_148 = arith.constant 7 : i32
      %cst_149 = arith.constant dense<0.000000e+00> : vector<8x32xf32>
      %440 = tpu.matmul %439, %0, %cst_149 {dimension_numbers = #tpu.dot_dimension_numbers<[1], [0], [0], [1], [0, 0, 1, 1], [], []>} : vector<8x16xf32>, vector<16x32xf32>, vector<8x32xf32> -> vector<8x32xf32>
      %441 = arith.addf %440, %3 : vector<8x32xf32>
      %442 = math.tanh %441 : vector<8x32xf32>
      %cst_150 = arith.constant dense<0.000000e+00> : vector<8x32xf32>
      %443 = tpu.matmul %442, %5, %cst_150 {dimension_numbers = #tpu.dot_dimension_numbers<[1], [0], [0], [1], [0, 0, 1, 1], [], []>} : vector<8x32xf32>, vector<32x32xf32>, vector<8x32xf32> -> vector<8x32xf32>
      %444 = arith.addf %443, %9 : vector<8x32xf32>
      %445 = math.tanh %444 : vector<8x32xf32>
      %cst_151 = arith.constant dense<0.000000e+00> : vector<8x16xf32>
      %446 = tpu.matmul %445, %10, %cst_151 {dimension_numbers = #tpu.dot_dimension_numbers<[1], [0], [0], [1], [0, 0, 1, 1], [], []>} : vector<8x32xf32>, vector<32x16xf32>, vector<8x16xf32> -> vector<8x16xf32>
      %447 = arith.addf %446, %13 : vector<8x16xf32>
      %cst_152 = arith.constant 0.166666672 : f32
      %448 = arith.mulf %26, %cst_152 : f32
      %449 = vector.broadcast %448 : f32 to vector<8x16xf32>
      %450 = arith.mulf %449, %447 : vector<8x16xf32>
      %451 = arith.addf %439, %450 : vector<8x16xf32>
      %cst_153 = arith.constant 5.000000e-01 : f32
      %452 = arith.mulf %cst_153, %26 : f32
      %453 = vector.broadcast %452 : f32 to vector<8x16xf32>
      %454 = arith.mulf %453, %447 : vector<8x16xf32>
      %455 = arith.addf %439, %454 : vector<8x16xf32>
      %cst_154 = arith.constant dense<0.000000e+00> : vector<8x32xf32>
      %456 = tpu.matmul %455, %0, %cst_154 {dimension_numbers = #tpu.dot_dimension_numbers<[1], [0], [0], [1], [0, 0, 1, 1], [], []>} : vector<8x16xf32>, vector<16x32xf32>, vector<8x32xf32> -> vector<8x32xf32>
      %457 = arith.addf %456, %3 : vector<8x32xf32>
      %458 = math.tanh %457 : vector<8x32xf32>
      %cst_155 = arith.constant dense<0.000000e+00> : vector<8x32xf32>
      %459 = tpu.matmul %458, %5, %cst_155 {dimension_numbers = #tpu.dot_dimension_numbers<[1], [0], [0], [1], [0, 0, 1, 1], [], []>} : vector<8x32xf32>, vector<32x32xf32>, vector<8x32xf32> -> vector<8x32xf32>
      %460 = arith.addf %459, %9 : vector<8x32xf32>
      %461 = math.tanh %460 : vector<8x32xf32>
      %cst_156 = arith.constant dense<0.000000e+00> : vector<8x16xf32>
      %462 = tpu.matmul %461, %10, %cst_156 {dimension_numbers = #tpu.dot_dimension_numbers<[1], [0], [0], [1], [0, 0, 1, 1], [], []>} : vector<8x32xf32>, vector<32x16xf32>, vector<8x16xf32> -> vector<8x16xf32>
      %463 = arith.addf %462, %13 : vector<8x16xf32>
      %cst_157 = arith.constant 0.333333343 : f32
      %464 = arith.mulf %26, %cst_157 : f32
      %465 = vector.broadcast %464 : f32 to vector<8x16xf32>
      %466 = arith.mulf %465, %463 : vector<8x16xf32>
      %467 = arith.addf %451, %466 : vector<8x16xf32>
      %cst_158 = arith.constant 5.000000e-01 : f32
      %468 = arith.mulf %cst_158, %26 : f32
      %469 = vector.broadcast %468 : f32 to vector<8x16xf32>
      %470 = arith.mulf %469, %463 : vector<8x16xf32>
      %471 = arith.addf %439, %470 : vector<8x16xf32>
      %cst_159 = arith.constant dense<0.000000e+00> : vector<8x32xf32>
      %472 = tpu.matmul %471, %0, %cst_159 {dimension_numbers = #tpu.dot_dimension_numbers<[1], [0], [0], [1], [0, 0, 1, 1], [], []>} : vector<8x16xf32>, vector<16x32xf32>, vector<8x32xf32> -> vector<8x32xf32>
      %473 = arith.addf %472, %3 : vector<8x32xf32>
      %474 = math.tanh %473 : vector<8x32xf32>
      %cst_160 = arith.constant dense<0.000000e+00> : vector<8x32xf32>
      %475 = tpu.matmul %474, %5, %cst_160 {dimension_numbers = #tpu.dot_dimension_numbers<[1], [0], [0], [1], [0, 0, 1, 1], [], []>} : vector<8x32xf32>, vector<32x32xf32>, vector<8x32xf32> -> vector<8x32xf32>
      %476 = arith.addf %475, %9 : vector<8x32xf32>
      %477 = math.tanh %476 : vector<8x32xf32>
      %cst_161 = arith.constant dense<0.000000e+00> : vector<8x16xf32>
      %478 = tpu.matmul %477, %10, %cst_161 {dimension_numbers = #tpu.dot_dimension_numbers<[1], [0], [0], [1], [0, 0, 1, 1], [], []>} : vector<8x32xf32>, vector<32x16xf32>, vector<8x16xf32> -> vector<8x16xf32>
      %479 = arith.addf %478, %13 : vector<8x16xf32>
      %cst_162 = arith.constant 0.333333343 : f32
      %480 = arith.mulf %26, %cst_162 : f32
      %481 = vector.broadcast %480 : f32 to vector<8x16xf32>
      %482 = arith.mulf %481, %479 : vector<8x16xf32>
      %483 = arith.addf %467, %482 : vector<8x16xf32>
      %484 = vector.broadcast %26 : f32 to vector<8x16xf32>
      %485 = arith.mulf %484, %479 : vector<8x16xf32>
      %486 = arith.addf %439, %485 : vector<8x16xf32>
      %cst_163 = arith.constant dense<0.000000e+00> : vector<8x32xf32>
      %487 = tpu.matmul %486, %0, %cst_163 {dimension_numbers = #tpu.dot_dimension_numbers<[1], [0], [0], [1], [0, 0, 1, 1], [], []>} : vector<8x16xf32>, vector<16x32xf32>, vector<8x32xf32> -> vector<8x32xf32>
      %488 = arith.addf %487, %3 : vector<8x32xf32>
      %489 = math.tanh %488 : vector<8x32xf32>
      %cst_164 = arith.constant dense<0.000000e+00> : vector<8x32xf32>
      %490 = tpu.matmul %489, %5, %cst_164 {dimension_numbers = #tpu.dot_dimension_numbers<[1], [0], [0], [1], [0, 0, 1, 1], [], []>} : vector<8x32xf32>, vector<32x32xf32>, vector<8x32xf32> -> vector<8x32xf32>
      %491 = arith.addf %490, %9 : vector<8x32xf32>
      %492 = math.tanh %491 : vector<8x32xf32>
      %cst_165 = arith.constant dense<0.000000e+00> : vector<8x16xf32>
      %493 = tpu.matmul %492, %10, %cst_165 {dimension_numbers = #tpu.dot_dimension_numbers<[1], [0], [0], [1], [0, 0, 1, 1], [], []>} : vector<8x32xf32>, vector<32x16xf32>, vector<8x16xf32> -> vector<8x16xf32>
      %494 = arith.addf %493, %13 : vector<8x16xf32>
      %cst_166 = arith.constant 0.166666672 : f32
      %495 = arith.mulf %26, %cst_166 : f32
      %496 = vector.broadcast %495 : f32 to vector<8x16xf32>
      %497 = arith.mulf %496, %494 : vector<8x16xf32>
      %498 = arith.addf %483, %497 : vector<8x16xf32>
      %c8_i32 = arith.constant 8 : i32
      %cst_167 = arith.constant dense<0.000000e+00> : vector<8x32xf32>
      %499 = tpu.matmul %498, %0, %cst_167 {dimension_numbers = #tpu.dot_dimension_numbers<[1], [0], [0], [1], [0, 0, 1, 1], [], []>} : vector<8x16xf32>, vector<16x32xf32>, vector<8x32xf32> -> vector<8x32xf32>
      %500 = arith.addf %499, %3 : vector<8x32xf32>
      %501 = math.tanh %500 : vector<8x32xf32>
      %cst_168 = arith.constant dense<0.000000e+00> : vector<8x32xf32>
      %502 = tpu.matmul %501, %5, %cst_168 {dimension_numbers = #tpu.dot_dimension_numbers<[1], [0], [0], [1], [0, 0, 1, 1], [], []>} : vector<8x32xf32>, vector<32x32xf32>, vector<8x32xf32> -> vector<8x32xf32>
      %503 = arith.addf %502, %9 : vector<8x32xf32>
      %504 = math.tanh %503 : vector<8x32xf32>
      %cst_169 = arith.constant dense<0.000000e+00> : vector<8x16xf32>
      %505 = tpu.matmul %504, %10, %cst_169 {dimension_numbers = #tpu.dot_dimension_numbers<[1], [0], [0], [1], [0, 0, 1, 1], [], []>} : vector<8x32xf32>, vector<32x16xf32>, vector<8x16xf32> -> vector<8x16xf32>
      %506 = arith.addf %505, %13 : vector<8x16xf32>
      %cst_170 = arith.constant 0.166666672 : f32
      %507 = arith.mulf %26, %cst_170 : f32
      %508 = vector.broadcast %507 : f32 to vector<8x16xf32>
      %509 = arith.mulf %508, %506 : vector<8x16xf32>
      %510 = arith.addf %498, %509 : vector<8x16xf32>
      %cst_171 = arith.constant 5.000000e-01 : f32
      %511 = arith.mulf %cst_171, %26 : f32
      %512 = vector.broadcast %511 : f32 to vector<8x16xf32>
      %513 = arith.mulf %512, %506 : vector<8x16xf32>
      %514 = arith.addf %498, %513 : vector<8x16xf32>
      %cst_172 = arith.constant dense<0.000000e+00> : vector<8x32xf32>
      %515 = tpu.matmul %514, %0, %cst_172 {dimension_numbers = #tpu.dot_dimension_numbers<[1], [0], [0], [1], [0, 0, 1, 1], [], []>} : vector<8x16xf32>, vector<16x32xf32>, vector<8x32xf32> -> vector<8x32xf32>
      %516 = arith.addf %515, %3 : vector<8x32xf32>
      %517 = math.tanh %516 : vector<8x32xf32>
      %cst_173 = arith.constant dense<0.000000e+00> : vector<8x32xf32>
      %518 = tpu.matmul %517, %5, %cst_173 {dimension_numbers = #tpu.dot_dimension_numbers<[1], [0], [0], [1], [0, 0, 1, 1], [], []>} : vector<8x32xf32>, vector<32x32xf32>, vector<8x32xf32> -> vector<8x32xf32>
      %519 = arith.addf %518, %9 : vector<8x32xf32>
      %520 = math.tanh %519 : vector<8x32xf32>
      %cst_174 = arith.constant dense<0.000000e+00> : vector<8x16xf32>
      %521 = tpu.matmul %520, %10, %cst_174 {dimension_numbers = #tpu.dot_dimension_numbers<[1], [0], [0], [1], [0, 0, 1, 1], [], []>} : vector<8x32xf32>, vector<32x16xf32>, vector<8x16xf32> -> vector<8x16xf32>
      %522 = arith.addf %521, %13 : vector<8x16xf32>
      %cst_175 = arith.constant 0.333333343 : f32
      %523 = arith.mulf %26, %cst_175 : f32
      %524 = vector.broadcast %523 : f32 to vector<8x16xf32>
      %525 = arith.mulf %524, %522 : vector<8x16xf32>
      %526 = arith.addf %510, %525 : vector<8x16xf32>
      %cst_176 = arith.constant 5.000000e-01 : f32
      %527 = arith.mulf %cst_176, %26 : f32
      %528 = vector.broadcast %527 : f32 to vector<8x16xf32>
      %529 = arith.mulf %528, %522 : vector<8x16xf32>
      %530 = arith.addf %498, %529 : vector<8x16xf32>
      %cst_177 = arith.constant dense<0.000000e+00> : vector<8x32xf32>
      %531 = tpu.matmul %530, %0, %cst_177 {dimension_numbers = #tpu.dot_dimension_numbers<[1], [0], [0], [1], [0, 0, 1, 1], [], []>} : vector<8x16xf32>, vector<16x32xf32>, vector<8x32xf32> -> vector<8x32xf32>
      %532 = arith.addf %531, %3 : vector<8x32xf32>
      %533 = math.tanh %532 : vector<8x32xf32>
      %cst_178 = arith.constant dense<0.000000e+00> : vector<8x32xf32>
      %534 = tpu.matmul %533, %5, %cst_178 {dimension_numbers = #tpu.dot_dimension_numbers<[1], [0], [0], [1], [0, 0, 1, 1], [], []>} : vector<8x32xf32>, vector<32x32xf32>, vector<8x32xf32> -> vector<8x32xf32>
      %535 = arith.addf %534, %9 : vector<8x32xf32>
      %536 = math.tanh %535 : vector<8x32xf32>
      %cst_179 = arith.constant dense<0.000000e+00> : vector<8x16xf32>
      %537 = tpu.matmul %536, %10, %cst_179 {dimension_numbers = #tpu.dot_dimension_numbers<[1], [0], [0], [1], [0, 0, 1, 1], [], []>} : vector<8x32xf32>, vector<32x16xf32>, vector<8x16xf32> -> vector<8x16xf32>
      %538 = arith.addf %537, %13 : vector<8x16xf32>
      %cst_180 = arith.constant 0.333333343 : f32
      %539 = arith.mulf %26, %cst_180 : f32
      %540 = vector.broadcast %539 : f32 to vector<8x16xf32>
      %541 = arith.mulf %540, %538 : vector<8x16xf32>
      %542 = arith.addf %526, %541 : vector<8x16xf32>
      %543 = vector.broadcast %26 : f32 to vector<8x16xf32>
      %544 = arith.mulf %543, %538 : vector<8x16xf32>
      %545 = arith.addf %498, %544 : vector<8x16xf32>
      %cst_181 = arith.constant dense<0.000000e+00> : vector<8x32xf32>
      %546 = tpu.matmul %545, %0, %cst_181 {dimension_numbers = #tpu.dot_dimension_numbers<[1], [0], [0], [1], [0, 0, 1, 1], [], []>} : vector<8x16xf32>, vector<16x32xf32>, vector<8x32xf32> -> vector<8x32xf32>
      %547 = arith.addf %546, %3 : vector<8x32xf32>
      %548 = math.tanh %547 : vector<8x32xf32>
      %cst_182 = arith.constant dense<0.000000e+00> : vector<8x32xf32>
      %549 = tpu.matmul %548, %5, %cst_182 {dimension_numbers = #tpu.dot_dimension_numbers<[1], [0], [0], [1], [0, 0, 1, 1], [], []>} : vector<8x32xf32>, vector<32x32xf32>, vector<8x32xf32> -> vector<8x32xf32>
      %550 = arith.addf %549, %9 : vector<8x32xf32>
      %551 = math.tanh %550 : vector<8x32xf32>
      %cst_183 = arith.constant dense<0.000000e+00> : vector<8x16xf32>
      %552 = tpu.matmul %551, %10, %cst_183 {dimension_numbers = #tpu.dot_dimension_numbers<[1], [0], [0], [1], [0, 0, 1, 1], [], []>} : vector<8x32xf32>, vector<32x16xf32>, vector<8x16xf32> -> vector<8x16xf32>
      %553 = arith.addf %552, %13 : vector<8x16xf32>
      %cst_184 = arith.constant 0.166666672 : f32
      %554 = arith.mulf %26, %cst_184 : f32
      %555 = vector.broadcast %554 : f32 to vector<8x16xf32>
      %556 = arith.mulf %555, %553 : vector<8x16xf32>
      %557 = arith.addf %542, %556 : vector<8x16xf32>
      %c9_i32 = arith.constant 9 : i32
      %cst_185 = arith.constant dense<0.000000e+00> : vector<8x32xf32>
      %558 = tpu.matmul %557, %0, %cst_185 {dimension_numbers = #tpu.dot_dimension_numbers<[1], [0], [0], [1], [0, 0, 1, 1], [], []>} : vector<8x16xf32>, vector<16x32xf32>, vector<8x32xf32> -> vector<8x32xf32>
      %559 = arith.addf %558, %3 : vector<8x32xf32>
      %560 = math.tanh %559 : vector<8x32xf32>
      %cst_186 = arith.constant dense<0.000000e+00> : vector<8x32xf32>
      %561 = tpu.matmul %560, %5, %cst_186 {dimension_numbers = #tpu.dot_dimension_numbers<[1], [0], [0], [1], [0, 0, 1, 1], [], []>} : vector<8x32xf32>, vector<32x32xf32>, vector<8x32xf32> -> vector<8x32xf32>
      %562 = arith.addf %561, %9 : vector<8x32xf32>
      %563 = math.tanh %562 : vector<8x32xf32>
      %cst_187 = arith.constant dense<0.000000e+00> : vector<8x16xf32>
      %564 = tpu.matmul %563, %10, %cst_187 {dimension_numbers = #tpu.dot_dimension_numbers<[1], [0], [0], [1], [0, 0, 1, 1], [], []>} : vector<8x32xf32>, vector<32x16xf32>, vector<8x16xf32> -> vector<8x16xf32>
      %565 = arith.addf %564, %13 : vector<8x16xf32>
      %cst_188 = arith.constant 0.166666672 : f32
      %566 = arith.mulf %26, %cst_188 : f32
      %567 = vector.broadcast %566 : f32 to vector<8x16xf32>
      %568 = arith.mulf %567, %565 : vector<8x16xf32>
      %569 = arith.addf %557, %568 : vector<8x16xf32>
      %cst_189 = arith.constant 5.000000e-01 : f32
      %570 = arith.mulf %cst_189, %26 : f32
      %571 = vector.broadcast %570 : f32 to vector<8x16xf32>
      %572 = arith.mulf %571, %565 : vector<8x16xf32>
      %573 = arith.addf %557, %572 : vector<8x16xf32>
      %cst_190 = arith.constant dense<0.000000e+00> : vector<8x32xf32>
      %574 = tpu.matmul %573, %0, %cst_190 {dimension_numbers = #tpu.dot_dimension_numbers<[1], [0], [0], [1], [0, 0, 1, 1], [], []>} : vector<8x16xf32>, vector<16x32xf32>, vector<8x32xf32> -> vector<8x32xf32>
      %575 = arith.addf %574, %3 : vector<8x32xf32>
      %576 = math.tanh %575 : vector<8x32xf32>
      %cst_191 = arith.constant dense<0.000000e+00> : vector<8x32xf32>
      %577 = tpu.matmul %576, %5, %cst_191 {dimension_numbers = #tpu.dot_dimension_numbers<[1], [0], [0], [1], [0, 0, 1, 1], [], []>} : vector<8x32xf32>, vector<32x32xf32>, vector<8x32xf32> -> vector<8x32xf32>
      %578 = arith.addf %577, %9 : vector<8x32xf32>
      %579 = math.tanh %578 : vector<8x32xf32>
      %cst_192 = arith.constant dense<0.000000e+00> : vector<8x16xf32>
      %580 = tpu.matmul %579, %10, %cst_192 {dimension_numbers = #tpu.dot_dimension_numbers<[1], [0], [0], [1], [0, 0, 1, 1], [], []>} : vector<8x32xf32>, vector<32x16xf32>, vector<8x16xf32> -> vector<8x16xf32>
      %581 = arith.addf %580, %13 : vector<8x16xf32>
      %cst_193 = arith.constant 0.333333343 : f32
      %582 = arith.mulf %26, %cst_193 : f32
      %583 = vector.broadcast %582 : f32 to vector<8x16xf32>
      %584 = arith.mulf %583, %581 : vector<8x16xf32>
      %585 = arith.addf %569, %584 : vector<8x16xf32>
      %cst_194 = arith.constant 5.000000e-01 : f32
      %586 = arith.mulf %cst_194, %26 : f32
      %587 = vector.broadcast %586 : f32 to vector<8x16xf32>
      %588 = arith.mulf %587, %581 : vector<8x16xf32>
      %589 = arith.addf %557, %588 : vector<8x16xf32>
      %cst_195 = arith.constant dense<0.000000e+00> : vector<8x32xf32>
      %590 = tpu.matmul %589, %0, %cst_195 {dimension_numbers = #tpu.dot_dimension_numbers<[1], [0], [0], [1], [0, 0, 1, 1], [], []>} : vector<8x16xf32>, vector<16x32xf32>, vector<8x32xf32> -> vector<8x32xf32>
      %591 = arith.addf %590, %3 : vector<8x32xf32>
      %592 = math.tanh %591 : vector<8x32xf32>
      %cst_196 = arith.constant dense<0.000000e+00> : vector<8x32xf32>
      %593 = tpu.matmul %592, %5, %cst_196 {dimension_numbers = #tpu.dot_dimension_numbers<[1], [0], [0], [1], [0, 0, 1, 1], [], []>} : vector<8x32xf32>, vector<32x32xf32>, vector<8x32xf32> -> vector<8x32xf32>
      %594 = arith.addf %593, %9 : vector<8x32xf32>
      %595 = math.tanh %594 : vector<8x32xf32>
      %cst_197 = arith.constant dense<0.000000e+00> : vector<8x16xf32>
      %596 = tpu.matmul %595, %10, %cst_197 {dimension_numbers = #tpu.dot_dimension_numbers<[1], [0], [0], [1], [0, 0, 1, 1], [], []>} : vector<8x32xf32>, vector<32x16xf32>, vector<8x16xf32> -> vector<8x16xf32>
      %597 = arith.addf %596, %13 : vector<8x16xf32>
      %cst_198 = arith.constant 0.333333343 : f32
      %598 = arith.mulf %26, %cst_198 : f32
      %599 = vector.broadcast %598 : f32 to vector<8x16xf32>
      %600 = arith.mulf %599, %597 : vector<8x16xf32>
      %601 = arith.addf %585, %600 : vector<8x16xf32>
      %602 = vector.broadcast %26 : f32 to vector<8x16xf32>
      %603 = arith.mulf %602, %597 : vector<8x16xf32>
      %604 = arith.addf %557, %603 : vector<8x16xf32>
      %cst_199 = arith.constant dense<0.000000e+00> : vector<8x32xf32>
      %605 = tpu.matmul %604, %0, %cst_199 {dimension_numbers = #tpu.dot_dimension_numbers<[1], [0], [0], [1], [0, 0, 1, 1], [], []>} : vector<8x16xf32>, vector<16x32xf32>, vector<8x32xf32> -> vector<8x32xf32>
      %606 = arith.addf %605, %3 : vector<8x32xf32>
      %607 = math.tanh %606 : vector<8x32xf32>
      %cst_200 = arith.constant dense<0.000000e+00> : vector<8x32xf32>
      %608 = tpu.matmul %607, %5, %cst_200 {dimension_numbers = #tpu.dot_dimension_numbers<[1], [0], [0], [1], [0, 0, 1, 1], [], []>} : vector<8x32xf32>, vector<32x32xf32>, vector<8x32xf32> -> vector<8x32xf32>
      %609 = arith.addf %608, %9 : vector<8x32xf32>
      %610 = math.tanh %609 : vector<8x32xf32>
      %cst_201 = arith.constant dense<0.000000e+00> : vector<8x16xf32>
      %611 = tpu.matmul %610, %10, %cst_201 {dimension_numbers = #tpu.dot_dimension_numbers<[1], [0], [0], [1], [0, 0, 1, 1], [], []>} : vector<8x32xf32>, vector<32x16xf32>, vector<8x16xf32> -> vector<8x16xf32>
      %612 = arith.addf %611, %13 : vector<8x16xf32>
      %cst_202 = arith.constant 0.166666672 : f32
      %613 = arith.mulf %26, %cst_202 : f32
      %614 = vector.broadcast %613 : f32 to vector<8x16xf32>
      %615 = arith.mulf %614, %612 : vector<8x16xf32>
      %616 = arith.addf %601, %615 : vector<8x16xf32>
      %c10_i32 = arith.constant 10 : i32
      %cst_203 = arith.constant dense<0.000000e+00> : vector<8x32xf32>
      %617 = tpu.matmul %616, %0, %cst_203 {dimension_numbers = #tpu.dot_dimension_numbers<[1], [0], [0], [1], [0, 0, 1, 1], [], []>} : vector<8x16xf32>, vector<16x32xf32>, vector<8x32xf32> -> vector<8x32xf32>
      %618 = arith.addf %617, %3 : vector<8x32xf32>
      %619 = math.tanh %618 : vector<8x32xf32>
      %cst_204 = arith.constant dense<0.000000e+00> : vector<8x32xf32>
      %620 = tpu.matmul %619, %5, %cst_204 {dimension_numbers = #tpu.dot_dimension_numbers<[1], [0], [0], [1], [0, 0, 1, 1], [], []>} : vector<8x32xf32>, vector<32x32xf32>, vector<8x32xf32> -> vector<8x32xf32>
      %621 = arith.addf %620, %9 : vector<8x32xf32>
      %622 = math.tanh %621 : vector<8x32xf32>
      %cst_205 = arith.constant dense<0.000000e+00> : vector<8x16xf32>
      %623 = tpu.matmul %622, %10, %cst_205 {dimension_numbers = #tpu.dot_dimension_numbers<[1], [0], [0], [1], [0, 0, 1, 1], [], []>} : vector<8x32xf32>, vector<32x16xf32>, vector<8x16xf32> -> vector<8x16xf32>
      %624 = arith.addf %623, %13 : vector<8x16xf32>
      %cst_206 = arith.constant 0.166666672 : f32
      %625 = arith.mulf %26, %cst_206 : f32
      %626 = vector.broadcast %625 : f32 to vector<8x16xf32>
      %627 = arith.mulf %626, %624 : vector<8x16xf32>
      %628 = arith.addf %616, %627 : vector<8x16xf32>
      %cst_207 = arith.constant 5.000000e-01 : f32
      %629 = arith.mulf %cst_207, %26 : f32
      %630 = vector.broadcast %629 : f32 to vector<8x16xf32>
      %631 = arith.mulf %630, %624 : vector<8x16xf32>
      %632 = arith.addf %616, %631 : vector<8x16xf32>
      %cst_208 = arith.constant dense<0.000000e+00> : vector<8x32xf32>
      %633 = tpu.matmul %632, %0, %cst_208 {dimension_numbers = #tpu.dot_dimension_numbers<[1], [0], [0], [1], [0, 0, 1, 1], [], []>} : vector<8x16xf32>, vector<16x32xf32>, vector<8x32xf32> -> vector<8x32xf32>
      %634 = arith.addf %633, %3 : vector<8x32xf32>
      %635 = math.tanh %634 : vector<8x32xf32>
      %cst_209 = arith.constant dense<0.000000e+00> : vector<8x32xf32>
      %636 = tpu.matmul %635, %5, %cst_209 {dimension_numbers = #tpu.dot_dimension_numbers<[1], [0], [0], [1], [0, 0, 1, 1], [], []>} : vector<8x32xf32>, vector<32x32xf32>, vector<8x32xf32> -> vector<8x32xf32>
      %637 = arith.addf %636, %9 : vector<8x32xf32>
      %638 = math.tanh %637 : vector<8x32xf32>
      %cst_210 = arith.constant dense<0.000000e+00> : vector<8x16xf32>
      %639 = tpu.matmul %638, %10, %cst_210 {dimension_numbers = #tpu.dot_dimension_numbers<[1], [0], [0], [1], [0, 0, 1, 1], [], []>} : vector<8x32xf32>, vector<32x16xf32>, vector<8x16xf32> -> vector<8x16xf32>
      %640 = arith.addf %639, %13 : vector<8x16xf32>
      %cst_211 = arith.constant 0.333333343 : f32
      %641 = arith.mulf %26, %cst_211 : f32
      %642 = vector.broadcast %641 : f32 to vector<8x16xf32>
      %643 = arith.mulf %642, %640 : vector<8x16xf32>
      %644 = arith.addf %628, %643 : vector<8x16xf32>
      %cst_212 = arith.constant 5.000000e-01 : f32
      %645 = arith.mulf %cst_212, %26 : f32
      %646 = vector.broadcast %645 : f32 to vector<8x16xf32>
      %647 = arith.mulf %646, %640 : vector<8x16xf32>
      %648 = arith.addf %616, %647 : vector<8x16xf32>
      %cst_213 = arith.constant dense<0.000000e+00> : vector<8x32xf32>
      %649 = tpu.matmul %648, %0, %cst_213 {dimension_numbers = #tpu.dot_dimension_numbers<[1], [0], [0], [1], [0, 0, 1, 1], [], []>} : vector<8x16xf32>, vector<16x32xf32>, vector<8x32xf32> -> vector<8x32xf32>
      %650 = arith.addf %649, %3 : vector<8x32xf32>
      %651 = math.tanh %650 : vector<8x32xf32>
      %cst_214 = arith.constant dense<0.000000e+00> : vector<8x32xf32>
      %652 = tpu.matmul %651, %5, %cst_214 {dimension_numbers = #tpu.dot_dimension_numbers<[1], [0], [0], [1], [0, 0, 1, 1], [], []>} : vector<8x32xf32>, vector<32x32xf32>, vector<8x32xf32> -> vector<8x32xf32>
      %653 = arith.addf %652, %9 : vector<8x32xf32>
      %654 = math.tanh %653 : vector<8x32xf32>
      %cst_215 = arith.constant dense<0.000000e+00> : vector<8x16xf32>
      %655 = tpu.matmul %654, %10, %cst_215 {dimension_numbers = #tpu.dot_dimension_numbers<[1], [0], [0], [1], [0, 0, 1, 1], [], []>} : vector<8x32xf32>, vector<32x16xf32>, vector<8x16xf32> -> vector<8x16xf32>
      %656 = arith.addf %655, %13 : vector<8x16xf32>
      %cst_216 = arith.constant 0.333333343 : f32
      %657 = arith.mulf %26, %cst_216 : f32
      %658 = vector.broadcast %657 : f32 to vector<8x16xf32>
      %659 = arith.mulf %658, %656 : vector<8x16xf32>
      %660 = arith.addf %644, %659 : vector<8x16xf32>
      %661 = vector.broadcast %26 : f32 to vector<8x16xf32>
      %662 = arith.mulf %661, %656 : vector<8x16xf32>
      %663 = arith.addf %616, %662 : vector<8x16xf32>
      %cst_217 = arith.constant dense<0.000000e+00> : vector<8x32xf32>
      %664 = tpu.matmul %663, %0, %cst_217 {dimension_numbers = #tpu.dot_dimension_numbers<[1], [0], [0], [1], [0, 0, 1, 1], [], []>} : vector<8x16xf32>, vector<16x32xf32>, vector<8x32xf32> -> vector<8x32xf32>
      %665 = arith.addf %664, %3 : vector<8x32xf32>
      %666 = math.tanh %665 : vector<8x32xf32>
      %cst_218 = arith.constant dense<0.000000e+00> : vector<8x32xf32>
      %667 = tpu.matmul %666, %5, %cst_218 {dimension_numbers = #tpu.dot_dimension_numbers<[1], [0], [0], [1], [0, 0, 1, 1], [], []>} : vector<8x32xf32>, vector<32x32xf32>, vector<8x32xf32> -> vector<8x32xf32>
      %668 = arith.addf %667, %9 : vector<8x32xf32>
      %669 = math.tanh %668 : vector<8x32xf32>
      %cst_219 = arith.constant dense<0.000000e+00> : vector<8x16xf32>
      %670 = tpu.matmul %669, %10, %cst_219 {dimension_numbers = #tpu.dot_dimension_numbers<[1], [0], [0], [1], [0, 0, 1, 1], [], []>} : vector<8x32xf32>, vector<32x16xf32>, vector<8x16xf32> -> vector<8x16xf32>
      %671 = arith.addf %670, %13 : vector<8x16xf32>
      %cst_220 = arith.constant 0.166666672 : f32
      %672 = arith.mulf %26, %cst_220 : f32
      %673 = vector.broadcast %672 : f32 to vector<8x16xf32>
      %674 = arith.mulf %673, %671 : vector<8x16xf32>
      %675 = arith.addf %660, %674 : vector<8x16xf32>
      %c11_i32 = arith.constant 11 : i32
      %cst_221 = arith.constant dense<0.000000e+00> : vector<8x32xf32>
      %676 = tpu.matmul %675, %0, %cst_221 {dimension_numbers = #tpu.dot_dimension_numbers<[1], [0], [0], [1], [0, 0, 1, 1], [], []>} : vector<8x16xf32>, vector<16x32xf32>, vector<8x32xf32> -> vector<8x32xf32>
      %677 = arith.addf %676, %3 : vector<8x32xf32>
      %678 = math.tanh %677 : vector<8x32xf32>
      %cst_222 = arith.constant dense<0.000000e+00> : vector<8x32xf32>
      %679 = tpu.matmul %678, %5, %cst_222 {dimension_numbers = #tpu.dot_dimension_numbers<[1], [0], [0], [1], [0, 0, 1, 1], [], []>} : vector<8x32xf32>, vector<32x32xf32>, vector<8x32xf32> -> vector<8x32xf32>
      %680 = arith.addf %679, %9 : vector<8x32xf32>
      %681 = math.tanh %680 : vector<8x32xf32>
      %cst_223 = arith.constant dense<0.000000e+00> : vector<8x16xf32>
      %682 = tpu.matmul %681, %10, %cst_223 {dimension_numbers = #tpu.dot_dimension_numbers<[1], [0], [0], [1], [0, 0, 1, 1], [], []>} : vector<8x32xf32>, vector<32x16xf32>, vector<8x16xf32> -> vector<8x16xf32>
      %683 = arith.addf %682, %13 : vector<8x16xf32>
      %cst_224 = arith.constant 0.166666672 : f32
      %684 = arith.mulf %26, %cst_224 : f32
      %685 = vector.broadcast %684 : f32 to vector<8x16xf32>
      %686 = arith.mulf %685, %683 : vector<8x16xf32>
      %687 = arith.addf %675, %686 : vector<8x16xf32>
      %cst_225 = arith.constant 5.000000e-01 : f32
      %688 = arith.mulf %cst_225, %26 : f32
      %689 = vector.broadcast %688 : f32 to vector<8x16xf32>
      %690 = arith.mulf %689, %683 : vector<8x16xf32>
      %691 = arith.addf %675, %690 : vector<8x16xf32>
      %cst_226 = arith.constant dense<0.000000e+00> : vector<8x32xf32>
      %692 = tpu.matmul %691, %0, %cst_226 {dimension_numbers = #tpu.dot_dimension_numbers<[1], [0], [0], [1], [0, 0, 1, 1], [], []>} : vector<8x16xf32>, vector<16x32xf32>, vector<8x32xf32> -> vector<8x32xf32>
      %693 = arith.addf %692, %3 : vector<8x32xf32>
      %694 = math.tanh %693 : vector<8x32xf32>
      %cst_227 = arith.constant dense<0.000000e+00> : vector<8x32xf32>
      %695 = tpu.matmul %694, %5, %cst_227 {dimension_numbers = #tpu.dot_dimension_numbers<[1], [0], [0], [1], [0, 0, 1, 1], [], []>} : vector<8x32xf32>, vector<32x32xf32>, vector<8x32xf32> -> vector<8x32xf32>
      %696 = arith.addf %695, %9 : vector<8x32xf32>
      %697 = math.tanh %696 : vector<8x32xf32>
      %cst_228 = arith.constant dense<0.000000e+00> : vector<8x16xf32>
      %698 = tpu.matmul %697, %10, %cst_228 {dimension_numbers = #tpu.dot_dimension_numbers<[1], [0], [0], [1], [0, 0, 1, 1], [], []>} : vector<8x32xf32>, vector<32x16xf32>, vector<8x16xf32> -> vector<8x16xf32>
      %699 = arith.addf %698, %13 : vector<8x16xf32>
      %cst_229 = arith.constant 0.333333343 : f32
      %700 = arith.mulf %26, %cst_229 : f32
      %701 = vector.broadcast %700 : f32 to vector<8x16xf32>
      %702 = arith.mulf %701, %699 : vector<8x16xf32>
      %703 = arith.addf %687, %702 : vector<8x16xf32>
      %cst_230 = arith.constant 5.000000e-01 : f32
      %704 = arith.mulf %cst_230, %26 : f32
      %705 = vector.broadcast %704 : f32 to vector<8x16xf32>
      %706 = arith.mulf %705, %699 : vector<8x16xf32>
      %707 = arith.addf %675, %706 : vector<8x16xf32>
      %cst_231 = arith.constant dense<0.000000e+00> : vector<8x32xf32>
      %708 = tpu.matmul %707, %0, %cst_231 {dimension_numbers = #tpu.dot_dimension_numbers<[1], [0], [0], [1], [0, 0, 1, 1], [], []>} : vector<8x16xf32>, vector<16x32xf32>, vector<8x32xf32> -> vector<8x32xf32>
      %709 = arith.addf %708, %3 : vector<8x32xf32>
      %710 = math.tanh %709 : vector<8x32xf32>
      %cst_232 = arith.constant dense<0.000000e+00> : vector<8x32xf32>
      %711 = tpu.matmul %710, %5, %cst_232 {dimension_numbers = #tpu.dot_dimension_numbers<[1], [0], [0], [1], [0, 0, 1, 1], [], []>} : vector<8x32xf32>, vector<32x32xf32>, vector<8x32xf32> -> vector<8x32xf32>
      %712 = arith.addf %711, %9 : vector<8x32xf32>
      %713 = math.tanh %712 : vector<8x32xf32>
      %cst_233 = arith.constant dense<0.000000e+00> : vector<8x16xf32>
      %714 = tpu.matmul %713, %10, %cst_233 {dimension_numbers = #tpu.dot_dimension_numbers<[1], [0], [0], [1], [0, 0, 1, 1], [], []>} : vector<8x32xf32>, vector<32x16xf32>, vector<8x16xf32> -> vector<8x16xf32>
      %715 = arith.addf %714, %13 : vector<8x16xf32>
      %cst_234 = arith.constant 0.333333343 : f32
      %716 = arith.mulf %26, %cst_234 : f32
      %717 = vector.broadcast %716 : f32 to vector<8x16xf32>
      %718 = arith.mulf %717, %715 : vector<8x16xf32>
      %719 = arith.addf %703, %718 : vector<8x16xf32>
      %720 = vector.broadcast %26 : f32 to vector<8x16xf32>
      %721 = arith.mulf %720, %715 : vector<8x16xf32>
      %722 = arith.addf %675, %721 : vector<8x16xf32>
      %cst_235 = arith.constant dense<0.000000e+00> : vector<8x32xf32>
      %723 = tpu.matmul %722, %0, %cst_235 {dimension_numbers = #tpu.dot_dimension_numbers<[1], [0], [0], [1], [0, 0, 1, 1], [], []>} : vector<8x16xf32>, vector<16x32xf32>, vector<8x32xf32> -> vector<8x32xf32>
      %724 = arith.addf %723, %3 : vector<8x32xf32>
      %725 = math.tanh %724 : vector<8x32xf32>
      %cst_236 = arith.constant dense<0.000000e+00> : vector<8x32xf32>
      %726 = tpu.matmul %725, %5, %cst_236 {dimension_numbers = #tpu.dot_dimension_numbers<[1], [0], [0], [1], [0, 0, 1, 1], [], []>} : vector<8x32xf32>, vector<32x32xf32>, vector<8x32xf32> -> vector<8x32xf32>
      %727 = arith.addf %726, %9 : vector<8x32xf32>
      %728 = math.tanh %727 : vector<8x32xf32>
      %cst_237 = arith.constant dense<0.000000e+00> : vector<8x16xf32>
      %729 = tpu.matmul %728, %10, %cst_237 {dimension_numbers = #tpu.dot_dimension_numbers<[1], [0], [0], [1], [0, 0, 1, 1], [], []>} : vector<8x32xf32>, vector<32x16xf32>, vector<8x16xf32> -> vector<8x16xf32>
      %730 = arith.addf %729, %13 : vector<8x16xf32>
      %cst_238 = arith.constant 0.166666672 : f32
      %731 = arith.mulf %26, %cst_238 : f32
      %732 = vector.broadcast %731 : f32 to vector<8x16xf32>
      %733 = arith.mulf %732, %730 : vector<8x16xf32>
      %734 = arith.addf %719, %733 : vector<8x16xf32>
      %c12_i32 = arith.constant 12 : i32
      %cst_239 = arith.constant dense<0.000000e+00> : vector<8x32xf32>
      %735 = tpu.matmul %734, %0, %cst_239 {dimension_numbers = #tpu.dot_dimension_numbers<[1], [0], [0], [1], [0, 0, 1, 1], [], []>} : vector<8x16xf32>, vector<16x32xf32>, vector<8x32xf32> -> vector<8x32xf32>
      %736 = arith.addf %735, %3 : vector<8x32xf32>
      %737 = math.tanh %736 : vector<8x32xf32>
      %cst_240 = arith.constant dense<0.000000e+00> : vector<8x32xf32>
      %738 = tpu.matmul %737, %5, %cst_240 {dimension_numbers = #tpu.dot_dimension_numbers<[1], [0], [0], [1], [0, 0, 1, 1], [], []>} : vector<8x32xf32>, vector<32x32xf32>, vector<8x32xf32> -> vector<8x32xf32>
      %739 = arith.addf %738, %9 : vector<8x32xf32>
      %740 = math.tanh %739 : vector<8x32xf32>
      %cst_241 = arith.constant dense<0.000000e+00> : vector<8x16xf32>
      %741 = tpu.matmul %740, %10, %cst_241 {dimension_numbers = #tpu.dot_dimension_numbers<[1], [0], [0], [1], [0, 0, 1, 1], [], []>} : vector<8x32xf32>, vector<32x16xf32>, vector<8x16xf32> -> vector<8x16xf32>
      %742 = arith.addf %741, %13 : vector<8x16xf32>
      %cst_242 = arith.constant 0.166666672 : f32
      %743 = arith.mulf %26, %cst_242 : f32
      %744 = vector.broadcast %743 : f32 to vector<8x16xf32>
      %745 = arith.mulf %744, %742 : vector<8x16xf32>
      %746 = arith.addf %734, %745 : vector<8x16xf32>
      %cst_243 = arith.constant 5.000000e-01 : f32
      %747 = arith.mulf %cst_243, %26 : f32
      %748 = vector.broadcast %747 : f32 to vector<8x16xf32>
      %749 = arith.mulf %748, %742 : vector<8x16xf32>
      %750 = arith.addf %734, %749 : vector<8x16xf32>
      %cst_244 = arith.constant dense<0.000000e+00> : vector<8x32xf32>
      %751 = tpu.matmul %750, %0, %cst_244 {dimension_numbers = #tpu.dot_dimension_numbers<[1], [0], [0], [1], [0, 0, 1, 1], [], []>} : vector<8x16xf32>, vector<16x32xf32>, vector<8x32xf32> -> vector<8x32xf32>
      %752 = arith.addf %751, %3 : vector<8x32xf32>
      %753 = math.tanh %752 : vector<8x32xf32>
      %cst_245 = arith.constant dense<0.000000e+00> : vector<8x32xf32>
      %754 = tpu.matmul %753, %5, %cst_245 {dimension_numbers = #tpu.dot_dimension_numbers<[1], [0], [0], [1], [0, 0, 1, 1], [], []>} : vector<8x32xf32>, vector<32x32xf32>, vector<8x32xf32> -> vector<8x32xf32>
      %755 = arith.addf %754, %9 : vector<8x32xf32>
      %756 = math.tanh %755 : vector<8x32xf32>
      %cst_246 = arith.constant dense<0.000000e+00> : vector<8x16xf32>
      %757 = tpu.matmul %756, %10, %cst_246 {dimension_numbers = #tpu.dot_dimension_numbers<[1], [0], [0], [1], [0, 0, 1, 1], [], []>} : vector<8x32xf32>, vector<32x16xf32>, vector<8x16xf32> -> vector<8x16xf32>
      %758 = arith.addf %757, %13 : vector<8x16xf32>
      %cst_247 = arith.constant 0.333333343 : f32
      %759 = arith.mulf %26, %cst_247 : f32
      %760 = vector.broadcast %759 : f32 to vector<8x16xf32>
      %761 = arith.mulf %760, %758 : vector<8x16xf32>
      %762 = arith.addf %746, %761 : vector<8x16xf32>
      %cst_248 = arith.constant 5.000000e-01 : f32
      %763 = arith.mulf %cst_248, %26 : f32
      %764 = vector.broadcast %763 : f32 to vector<8x16xf32>
      %765 = arith.mulf %764, %758 : vector<8x16xf32>
      %766 = arith.addf %734, %765 : vector<8x16xf32>
      %cst_249 = arith.constant dense<0.000000e+00> : vector<8x32xf32>
      %767 = tpu.matmul %766, %0, %cst_249 {dimension_numbers = #tpu.dot_dimension_numbers<[1], [0], [0], [1], [0, 0, 1, 1], [], []>} : vector<8x16xf32>, vector<16x32xf32>, vector<8x32xf32> -> vector<8x32xf32>
      %768 = arith.addf %767, %3 : vector<8x32xf32>
      %769 = math.tanh %768 : vector<8x32xf32>
      %cst_250 = arith.constant dense<0.000000e+00> : vector<8x32xf32>
      %770 = tpu.matmul %769, %5, %cst_250 {dimension_numbers = #tpu.dot_dimension_numbers<[1], [0], [0], [1], [0, 0, 1, 1], [], []>} : vector<8x32xf32>, vector<32x32xf32>, vector<8x32xf32> -> vector<8x32xf32>
      %771 = arith.addf %770, %9 : vector<8x32xf32>
      %772 = math.tanh %771 : vector<8x32xf32>
      %cst_251 = arith.constant dense<0.000000e+00> : vector<8x16xf32>
      %773 = tpu.matmul %772, %10, %cst_251 {dimension_numbers = #tpu.dot_dimension_numbers<[1], [0], [0], [1], [0, 0, 1, 1], [], []>} : vector<8x32xf32>, vector<32x16xf32>, vector<8x16xf32> -> vector<8x16xf32>
      %774 = arith.addf %773, %13 : vector<8x16xf32>
      %cst_252 = arith.constant 0.333333343 : f32
      %775 = arith.mulf %26, %cst_252 : f32
      %776 = vector.broadcast %775 : f32 to vector<8x16xf32>
      %777 = arith.mulf %776, %774 : vector<8x16xf32>
      %778 = arith.addf %762, %777 : vector<8x16xf32>
      %779 = vector.broadcast %26 : f32 to vector<8x16xf32>
      %780 = arith.mulf %779, %774 : vector<8x16xf32>
      %781 = arith.addf %734, %780 : vector<8x16xf32>
      %cst_253 = arith.constant dense<0.000000e+00> : vector<8x32xf32>
      %782 = tpu.matmul %781, %0, %cst_253 {dimension_numbers = #tpu.dot_dimension_numbers<[1], [0], [0], [1], [0, 0, 1, 1], [], []>} : vector<8x16xf32>, vector<16x32xf32>, vector<8x32xf32> -> vector<8x32xf32>
      %783 = arith.addf %782, %3 : vector<8x32xf32>
      %784 = math.tanh %783 : vector<8x32xf32>
      %cst_254 = arith.constant dense<0.000000e+00> : vector<8x32xf32>
      %785 = tpu.matmul %784, %5, %cst_254 {dimension_numbers = #tpu.dot_dimension_numbers<[1], [0], [0], [1], [0, 0, 1, 1], [], []>} : vector<8x32xf32>, vector<32x32xf32>, vector<8x32xf32> -> vector<8x32xf32>
      %786 = arith.addf %785, %9 : vector<8x32xf32>
      %787 = math.tanh %786 : vector<8x32xf32>
      %cst_255 = arith.constant dense<0.000000e+00> : vector<8x16xf32>
      %788 = tpu.matmul %787, %10, %cst_255 {dimension_numbers = #tpu.dot_dimension_numbers<[1], [0], [0], [1], [0, 0, 1, 1], [], []>} : vector<8x32xf32>, vector<32x16xf32>, vector<8x16xf32> -> vector<8x16xf32>
      %789 = arith.addf %788, %13 : vector<8x16xf32>
      %cst_256 = arith.constant 0.166666672 : f32
      %790 = arith.mulf %26, %cst_256 : f32
      %791 = vector.broadcast %790 : f32 to vector<8x16xf32>
      %792 = arith.mulf %791, %789 : vector<8x16xf32>
      %793 = arith.addf %778, %792 : vector<8x16xf32>
      %c13_i32 = arith.constant 13 : i32
      %cst_257 = arith.constant dense<0.000000e+00> : vector<8x32xf32>
      %794 = tpu.matmul %793, %0, %cst_257 {dimension_numbers = #tpu.dot_dimension_numbers<[1], [0], [0], [1], [0, 0, 1, 1], [], []>} : vector<8x16xf32>, vector<16x32xf32>, vector<8x32xf32> -> vector<8x32xf32>
      %795 = arith.addf %794, %3 : vector<8x32xf32>
      %796 = math.tanh %795 : vector<8x32xf32>
      %cst_258 = arith.constant dense<0.000000e+00> : vector<8x32xf32>
      %797 = tpu.matmul %796, %5, %cst_258 {dimension_numbers = #tpu.dot_dimension_numbers<[1], [0], [0], [1], [0, 0, 1, 1], [], []>} : vector<8x32xf32>, vector<32x32xf32>, vector<8x32xf32> -> vector<8x32xf32>
      %798 = arith.addf %797, %9 : vector<8x32xf32>
      %799 = math.tanh %798 : vector<8x32xf32>
      %cst_259 = arith.constant dense<0.000000e+00> : vector<8x16xf32>
      %800 = tpu.matmul %799, %10, %cst_259 {dimension_numbers = #tpu.dot_dimension_numbers<[1], [0], [0], [1], [0, 0, 1, 1], [], []>} : vector<8x32xf32>, vector<32x16xf32>, vector<8x16xf32> -> vector<8x16xf32>
      %801 = arith.addf %800, %13 : vector<8x16xf32>
      %cst_260 = arith.constant 0.166666672 : f32
      %802 = arith.mulf %26, %cst_260 : f32
      %803 = vector.broadcast %802 : f32 to vector<8x16xf32>
      %804 = arith.mulf %803, %801 : vector<8x16xf32>
      %805 = arith.addf %793, %804 : vector<8x16xf32>
      %cst_261 = arith.constant 5.000000e-01 : f32
      %806 = arith.mulf %cst_261, %26 : f32
      %807 = vector.broadcast %806 : f32 to vector<8x16xf32>
      %808 = arith.mulf %807, %801 : vector<8x16xf32>
      %809 = arith.addf %793, %808 : vector<8x16xf32>
      %cst_262 = arith.constant dense<0.000000e+00> : vector<8x32xf32>
      %810 = tpu.matmul %809, %0, %cst_262 {dimension_numbers = #tpu.dot_dimension_numbers<[1], [0], [0], [1], [0, 0, 1, 1], [], []>} : vector<8x16xf32>, vector<16x32xf32>, vector<8x32xf32> -> vector<8x32xf32>
      %811 = arith.addf %810, %3 : vector<8x32xf32>
      %812 = math.tanh %811 : vector<8x32xf32>
      %cst_263 = arith.constant dense<0.000000e+00> : vector<8x32xf32>
      %813 = tpu.matmul %812, %5, %cst_263 {dimension_numbers = #tpu.dot_dimension_numbers<[1], [0], [0], [1], [0, 0, 1, 1], [], []>} : vector<8x32xf32>, vector<32x32xf32>, vector<8x32xf32> -> vector<8x32xf32>
      %814 = arith.addf %813, %9 : vector<8x32xf32>
      %815 = math.tanh %814 : vector<8x32xf32>
      %cst_264 = arith.constant dense<0.000000e+00> : vector<8x16xf32>
      %816 = tpu.matmul %815, %10, %cst_264 {dimension_numbers = #tpu.dot_dimension_numbers<[1], [0], [0], [1], [0, 0, 1, 1], [], []>} : vector<8x32xf32>, vector<32x16xf32>, vector<8x16xf32> -> vector<8x16xf32>
      %817 = arith.addf %816, %13 : vector<8x16xf32>
      %cst_265 = arith.constant 0.333333343 : f32
      %818 = arith.mulf %26, %cst_265 : f32
      %819 = vector.broadcast %818 : f32 to vector<8x16xf32>
      %820 = arith.mulf %819, %817 : vector<8x16xf32>
      %821 = arith.addf %805, %820 : vector<8x16xf32>
      %cst_266 = arith.constant 5.000000e-01 : f32
      %822 = arith.mulf %cst_266, %26 : f32
      %823 = vector.broadcast %822 : f32 to vector<8x16xf32>
      %824 = arith.mulf %823, %817 : vector<8x16xf32>
      %825 = arith.addf %793, %824 : vector<8x16xf32>
      %cst_267 = arith.constant dense<0.000000e+00> : vector<8x32xf32>
      %826 = tpu.matmul %825, %0, %cst_267 {dimension_numbers = #tpu.dot_dimension_numbers<[1], [0], [0], [1], [0, 0, 1, 1], [], []>} : vector<8x16xf32>, vector<16x32xf32>, vector<8x32xf32> -> vector<8x32xf32>
      %827 = arith.addf %826, %3 : vector<8x32xf32>
      %828 = math.tanh %827 : vector<8x32xf32>
      %cst_268 = arith.constant dense<0.000000e+00> : vector<8x32xf32>
      %829 = tpu.matmul %828, %5, %cst_268 {dimension_numbers = #tpu.dot_dimension_numbers<[1], [0], [0], [1], [0, 0, 1, 1], [], []>} : vector<8x32xf32>, vector<32x32xf32>, vector<8x32xf32> -> vector<8x32xf32>
      %830 = arith.addf %829, %9 : vector<8x32xf32>
      %831 = math.tanh %830 : vector<8x32xf32>
      %cst_269 = arith.constant dense<0.000000e+00> : vector<8x16xf32>
      %832 = tpu.matmul %831, %10, %cst_269 {dimension_numbers = #tpu.dot_dimension_numbers<[1], [0], [0], [1], [0, 0, 1, 1], [], []>} : vector<8x32xf32>, vector<32x16xf32>, vector<8x16xf32> -> vector<8x16xf32>
      %833 = arith.addf %832, %13 : vector<8x16xf32>
      %cst_270 = arith.constant 0.333333343 : f32
      %834 = arith.mulf %26, %cst_270 : f32
      %835 = vector.broadcast %834 : f32 to vector<8x16xf32>
      %836 = arith.mulf %835, %833 : vector<8x16xf32>
      %837 = arith.addf %821, %836 : vector<8x16xf32>
      %838 = vector.broadcast %26 : f32 to vector<8x16xf32>
      %839 = arith.mulf %838, %833 : vector<8x16xf32>
      %840 = arith.addf %793, %839 : vector<8x16xf32>
      %cst_271 = arith.constant dense<0.000000e+00> : vector<8x32xf32>
      %841 = tpu.matmul %840, %0, %cst_271 {dimension_numbers = #tpu.dot_dimension_numbers<[1], [0], [0], [1], [0, 0, 1, 1], [], []>} : vector<8x16xf32>, vector<16x32xf32>, vector<8x32xf32> -> vector<8x32xf32>
      %842 = arith.addf %841, %3 : vector<8x32xf32>
      %843 = math.tanh %842 : vector<8x32xf32>
      %cst_272 = arith.constant dense<0.000000e+00> : vector<8x32xf32>
      %844 = tpu.matmul %843, %5, %cst_272 {dimension_numbers = #tpu.dot_dimension_numbers<[1], [0], [0], [1], [0, 0, 1, 1], [], []>} : vector<8x32xf32>, vector<32x32xf32>, vector<8x32xf32> -> vector<8x32xf32>
      %845 = arith.addf %844, %9 : vector<8x32xf32>
      %846 = math.tanh %845 : vector<8x32xf32>
      %cst_273 = arith.constant dense<0.000000e+00> : vector<8x16xf32>
      %847 = tpu.matmul %846, %10, %cst_273 {dimension_numbers = #tpu.dot_dimension_numbers<[1], [0], [0], [1], [0, 0, 1, 1], [], []>} : vector<8x32xf32>, vector<32x16xf32>, vector<8x16xf32> -> vector<8x16xf32>
      %848 = arith.addf %847, %13 : vector<8x16xf32>
      %cst_274 = arith.constant 0.166666672 : f32
      %849 = arith.mulf %26, %cst_274 : f32
      %850 = vector.broadcast %849 : f32 to vector<8x16xf32>
      %851 = arith.mulf %850, %848 : vector<8x16xf32>
      %852 = arith.addf %837, %851 : vector<8x16xf32>
      %c14_i32 = arith.constant 14 : i32
      %cst_275 = arith.constant dense<0.000000e+00> : vector<8x32xf32>
      %853 = tpu.matmul %852, %0, %cst_275 {dimension_numbers = #tpu.dot_dimension_numbers<[1], [0], [0], [1], [0, 0, 1, 1], [], []>} : vector<8x16xf32>, vector<16x32xf32>, vector<8x32xf32> -> vector<8x32xf32>
      %854 = arith.addf %853, %3 : vector<8x32xf32>
      %855 = math.tanh %854 : vector<8x32xf32>
      %cst_276 = arith.constant dense<0.000000e+00> : vector<8x32xf32>
      %856 = tpu.matmul %855, %5, %cst_276 {dimension_numbers = #tpu.dot_dimension_numbers<[1], [0], [0], [1], [0, 0, 1, 1], [], []>} : vector<8x32xf32>, vector<32x32xf32>, vector<8x32xf32> -> vector<8x32xf32>
      %857 = arith.addf %856, %9 : vector<8x32xf32>
      %858 = math.tanh %857 : vector<8x32xf32>
      %cst_277 = arith.constant dense<0.000000e+00> : vector<8x16xf32>
      %859 = tpu.matmul %858, %10, %cst_277 {dimension_numbers = #tpu.dot_dimension_numbers<[1], [0], [0], [1], [0, 0, 1, 1], [], []>} : vector<8x32xf32>, vector<32x16xf32>, vector<8x16xf32> -> vector<8x16xf32>
      %860 = arith.addf %859, %13 : vector<8x16xf32>
      %cst_278 = arith.constant 0.166666672 : f32
      %861 = arith.mulf %26, %cst_278 : f32
      %862 = vector.broadcast %861 : f32 to vector<8x16xf32>
      %863 = arith.mulf %862, %860 : vector<8x16xf32>
      %864 = arith.addf %852, %863 : vector<8x16xf32>
      %cst_279 = arith.constant 5.000000e-01 : f32
      %865 = arith.mulf %cst_279, %26 : f32
      %866 = vector.broadcast %865 : f32 to vector<8x16xf32>
      %867 = arith.mulf %866, %860 : vector<8x16xf32>
      %868 = arith.addf %852, %867 : vector<8x16xf32>
      %cst_280 = arith.constant dense<0.000000e+00> : vector<8x32xf32>
      %869 = tpu.matmul %868, %0, %cst_280 {dimension_numbers = #tpu.dot_dimension_numbers<[1], [0], [0], [1], [0, 0, 1, 1], [], []>} : vector<8x16xf32>, vector<16x32xf32>, vector<8x32xf32> -> vector<8x32xf32>
      %870 = arith.addf %869, %3 : vector<8x32xf32>
      %871 = math.tanh %870 : vector<8x32xf32>
      %cst_281 = arith.constant dense<0.000000e+00> : vector<8x32xf32>
      %872 = tpu.matmul %871, %5, %cst_281 {dimension_numbers = #tpu.dot_dimension_numbers<[1], [0], [0], [1], [0, 0, 1, 1], [], []>} : vector<8x32xf32>, vector<32x32xf32>, vector<8x32xf32> -> vector<8x32xf32>
      %873 = arith.addf %872, %9 : vector<8x32xf32>
      %874 = math.tanh %873 : vector<8x32xf32>
      %cst_282 = arith.constant dense<0.000000e+00> : vector<8x16xf32>
      %875 = tpu.matmul %874, %10, %cst_282 {dimension_numbers = #tpu.dot_dimension_numbers<[1], [0], [0], [1], [0, 0, 1, 1], [], []>} : vector<8x32xf32>, vector<32x16xf32>, vector<8x16xf32> -> vector<8x16xf32>
      %876 = arith.addf %875, %13 : vector<8x16xf32>
      %cst_283 = arith.constant 0.333333343 : f32
      %877 = arith.mulf %26, %cst_283 : f32
      %878 = vector.broadcast %877 : f32 to vector<8x16xf32>
      %879 = arith.mulf %878, %876 : vector<8x16xf32>
      %880 = arith.addf %864, %879 : vector<8x16xf32>
      %cst_284 = arith.constant 5.000000e-01 : f32
      %881 = arith.mulf %cst_284, %26 : f32
      %882 = vector.broadcast %881 : f32 to vector<8x16xf32>
      %883 = arith.mulf %882, %876 : vector<8x16xf32>
      %884 = arith.addf %852, %883 : vector<8x16xf32>
      %cst_285 = arith.constant dense<0.000000e+00> : vector<8x32xf32>
      %885 = tpu.matmul %884, %0, %cst_285 {dimension_numbers = #tpu.dot_dimension_numbers<[1], [0], [0], [1], [0, 0, 1, 1], [], []>} : vector<8x16xf32>, vector<16x32xf32>, vector<8x32xf32> -> vector<8x32xf32>
      %886 = arith.addf %885, %3 : vector<8x32xf32>
      %887 = math.tanh %886 : vector<8x32xf32>
      %cst_286 = arith.constant dense<0.000000e+00> : vector<8x32xf32>
      %888 = tpu.matmul %887, %5, %cst_286 {dimension_numbers = #tpu.dot_dimension_numbers<[1], [0], [0], [1], [0, 0, 1, 1], [], []>} : vector<8x32xf32>, vector<32x32xf32>, vector<8x32xf32> -> vector<8x32xf32>
      %889 = arith.addf %888, %9 : vector<8x32xf32>
      %890 = math.tanh %889 : vector<8x32xf32>
      %cst_287 = arith.constant dense<0.000000e+00> : vector<8x16xf32>
      %891 = tpu.matmul %890, %10, %cst_287 {dimension_numbers = #tpu.dot_dimension_numbers<[1], [0], [0], [1], [0, 0, 1, 1], [], []>} : vector<8x32xf32>, vector<32x16xf32>, vector<8x16xf32> -> vector<8x16xf32>
      %892 = arith.addf %891, %13 : vector<8x16xf32>
      %cst_288 = arith.constant 0.333333343 : f32
      %893 = arith.mulf %26, %cst_288 : f32
      %894 = vector.broadcast %893 : f32 to vector<8x16xf32>
      %895 = arith.mulf %894, %892 : vector<8x16xf32>
      %896 = arith.addf %880, %895 : vector<8x16xf32>
      %897 = vector.broadcast %26 : f32 to vector<8x16xf32>
      %898 = arith.mulf %897, %892 : vector<8x16xf32>
      %899 = arith.addf %852, %898 : vector<8x16xf32>
      %cst_289 = arith.constant dense<0.000000e+00> : vector<8x32xf32>
      %900 = tpu.matmul %899, %0, %cst_289 {dimension_numbers = #tpu.dot_dimension_numbers<[1], [0], [0], [1], [0, 0, 1, 1], [], []>} : vector<8x16xf32>, vector<16x32xf32>, vector<8x32xf32> -> vector<8x32xf32>
      %901 = arith.addf %900, %3 : vector<8x32xf32>
      %902 = math.tanh %901 : vector<8x32xf32>
      %cst_290 = arith.constant dense<0.000000e+00> : vector<8x32xf32>
      %903 = tpu.matmul %902, %5, %cst_290 {dimension_numbers = #tpu.dot_dimension_numbers<[1], [0], [0], [1], [0, 0, 1, 1], [], []>} : vector<8x32xf32>, vector<32x32xf32>, vector<8x32xf32> -> vector<8x32xf32>
      %904 = arith.addf %903, %9 : vector<8x32xf32>
      %905 = math.tanh %904 : vector<8x32xf32>
      %cst_291 = arith.constant dense<0.000000e+00> : vector<8x16xf32>
      %906 = tpu.matmul %905, %10, %cst_291 {dimension_numbers = #tpu.dot_dimension_numbers<[1], [0], [0], [1], [0, 0, 1, 1], [], []>} : vector<8x32xf32>, vector<32x16xf32>, vector<8x16xf32> -> vector<8x16xf32>
      %907 = arith.addf %906, %13 : vector<8x16xf32>
      %cst_292 = arith.constant 0.166666672 : f32
      %908 = arith.mulf %26, %cst_292 : f32
      %909 = vector.broadcast %908 : f32 to vector<8x16xf32>
      %910 = arith.mulf %909, %907 : vector<8x16xf32>
      %911 = arith.addf %896, %910 : vector<8x16xf32>
      %c15_i32 = arith.constant 15 : i32
      %cst_293 = arith.constant dense<0.000000e+00> : vector<8x32xf32>
      %912 = tpu.matmul %911, %0, %cst_293 {dimension_numbers = #tpu.dot_dimension_numbers<[1], [0], [0], [1], [0, 0, 1, 1], [], []>} : vector<8x16xf32>, vector<16x32xf32>, vector<8x32xf32> -> vector<8x32xf32>
      %913 = arith.addf %912, %3 : vector<8x32xf32>
      %914 = math.tanh %913 : vector<8x32xf32>
      %cst_294 = arith.constant dense<0.000000e+00> : vector<8x32xf32>
      %915 = tpu.matmul %914, %5, %cst_294 {dimension_numbers = #tpu.dot_dimension_numbers<[1], [0], [0], [1], [0, 0, 1, 1], [], []>} : vector<8x32xf32>, vector<32x32xf32>, vector<8x32xf32> -> vector<8x32xf32>
      %916 = arith.addf %915, %9 : vector<8x32xf32>
      %917 = math.tanh %916 : vector<8x32xf32>
      %cst_295 = arith.constant dense<0.000000e+00> : vector<8x16xf32>
      %918 = tpu.matmul %917, %10, %cst_295 {dimension_numbers = #tpu.dot_dimension_numbers<[1], [0], [0], [1], [0, 0, 1, 1], [], []>} : vector<8x32xf32>, vector<32x16xf32>, vector<8x16xf32> -> vector<8x16xf32>
      %919 = arith.addf %918, %13 : vector<8x16xf32>
      %cst_296 = arith.constant 0.166666672 : f32
      %920 = arith.mulf %26, %cst_296 : f32
      %921 = vector.broadcast %920 : f32 to vector<8x16xf32>
      %922 = arith.mulf %921, %919 : vector<8x16xf32>
      %923 = arith.addf %911, %922 : vector<8x16xf32>
      %cst_297 = arith.constant 5.000000e-01 : f32
      %924 = arith.mulf %cst_297, %26 : f32
      %925 = vector.broadcast %924 : f32 to vector<8x16xf32>
      %926 = arith.mulf %925, %919 : vector<8x16xf32>
      %927 = arith.addf %911, %926 : vector<8x16xf32>
      %cst_298 = arith.constant dense<0.000000e+00> : vector<8x32xf32>
      %928 = tpu.matmul %927, %0, %cst_298 {dimension_numbers = #tpu.dot_dimension_numbers<[1], [0], [0], [1], [0, 0, 1, 1], [], []>} : vector<8x16xf32>, vector<16x32xf32>, vector<8x32xf32> -> vector<8x32xf32>
      %929 = arith.addf %928, %3 : vector<8x32xf32>
      %930 = math.tanh %929 : vector<8x32xf32>
      %cst_299 = arith.constant dense<0.000000e+00> : vector<8x32xf32>
      %931 = tpu.matmul %930, %5, %cst_299 {dimension_numbers = #tpu.dot_dimension_numbers<[1], [0], [0], [1], [0, 0, 1, 1], [], []>} : vector<8x32xf32>, vector<32x32xf32>, vector<8x32xf32> -> vector<8x32xf32>
      %932 = arith.addf %931, %9 : vector<8x32xf32>
      %933 = math.tanh %932 : vector<8x32xf32>
      %cst_300 = arith.constant dense<0.000000e+00> : vector<8x16xf32>
      %934 = tpu.matmul %933, %10, %cst_300 {dimension_numbers = #tpu.dot_dimension_numbers<[1], [0], [0], [1], [0, 0, 1, 1], [], []>} : vector<8x32xf32>, vector<32x16xf32>, vector<8x16xf32> -> vector<8x16xf32>
      %935 = arith.addf %934, %13 : vector<8x16xf32>
      %cst_301 = arith.constant 0.333333343 : f32
      %936 = arith.mulf %26, %cst_301 : f32
      %937 = vector.broadcast %936 : f32 to vector<8x16xf32>
      %938 = arith.mulf %937, %935 : vector<8x16xf32>
      %939 = arith.addf %923, %938 : vector<8x16xf32>
      %cst_302 = arith.constant 5.000000e-01 : f32
      %940 = arith.mulf %cst_302, %26 : f32
      %941 = vector.broadcast %940 : f32 to vector<8x16xf32>
      %942 = arith.mulf %941, %935 : vector<8x16xf32>
      %943 = arith.addf %911, %942 : vector<8x16xf32>
      %cst_303 = arith.constant dense<0.000000e+00> : vector<8x32xf32>
      %944 = tpu.matmul %943, %0, %cst_303 {dimension_numbers = #tpu.dot_dimension_numbers<[1], [0], [0], [1], [0, 0, 1, 1], [], []>} : vector<8x16xf32>, vector<16x32xf32>, vector<8x32xf32> -> vector<8x32xf32>
      %945 = arith.addf %944, %3 : vector<8x32xf32>
      %946 = math.tanh %945 : vector<8x32xf32>
      %cst_304 = arith.constant dense<0.000000e+00> : vector<8x32xf32>
      %947 = tpu.matmul %946, %5, %cst_304 {dimension_numbers = #tpu.dot_dimension_numbers<[1], [0], [0], [1], [0, 0, 1, 1], [], []>} : vector<8x32xf32>, vector<32x32xf32>, vector<8x32xf32> -> vector<8x32xf32>
      %948 = arith.addf %947, %9 : vector<8x32xf32>
      %949 = math.tanh %948 : vector<8x32xf32>
      %cst_305 = arith.constant dense<0.000000e+00> : vector<8x16xf32>
      %950 = tpu.matmul %949, %10, %cst_305 {dimension_numbers = #tpu.dot_dimension_numbers<[1], [0], [0], [1], [0, 0, 1, 1], [], []>} : vector<8x32xf32>, vector<32x16xf32>, vector<8x16xf32> -> vector<8x16xf32>
      %951 = arith.addf %950, %13 : vector<8x16xf32>
      %cst_306 = arith.constant 0.333333343 : f32
      %952 = arith.mulf %26, %cst_306 : f32
      %953 = vector.broadcast %952 : f32 to vector<8x16xf32>
      %954 = arith.mulf %953, %951 : vector<8x16xf32>
      %955 = arith.addf %939, %954 : vector<8x16xf32>
      %956 = vector.broadcast %26 : f32 to vector<8x16xf32>
      %957 = arith.mulf %956, %951 : vector<8x16xf32>
      %958 = arith.addf %911, %957 : vector<8x16xf32>
      %cst_307 = arith.constant dense<0.000000e+00> : vector<8x32xf32>
      %959 = tpu.matmul %958, %0, %cst_307 {dimension_numbers = #tpu.dot_dimension_numbers<[1], [0], [0], [1], [0, 0, 1, 1], [], []>} : vector<8x16xf32>, vector<16x32xf32>, vector<8x32xf32> -> vector<8x32xf32>
      %960 = arith.addf %959, %3 : vector<8x32xf32>
      %961 = math.tanh %960 : vector<8x32xf32>
      %cst_308 = arith.constant dense<0.000000e+00> : vector<8x32xf32>
      %962 = tpu.matmul %961, %5, %cst_308 {dimension_numbers = #tpu.dot_dimension_numbers<[1], [0], [0], [1], [0, 0, 1, 1], [], []>} : vector<8x32xf32>, vector<32x32xf32>, vector<8x32xf32> -> vector<8x32xf32>
      %963 = arith.addf %962, %9 : vector<8x32xf32>
      %964 = math.tanh %963 : vector<8x32xf32>
      %cst_309 = arith.constant dense<0.000000e+00> : vector<8x16xf32>
      %965 = tpu.matmul %964, %10, %cst_309 {dimension_numbers = #tpu.dot_dimension_numbers<[1], [0], [0], [1], [0, 0, 1, 1], [], []>} : vector<8x32xf32>, vector<32x16xf32>, vector<8x16xf32> -> vector<8x16xf32>
      %966 = arith.addf %965, %13 : vector<8x16xf32>
      %cst_310 = arith.constant 0.166666672 : f32
      %967 = arith.mulf %26, %cst_310 : f32
      %968 = vector.broadcast %967 : f32 to vector<8x16xf32>
      %969 = arith.mulf %968, %966 : vector<8x16xf32>
      %970 = arith.addf %955, %969 : vector<8x16xf32>
      %971 = arith.index_cast %arg10 : i32 to index
      %c0_311 = arith.constant 0 : index
      %c0_312 = arith.constant 0 : index
      %972 = vector.load %arg9[%971, %c0_311, %c0_312] : memref<8x8x16xf32, #tpu.memory_space<vmem>>, vector<1x8x16xf32>
      %973 = vector.shape_cast %972 : vector<1x8x16xf32> to vector<8x16xf32>
      %974 = vector.shape_cast %970 : vector<8x16xf32> to vector<1x8x16xf32>
      tpu.vector_store %arg9[%971, %c0_311, %c0_312], %974 {strides = array<i32>} : memref<8x8x16xf32, #tpu.memory_space<vmem>>, vector<1x8x16xf32>,
      scf.yield %970 : vector<8x16xf32>
    }
    %c7_i32_19 = arith.constant 7 : i32
    return
  }
  func.func @transform_0(%arg0: i32, %arg1: memref<8xf32, #tpu.memory_space<smem>>) -> (i32, i32) {
    %c0_i32 = arith.constant 0 : i32
    %c0_i32_0 = arith.constant 0 : i32
    return %arg0, %c0_i32 : i32, i32
  }
  func.func @transform_1(%arg0: i32, %arg1: memref<8xf32, #tpu.memory_space<smem>>) -> (i32, i32) {
    %c0_i32 = arith.constant 0 : i32
    %c0_i32_0 = arith.constant 0 : i32
    %c0_i32_1 = arith.constant 0 : i32
    return %c0_i32, %c0_i32_0 : i32, i32
  }
  func.func @transform_2(%arg0: i32, %arg1: memref<8xf32, #tpu.memory_space<smem>>) -> (i32, i32) {
    %c0_i32 = arith.constant 0 : i32
    %c0_i32_0 = arith.constant 0 : i32
    %c0_i32_1 = arith.constant 0 : i32
    return %c0_i32, %c0_i32_0 : i32, i32
  }
  func.func @transform_3(%arg0: i32, %arg1: memref<8xf32, #tpu.memory_space<smem>>) -> (i32, i32, i32) {
    %c0_i32 = arith.constant 0 : i32
    %c0_i32_0 = arith.constant 0 : i32
    %c0_i32_1 = arith.constant 0 : i32
    %c0_i32_2 = arith.constant 0 : i32
    return %c0_i32, %c0_i32_0, %c0_i32_1 : i32, i32, i32
  }
  func.func @transform_4(%arg0: i32, %arg1: memref<8xf32, #tpu.memory_space<smem>>) -> (i32, i32, i32) {
    %c0_i32 = arith.constant 0 : i32
    %c0_i32_0 = arith.constant 0 : i32
    %c0_i32_1 = arith.constant 0 : i32
    %c0_i32_2 = arith.constant 0 : i32
    return %c0_i32, %c0_i32_0, %c0_i32_1 : i32, i32, i32
  }
  func.func @transform_5(%arg0: i32, %arg1: memref<8xf32, #tpu.memory_space<smem>>) -> (i32, i32) {
    %c0_i32 = arith.constant 0 : i32
    %c0_i32_0 = arith.constant 0 : i32
    %c0_i32_1 = arith.constant 0 : i32
    return %c0_i32, %c0_i32_0 : i32, i32
  }
  func.func @transform_6(%arg0: i32, %arg1: memref<8xf32, #tpu.memory_space<smem>>) -> (i32, i32) {
    %c0_i32 = arith.constant 0 : i32
    %c0_i32_0 = arith.constant 0 : i32
    %c0_i32_1 = arith.constant 0 : i32
    return %c0_i32, %c0_i32_0 : i32, i32
  }
  func.func @transform_7(%arg0: i32, %arg1: memref<8xf32, #tpu.memory_space<smem>>) -> (i32, i32, i32) {
    %c0_i32 = arith.constant 0 : i32
    %c0_i32_0 = arith.constant 0 : i32
    %c0_i32_1 = arith.constant 0 : i32
    return %c0_i32, %arg0, %c0_i32_0 : i32, i32, i32
  }
}

</mosaic_0001>

<bundles_post_ra>
// kernel: tpu_custom_call.1
= control target key start
LH: loop header
LB: loop body
LE: loop exit
PB: predicated region body
PF: predicated region fallthrough
CT: control target
= control target key end

     0   :  { %s20530_s0 = inlined_call_operand.vmem [shape: f32[8], index: 0, kind: input, shape index: {}]   ;;  %s20531_s1 = inlined_call_operand.hbm [shape: f32[8,16], index: 1, kind: input, shape index: {}]   ;;  %s20532_s2 = inlined_call_operand.vmem [shape: f32[16,32], index: 2, kind: input, shape index: {}]   ;;  %s20533_s3 = inlined_call_operand.vmem [shape: f32[1,32], index: 3, kind: input, shape index: {}]   ;;  %s20534_s4 = inlined_call_operand.vmem [shape: f32[1,32,32], index: 4, kind: input, shape index: {}]   ;;  %s20535_s5 = inlined_call_operand.vmem [shape: f32[1,1,32], index: 5, kind: input, shape index: {}]   ;;  %s20536_s6 = inlined_call_operand.vmem [shape: f32[32,16], index: 6, kind: input, shape index: {}]   ;;  %s20537_s7 = inlined_call_operand.vmem [shape: f32[1,16], index: 7, kind: input, shape index: {}]   ;;  %s20538_s8 = inlined_call_operand.hbm [shape: f32[8,8,16], index: 8, kind: output, shape index: {}]  }
   0x1   :  { %s13_s29 = sshll.u32 %s20530_s0, 4  ;;  %s14_s29 = int_to_ptr.vmem [resolvable:$true] %s13_s29 }
   0x2   :  { %s18623_s30 = scalar_lea.vmem %s14_s29, 16  ;;  %p18628_p1 = scmp.lt.s32.totalorder %s14_s29, %s14_s29 }
   0x3   :  { %p18624_p0 = scmp.ne.s32.totalorder %s14_s29, %s18623_s30  ;;  %p18629_p2 = scmp.lt.s32.totalorder %s18623_s30, %s18623_s30 }
   0x5   :  { %p18630_p3 = por %p18629_p2, %p18628_p1 }
   0x7   :  { %p18631_p4 = pnand %p18630_p3, %p18624_p0 }
   0x9   :  { %18634 = shalt.err (!%p18631_p4)  }
   0xa   :  { %s18701_s9 = smov [#allocation3]  }
   0xb   :  { %16 = dma.vmem_to_smem %s14_s29, 16, %s18701_s9, [#allocation2] }
   0xc   :  { %18687 = dma.done.wait [#allocation2], 16 }
   0xd   :  { %18688 = vsyncadd [#allocation2], 4294967280 }
   0xe   :  { %18 = sfence }
   0xf   :  { %19 = vsyncpa [#allocation5], 0 }
  0x10   :  { %20 = vsyncpa [#allocation6], 0  ;;  %s18702_s10 = smov [#allocation4]   ;;  %s18635_s13 = scalar_lea.hbm %s20531_s1, 128 }
  0x11   :  { %s27_s11 = sshll.u32 %s18702_s10, 4  ;;  %p18636_p5 = scmp.ne.s32.totalorder %s20531_s1, %s18635_s13  ;;  %s28_s11 = int_to_ptr.vmem [resolvable:$true] %s27_s11 }
  0x12   :  { %p18639_p6 = scmp.lt.u32.totalorder %s18635_s13, %s20531_s1 }
  0x14   :  { %p18641_p7 = pnand %p18639_p6, %p18636_p5 }
  0x16   :  { %18644 = shalt.err (!%p18641_p7)
}
  0x17   :  { %s18645_s18 = scalar_lea.vmem %s28_s11, 128  ;;  %p18650_p9 = scmp.lt.s32.totalorder %s28_s11, %s28_s11 }
  0x18   :  { %p18646_p8 = scmp.ne.s32.totalorder %s28_s11, %s18645_s18  ;;  %p18651_p10 = scmp.lt.s32.totalorder %s18645_s18, %s18645_s18 }
  0x1a   :  { %p18652_p11 = por %p18651_p10, %p18650_p9 }
  0x1c   :  { %p18653_p12 = pnand %p18652_p11, %p18646_p8 }
  0x1e   :  { %18656 = shalt.err (!%p18653_p12)
}
  0x1f   :  { %30 = dma.hbm_to_vmem [thread:$0]  %s20531_s1, 128, %s28_s11, [#allocation5]  }
  0x20   :  { %18689 = dma.done.wait [#allocation5], 128  }
  0x21   :  { %18690 = vsyncadd [#allocation5], 4294967168  ;;  %v18772_v0 = vld [vmem:[%s20532_s2] sm:$0xff]  ;;  %v18777_v1 = vld [vmem:[%s20532_s2 + $0x8] sm:$0xff]  ;;  %vm78_vm0 = vcmask 130048   ;;  %s18837_s19 = smov 1  }
  0x22   :  { %v18782_v2 = vld [vmem:[%s20533_s3] ss:$0 sm:$0xff]  ;;  %v18792_v4 = vld [vmem:[%s20534_s4 + $0x8] sm:$0xff]  ;;  %v18797_v5 = vld [vmem:[%s20534_s4 + $0x10] sm:$0xff] }
  0x23   :  { %v18787_v3 = vld [vmem:[%s20534_s4] sm:$0xff]  ;;  %v18802_v6 = vld [vmem:[%s20534_s4 + $0x18] sm:$0xff]  ;;  %v18817_v9 = vld [vmem:[%s20536_s6 + $0x8] sm:$0xff] }
  0x24   :  { %v18807_v7 = vld [vmem:[%s20535_s5] ss:$0 sm:$0xff]  ;;  %v18822_v10 = vld [vmem:[%s20536_s6 + $0x10] sm:$0xff]  ;;  %v18827_v11 = vld [vmem:[%s20536_s6 + $0x18] sm:$0xff] }
  0x25   :  { %v18812_v8 = vld [vmem:[%s20536_s6] sm:$0xff] }
  0x26   :  { %v18832_v12 = vld [vmem:[%s20537_s7] ss:$0 sm:$0xff] }
  0x27   :  { %v77_v13 = vld [vmem:[#allocation4] sm:$0xff]  }
  0x28   :  { %79 = vst.msk [vmem:[#allocation7] sm:$0xff] %vm78_vm0, %v77_v13 }
  0x29 LB: > { %v18847_v14 = vpack.c.bf16 %v18777_v1, %v18772_v0  ;;  %v18703_v15 = vmov 0.0|0.0   ;;  %vm18704_vm1 = vmmov 0   ;;  %v18705_v16 = vmov 0.0   ;;  %s14501_s6 = sadd.s32 4294967295, %s18699_s19  ;;  %s87_s7 = sld [smem:[#allocation3 + %s18699_s19]]  ;;  %s18699_s19 = sphi %s18837_s19, %s85_s19   ;;  %v18695_v13 = vphi %v77_v13, %v14467_v13  }
  0x2a   : > { %17383 = vmatprep.subr.bf16.mxu0 %v18703_v15  ;;  %15531 = vmatprep.mubr.msk.f32.mxu0 %vm18704_vm1, %v18705_v16  ;;  %v18863_v17 = vpack.c.bf16 %v18792_v4, %v18787_v3  ;;  %v18868_v18 = vpack.c.bf16 %v18802_v6, %v18797_v5  ;;  %vm166_vm2 = vcmask 261120   ;;  %v18881_v23 = vpack.c.bf16 %v18817_v9, %v18812_v8  ;;  %s89_s20 = sld [smem:[#allocation3 + %s14501_s6]]  ;;  %s14694_s26 = sshll.u32 %s18699_s19, 3 }
  0x2b   : > { %17385 = vmatpush3.bf16.msra.mxu0 %v18847_v14  ;;  %17386 = vmatprep.subr.bf16.mxu1 %v18703_v15  ;;  %v18886_v24 = vpack.c.bf16 %v18827_v11, %v18822_v10  ;;  %s14469_s27 = scalar_lea.vmem [#allocation7], %s14694_s26  ;;  %s85_s19 = sadd.s32 1, %s18699_s19  }
  0x2c   : > { %15542 = vmatprep.mubr.msk.f32.mxu1 %vm18704_vm1, %v18705_v16  ;;  %17392 = vmatprep.subr.bf16.mxu0 %v18703_v15  ;;  %p82_p13 = scmp.ge.s32.totalorder %s85_s19, 8  }
  0x2d   : > { %17388 = vmatpush3.bf16.msra.mxu1 %v18863_v17  ;;  %s18706_s28 = smov (%p82_p13), [#allocation7]  }
  0x2e   : > { %15532 = vmatmul.mubr.msk.f32.vlgmr.msra.gmra.mrb[0].mxu0 %vm78_vm0, %v18695_v13  ;;  %17389 = vmatprep.subr.bf16.mxu1 %v18703_v15  ;;  %s14476_s1 = sshll.u32 (%p82_p13), %s18706_s28, 4  ;;  %s14477_s1 = int_to_ptr.vmem [resolvable:$true] %s14476_s1 }
  0x2f   : > { %15553 = vmatprep.mubr.msk.f32.mxu0 %vm18704_vm1, %v18705_v16  ;;  %17394 = vmatpush3.bf16.msra.mxu0 %v18881_v23  ;;  %s18657_s29 = scalar_lea.vmem (%p82_p13), %s14477_s1, 1024  ;;  %p18662_p1 = scmp.lt.s32.totalorder (%p82_p13), %s14477_s1, %s14477_s1 }
  0x30   : > { %17395 = vmatprep.subr.bf16.mxu0 %v18703_v15  ;;  %s90_s21 = ssub.f32 %s87_s7, %s89_s20  ;;  %p18658_p0 = scmp.ne.s32.totalorder (%p82_p13), %s14477_s1, %s18657_s29 }
  0x31   : > { %17391 = vmatpush3.bf16.msra.mxu1 %v18868_v18  ;;  %p18663_p2 = scmp.lt.s32.totalorder (%p82_p13), %s18657_s29, %s18657_s29 }
  0x32   : > { %17398 = vmatprep.subr.bf16.mxu1 %v18703_v15  ;;  %s18901_s22 = smul.f32 0.0625, %s90_s21 }
  0x33   : > { %17397 = vmatpush3.bf16.msra.mxu0 %v18886_v24  ;;  %p18664_p3 = por (%p82_p13), %p18663_p2, %p18662_p1 }
  0x34   : > { %17401 = vmatprep.subr.bf16.mxu0 %v18703_v15  ;;  %s318_s23 = smul.f32 0.5, %s18901_s22  ;;  %v18964_v63 = vstv %s18901_s22 }
  0x35   : > { %s314_s24 = smul.f32 0.16666667, %s18901_s22  ;;  %p18665_p4 = pnand (%p82_p13), %p18664_p3, %p18658_p0 }
  0x36   : > { %v18904_v30 = vstv %s318_s23  ;;  %s543_s25 = smul.f32 0.33333334, %s18901_s22 }
  0x37   : > { %v18931_v43 = vstv %s314_s24 }
  0x38   : > { %v18935_v46 = vstv %s543_s25 }
 0x101   : > { %v161_v19 = vpop.f32.mrb[0].mxu0 }
 0x102   : > { %v162_v20 = vadd.f32 %v18782_v2, %v161_v19  ;;  %v15533_v21 = vpop.f32.mrb[1].mxu0 }
 0x104   : > { %18367 = vtanh.f32 %v162_v20 }
 0x10e   : > { %v18368_v22 = vpop.eup %18367 }
 0x10f   : > { %15543 = vmatmul.mubr.msk.f32.vlgmr.msra.gmra.mrb[0].mxu1 %vm166_vm2, %v18368_v22 }
 0x110   : > { %17400 = vmatpush3.bf16.msra.mxu1 %v18847_v14  ;;  %15560 = vmatprep.mubr.msk.f32.mxu1 %vm18704_vm1, %v18705_v16 }
 0x111   : > { %17407 = vmatprep.subr.bf16.mxu1 %v18703_v15 }
 0x1e2   : > { %v236_v25 = vpop.f32.mrb[0].mxu1 }
 0x1e3   : > { %v237_v26 = vadd.f32 %v18807_v7, %v236_v25  ;;  %v15544_v27 = vpop.f32.mrb[1].mxu1 }
 0x1e5   : > { %18369 = vtanh.f32 %v237_v26 }
 0x1ef   : > { %v18370_v28 = vpop.eup %18369 }
 0x1f0   : > { %15554 = vmatmul.mubr.msk.f32.vlgmr.msra.gmra.mrb[2].mxu0 %vm166_vm2, %v18370_v28 }
 0x1f1   : > { %17403 = vmatpush3.bf16.msra.mxu0 %v18863_v17  ;;  %15571 = vmatprep.mubr.msk.f32.mxu0 %vm18704_vm1, %v18705_v16 }
 0x1f2   : > { %17404 = vmatprep.subr.bf16.mxu0 %v18703_v15 }
 0x1f5   : > { %17406 = vmatpush3.bf16.msra.mxu0 %v18868_v18 }
 0x1f6   : > { %17413 = vmatprep.subr.bf16.mxu0 %v18703_v15 }
 0x2c3   : > { %v310_v29 = vpop.f32.mrb[2].mxu0 }
 0x2c4   : > { %v311_v31 = vadd.f32 %v18832_v12, %v310_v29  ;;  %v15555_v32 = vpop.f32.mrb[3].mxu0 }
 0x2c6   : > { %v320_v33 = vmul.f32 %v18904_v30, %v311_v31  ;;  %v316_v44 = vmul.f32 %v18931_v43, %v311_v31 }
 0x2c8   : > { %v321_v34 = vadd.f32 %v18695_v13, %v320_v33  ;;  %v317_v49 = vadd.f32 %v18695_v13, %v316_v44 }
 0x2ca   : > { %15561 = vmatmul.mubr.msk.f32.vlgmr.msra.gmra.mrb[2].mxu1 %vm78_vm0, %v321_v34 }
 0x2cb   : > { %17409 = vmatpush3.bf16.msra.mxu1 %v18881_v23  ;;  %15582 = vmatprep.mubr.msk.f32.mxu1 %vm18704_vm1, %v18705_v16 }
 0x2cc   : > { %17410 = vmatprep.subr.bf16.mxu1 %v18703_v15 }
 0x2cf   : > { %17412 = vmatpush3.bf16.msra.mxu1 %v18886_v24 }
 0x2d0   : > { %17416 = vmatprep.subr.bf16.mxu1 %v18703_v15 }
 0x39d   : > { %v391_v35 = vpop.f32.mrb[2].mxu1 }
 0x39e   : > { %v392_v36 = vadd.f32 %v18782_v2, %v391_v35  ;;  %v15562_v37 = vpop.f32.mrb[3].mxu1 }
 0x3a0   : > { %18371 = vtanh.f32 %v392_v36 }
 0x3aa   : > { %v18372_v38 = vpop.eup %18371 }
 0x3ab   : > { %15572 = vmatmul.mubr.msk.f32.vlgmr.msra.gmra.mrb[4].mxu0 %vm166_vm2, %v18372_v38 }
 0x3ac   : > { %17415 = vmatpush3.bf16.msra.mxu0 %v18847_v14  ;;  %15589 = vmatprep.mubr.msk.f32.mxu0 %vm18704_vm1, %v18705_v16 }
 0x3ad   : > { %17422 = vmatprep.subr.bf16.mxu0 %v18703_v15 }
 0x47e   : > { %v465_v39 = vpop.f32.mrb[4].mxu0 }
 0x47f   : > { %v466_v40 = vadd.f32 %v18807_v7, %v465_v39  ;;  %v15573_v41 = vpop.f32.mrb[5].mxu0 }
 0x481   : > { %18373 = vtanh.f32 %v466_v40 }
 0x48b   : > { %v18374_v42 = vpop.eup %18373 }
 0x48c   : > { %15583 = vmatmul.mubr.msk.f32.vlgmr.msra.gmra.mrb[4].mxu1 %vm166_vm2, %v18374_v42 }
 0x48d   : > { %17418 = vmatpush3.bf16.msra.mxu1 %v18863_v17  ;;  %15600 = vmatprep.mubr.msk.f32.mxu1 %vm18704_vm1, %v18705_v16 }
 0x48e   : > { %17419 = vmatprep.subr.bf16.mxu1 %v18703_v15 }
 0x491   : > { %17421 = vmatpush3.bf16.msra.mxu1 %v18868_v18 }
 0x492   : > { %17428 = vmatprep.subr.bf16.mxu1 %v18703_v15 }
 0x55f   : > { %v539_v45 = vpop.f32.mrb[4].mxu1 }
 0x560   : > { %v540_v47 = vadd.f32 %v18832_v12, %v539_v45  ;;  %v15584_v48 = vpop.f32.mrb[5].mxu1 }
 0x562   : > { %v545_v50 = vmul.f32 %v18935_v46, %v540_v47  ;;  %v547_v51 = vmul.f32 %v540_v47, %v18904_v30 }
 0x564   : > { %v546_v52 = vadd.f32 %v545_v50, %v317_v49  ;;  %v548_v53 = vadd.f32 %v18695_v13, %v547_v51 }
 0x566   : > { %15590 = vmatmul.mubr.msk.f32.vlgmr.msra.gmra.mrb[6].mxu0 %vm78_vm0, %v548_v53 }
 0x567   : > { %17424 = vmatpush3.bf16.msra.mxu0 %v18881_v23  ;;  %15611 = vmatprep.mubr.msk.f32.mxu0 %vm18704_vm1, %v18705_v16 }
 0x568   : > { %17425 = vmatprep.subr.bf16.mxu0 %v18703_v15 }
 0x56b   : > { %17427 = vmatpush3.bf16.msra.mxu0 %v18886_v24 }
 0x56c   : > { %17431 = vmatprep.subr.bf16.mxu0 %v18703_v15 }
 0x639   : > { %v618_v54 = vpop.f32.mrb[6].mxu0 }
 0x63a   : > { %v619_v55 = vadd.f32 %v18782_v2, %v618_v54  ;;  %v15591_v56 = vpop.f32.mrb[7].mxu0 }
 0x63c   : > { %18375 = vtanh.f32 %v619_v55 }
 0x646   : > { %v18376_v57 = vpop.eup %18375 }
 0x647   : > { %15601 = vmatmul.mubr.msk.f32.vlgmr.msra.gmra.mrb[6].mxu1 %vm166_vm2, %v18376_v57 }
 0x648   : > { %17430 = vmatpush3.bf16.msra.mxu1 %v18847_v14  ;;  %15618 = vmatprep.mubr.msk.f32.mxu1 %vm18704_vm1, %v18705_v16 }
 0x649   : > { %17437 = vmatprep.subr.bf16.mxu1 %v18703_v15 }
 0x71a   : > { %v692_v58 = vpop.f32.mrb[6].mxu1 }
 0x71b   : > { %v693_v59 = vadd.f32 %v18807_v7, %v692_v58  ;;  %v15602_v60 = vpop.f32.mrb[7].mxu1 }
 0x71d   : > { %18377 = vtanh.f32 %v693_v59 }
 0x727   : > { %v18378_v61 = vpop.eup %18377 }
 0x728   : > { %15612 = vmatmul.mubr.msk.f32.vlgmr.msra.gmra.mrb[8].mxu0 %vm166_vm2, %v18378_v61 }
 0x729   : > { %17433 = vmatpush3.bf16.msra.mxu0 %v18863_v17  ;;  %15629 = vmatprep.mubr.msk.f32.mxu0 %vm18704_vm1, %v18705_v16 }
 0x72a   : > { %17434 = vmatprep.subr.bf16.mxu0 %v18703_v15 }
 0x72d   : > { %17436 = vmatpush3.bf16.msra.mxu0 %v18868_v18 }
 0x72e   : > { %17443 = vmatprep.subr.bf16.mxu0 %v18703_v15 }
 0x7fb   : > { %v766_v62 = vpop.f32.mrb[8].mxu0 }
 0x7fc   : > { %v767_v19 = vadd.f32 %v18832_v12, %v766_v62  ;;  %v15613_v20 = vpop.f32.mrb[9].mxu0 }
 0x7fe   : > { %v770_v21 = vmul.f32 %v767_v19, %v18935_v46  ;;  %v773_v22 = vmul.f32 %v18964_v63, %v767_v19 }
 0x800   : > { %v771_v25 = vadd.f32 %v770_v21, %v546_v52  ;;  %v774_v26 = vadd.f32 %v18695_v13, %v773_v22 }
 0x802   : > { %15619 = vmatmul.mubr.msk.f32.vlgmr.msra.gmra.mrb[8].mxu1 %vm78_vm0, %v774_v26 }
 0x803   : > { %17439 = vmatpush3.bf16.msra.mxu1 %v18881_v23  ;;  %15640 = vmatprep.mubr.msk.f32.mxu1 %vm18704_vm1, %v18705_v16 }
 0x804   : > { %17440 = vmatprep.subr.bf16.mxu1 %v18703_v15 }
 0x807   : > { %17442 = vmatpush3.bf16.msra.mxu1 %v18886_v24 }
 0x808   : > { %17446 = vmatprep.subr.bf16.mxu1 %v18703_v15 }
 0x8d5   : > { %v844_v27 = vpop.f32.mrb[8].mxu1 }
 0x8d6   : > { %v845_v28 = vadd.f32 %v18782_v2, %v844_v27  ;;  %v15620_v29 = vpop.f32.mrb[9].mxu1 }
 0x8d8   : > { %18379 = vtanh.f32 %v845_v28 }
 0x8e2   : > { %v18380_v31 = vpop.eup %18379 }
 0x8e3   : > { %15630 = vmatmul.mubr.msk.f32.vlgmr.msra.gmra.mrb[10].mxu0 %vm166_vm2, %v18380_v31 }
 0x8e4   : > { %17445 = vmatpush3.bf16.msra.mxu0 %v18847_v14  ;;  %15647 = vmatprep.mubr.msk.f32.mxu0 %vm18704_vm1, %v18705_v16 }
 0x8e5   : > { %17452 = vmatprep.subr.bf16.mxu0 %v18703_v15 }
 0x9b6   : > { %v918_v13 = vpop.f32.mrb[10].mxu0 }
 0x9b7   : > { %v919_v32 = vadd.f32 %v18807_v7, %v918_v13  ;;  %v15631_v33 = vpop.f32.mrb[11].mxu0 }
 0x9b9   : > { %18381 = vtanh.f32 %v919_v32 }
 0x9c3   : > { %v18382_v34 = vpop.eup %18381 }
 0x9c4   : > { %15641 = vmatmul.mubr.msk.f32.vlgmr.msra.gmra.mrb[10].mxu1 %vm166_vm2, %v18382_v34 }
 0x9c5   : > { %17448 = vmatpush3.bf16.msra.mxu1 %v18863_v17  ;;  %15658 = vmatprep.mubr.msk.f32.mxu1 %vm18704_vm1, %v18705_v16 }
 0x9c6   : > { %17449 = vmatprep.subr.bf16.mxu1 %v18703_v15 }
 0x9c9   : > { %17451 = vmatpush3.bf16.msra.mxu1 %v18868_v18 }
 0x9ca   : > { %17458 = vmatprep.subr.bf16.mxu1 %v18703_v15 }
 0xa97   : > { %v992_v35 = vpop.f32.mrb[10].mxu1 }
 0xa98   : > { %v993_v36 = vadd.f32 %v18832_v12, %v992_v35  ;;  %v15642_v37 = vpop.f32.mrb[11].mxu1 }
 0xa9a   : > { %v996_v38 = vmul.f32 %v993_v36, %v18931_v43 }
 0xa9c   : > { %v18993_v39 = vadd.f32 %v996_v38, %v771_v25 }
 0xa9e   : > { %15648 = vmatmul.mubr.msk.f32.vlgmr.msra.gmra.mrb[12].mxu0 %vm78_vm0, %v18993_v39 }
 0xa9f   : > { %17454 = vmatpush3.bf16.msra.mxu0 %v18881_v23  ;;  %15669 = vmatprep.mubr.msk.f32.mxu0 %vm18704_vm1, %v18705_v16 }
 0xaa0   : > { %17455 = vmatprep.subr.bf16.mxu0 %v18703_v15 }
 0xaa3   : > { %17457 = vmatpush3.bf16.msra.mxu0 %v18886_v24 }
 0xaa4   : > { %17461 = vmatprep.subr.bf16.mxu0 %v18703_v15 }
 0xb71   : > { %v1067_v40 = vpop.f32.mrb[12].mxu0 }
 0xb72   : > { %v1068_v41 = vadd.f32 %v18782_v2, %v1067_v40  ;;  %v15649_v42 = vpop.f32.mrb[13].mxu0 }
 0xb74   : > { %18383 = vtanh.f32 %v1068_v41 }
 0xb7e   : > { %v18384_v44 = vpop.eup %18383 }
 0xb7f   : > { %15659 = vmatmul.mubr.msk.f32.vlgmr.msra.gmra.mrb[12].mxu1 %vm166_vm2, %v18384_v44 }
 0xb80   : > { %17460 = vmatpush3.bf16.msra.mxu1 %v18847_v14  ;;  %15676 = vmatprep.mubr.msk.f32.mxu1 %vm18704_vm1, %v18705_v16 }
 0xb81   : > { %17467 = vmatprep.subr.bf16.mxu1 %v18703_v15 }
 0xc52   : > { %v1141_v45 = vpop.f32.mrb[12].mxu1 }
 0xc53   : > { %v1142_v47 = vadd.f32 %v18807_v7, %v1141_v45  ;;  %v15660_v48 = vpop.f32.mrb[13].mxu1 }
 0xc55   : > { %18385 = vtanh.f32 %v1142_v47 }
 0xc5f   : > { %v18386_v49 = vpop.eup %18385 }
 0xc60   : > { %15670 = vmatmul.mubr.msk.f32.vlgmr.msra.gmra.mrb[14].mxu0 %vm166_vm2, %v18386_v49 }
 0xc61   : > { %17463 = vmatpush3.bf16.msra.mxu0 %v18863_v17  ;;  %15687 = vmatprep.mubr.msk.f32.mxu0 %vm18704_vm1, %v18705_v16 }
 0xc62   : > { %17464 = vmatprep.subr.bf16.mxu0 %v18703_v15 }
 0xc65   : > { %17466 = vmatpush3.bf16.msra.mxu0 %v18868_v18 }
 0xc66   : > { %17473 = vmatprep.subr.bf16.mxu0 %v18703_v15 }
 0xd33   : > { %v1215_v50 = vpop.f32.mrb[14].mxu0 }
 0xd34   : > { %v1216_v51 = vadd.f32 %v18832_v12, %v1215_v50  ;;  %v15671_v52 = vpop.f32.mrb[15].mxu0 }
 0xd36   : > { %v1221_v53 = vmul.f32 %v1216_v51, %v18904_v30  ;;  %v1219_v19 = vmul.f32 %v1216_v51, %v18931_v43 }
 0xd38   : > { %v1222_v54 = vadd.f32 %v1221_v53, %v18993_v39  ;;  %v1220_v25 = vadd.f32 %v1219_v19, %v18993_v39 }
 0xd3a   : > { %15677 = vmatmul.mubr.msk.f32.vlgmr.msra.gmra.mrb[14].mxu1 %vm78_vm0, %v1222_v54 }
 0xd3b   : > { %17469 = vmatpush3.bf16.msra.mxu1 %v18881_v23  ;;  %15698 = vmatprep.mubr.msk.f32.mxu1 %vm18704_vm1, %v18705_v16 }
 0xd3c   : > { %17470 = vmatprep.subr.bf16.mxu1 %v18703_v15 }
 0xd3f   : > { %17472 = vmatpush3.bf16.msra.mxu1 %v18886_v24 }
 0xd40   : > { %17476 = vmatprep.subr.bf16.mxu1 %v18703_v15 }
 0xe0d   : > { %v1292_v55 = vpop.f32.mrb[14].mxu1 }
 0xe0e   : > { %v1293_v56 = vadd.f32 %v18782_v2, %v1292_v55  ;;  %v15678_v57 = vpop.f32.mrb[15].mxu1 }
 0xe10   : > { %18387 = vtanh.f32 %v1293_v56 }
 0xe1a   : > { %v18388_v58 = vpop.eup %18387 }
 0xe1b   : > { %15688 = vmatmul.mubr.msk.f32.vlgmr.msra.gmra.mrb[16].mxu0 %vm166_vm2, %v18388_v58 }
 0xe1c   : > { %17475 = vmatpush3.bf16.msra.mxu0 %v18847_v14  ;;  %15705 = vmatprep.mubr.msk.f32.mxu0 %vm18704_vm1, %v18705_v16 }
 0xe1d   : > { %17482 = vmatprep.subr.bf16.mxu0 %v18703_v15 }
 0xeee   : > { %v1366_v59 = vpop.f32.mrb[16].mxu0 }
 0xeef   : > { %v1367_v60 = vadd.f32 %v18807_v7, %v1366_v59  ;;  %v15689_v61 = vpop.f32.mrb[17].mxu0 }
 0xef1   : > { %18389 = vtanh.f32 %v1367_v60 }
 0xefb   : > { %v18390_v62 = vpop.eup %18389 }
 0xefc   : > { %15699 = vmatmul.mubr.msk.f32.vlgmr.msra.gmra.mrb[16].mxu1 %vm166_vm2, %v18390_v62 }
 0xefd   : > { %17478 = vmatpush3.bf16.msra.mxu1 %v18863_v17  ;;  %15716 = vmatprep.mubr.msk.f32.mxu1 %vm18704_vm1, %v18705_v16 }
 0xefe   : > { %17479 = vmatprep.subr.bf16.mxu1 %v18703_v15 }
 0xf01   : > { %17481 = vmatpush3.bf16.msra.mxu1 %v18868_v18 }
 0xf02   : > { %17488 = vmatprep.subr.bf16.mxu1 %v18703_v15 }
 0xfcf   : > { %v1440_v20 = vpop.f32.mrb[16].mxu1 }
 0xfd0   : > { %v1441_v21 = vadd.f32 %v18832_v12, %v1440_v20  ;;  %v15700_v22 = vpop.f32.mrb[17].mxu1 }
 0xfd2   : > { %v1444_v26 = vmul.f32 %v1441_v21, %v18935_v46  ;;  %v1446_v27 = vmul.f32 %v1441_v21, %v18904_v30 }
 0xfd4   : > { %v1445_v28 = vadd.f32 %v1444_v26, %v1220_v25  ;;  %v1447_v29 = vadd.f32 %v1446_v27, %v18993_v39 }
 0xfd6   : > { %15706 = vmatmul.mubr.msk.f32.vlgmr.msra.gmra.mrb[18].mxu0 %vm78_vm0, %v1447_v29 }
 0xfd7   : > { %17484 = vmatpush3.bf16.msra.mxu0 %v18881_v23  ;;  %15727 = vmatprep.mubr.msk.f32.mxu0 %vm18704_vm1, %v18705_v16 }
 0xfd8   : > { %17485 = vmatprep.subr.bf16.mxu0 %v18703_v15 }
 0xfdb   : > { %17487 = vmatpush3.bf16.msra.mxu0 %v18886_v24 }
 0xfdc   : > { %17491 = vmatprep.subr.bf16.mxu0 %v18703_v15 }
0x10a9   : > { %v1517_v31 = vpop.f32.mrb[18].mxu0 }
0x10aa   : > { %v1518_v13 = vadd.f32 %v18782_v2, %v1517_v31  ;;  %v15707_v32 = vpop.f32.mrb[19].mxu0 }
0x10ac   : > { %18391 = vtanh.f32 %v1518_v13 }
0x10b6   : > { %v18392_v33 = vpop.eup %18391 }
0x10b7   : > { %15717 = vmatmul.mubr.msk.f32.vlgmr.msra.gmra.mrb[18].mxu1 %vm166_vm2, %v18392_v33 }
0x10b8   : > { %17490 = vmatpush3.bf16.msra.mxu1 %v18847_v14  ;;  %15734 = vmatprep.mubr.msk.f32.mxu1 %vm18704_vm1, %v18705_v16 }
0x10b9   : > { %17497 = vmatprep.subr.bf16.mxu1 %v18703_v15 }
0x118a   : > { %v1591_v34 = vpop.f32.mrb[18].mxu1 }
0x118b   : > { %v1592_v35 = vadd.f32 %v18807_v7, %v1591_v34  ;;  %v15718_v36 = vpop.f32.mrb[19].mxu1 }
0x118d   : > { %18393 = vtanh.f32 %v1592_v35 }
0x1197   : > { %v18394_v37 = vpop.eup %18393 }
0x1198   : > { %15728 = vmatmul.mubr.msk.f32.vlgmr.msra.gmra.mrb[20].mxu0 %vm166_vm2, %v18394_v37 }
0x1199   : > { %17493 = vmatpush3.bf16.msra.mxu0 %v18863_v17  ;;  %15745 = vmatprep.mubr.msk.f32.mxu0 %vm18704_vm1, %v18705_v16 }
0x119a   : > { %17494 = vmatprep.subr.bf16.mxu0 %v18703_v15 }
0x119d   : > { %17496 = vmatpush3.bf16.msra.mxu0 %v18868_v18 }
0x119e   : > { %17503 = vmatprep.subr.bf16.mxu0 %v18703_v15 }
0x126b   : > { %v1665_v38 = vpop.f32.mrb[20].mxu0 }
0x126c   : > { %v1666_v40 = vadd.f32 %v18832_v12, %v1665_v38  ;;  %v15729_v41 = vpop.f32.mrb[21].mxu0 }
0x126e   : > { %v1669_v42 = vmul.f32 %v1666_v40, %v18935_v46  ;;  %v1671_v44 = vmul.f32 %v1666_v40, %v18964_v63 }
0x1270   : > { %v1670_v45 = vadd.f32 %v1669_v42, %v1445_v28  ;;  %v1672_v47 = vadd.f32 %v1671_v44, %v18993_v39 }
0x1272   : > { %15735 = vmatmul.mubr.msk.f32.vlgmr.msra.gmra.mrb[20].mxu1 %vm78_vm0, %v1672_v47 }
0x1273   : > { %17499 = vmatpush3.bf16.msra.mxu1 %v18881_v23  ;;  %15756 = vmatprep.mubr.msk.f32.mxu1 %vm18704_vm1, %v18705_v16 }
0x1274   : > { %17500 = vmatprep.subr.bf16.mxu1 %v18703_v15 }
0x1277   : > { %17502 = vmatpush3.bf16.msra.mxu1 %v18886_v24 }
0x1278   : > { %17506 = vmatprep.subr.bf16.mxu1 %v18703_v15 }
0x1345   : > { %v1742_v48 = vpop.f32.mrb[20].mxu1 }
0x1346   : > { %v1743_v49 = vadd.f32 %v18782_v2, %v1742_v48  ;;  %v15736_v50 = vpop.f32.mrb[21].mxu1 }
0x1348   : > { %18395 = vtanh.f32 %v1743_v49 }
0x1352   : > { %v18396_v51 = vpop.eup %18395 }
0x1353   : > { %15746 = vmatmul.mubr.msk.f32.vlgmr.msra.gmra.mrb[22].mxu0 %vm166_vm2, %v18396_v51 }
0x1354   : > { %17505 = vmatpush3.bf16.msra.mxu0 %v18847_v14  ;;  %15763 = vmatprep.mubr.msk.f32.mxu0 %vm18704_vm1, %v18705_v16 }
0x1355   : > { %17512 = vmatprep.subr.bf16.mxu0 %v18703_v15 }
0x1426   : > { %v1816_v39 = vpop.f32.mrb[22].mxu0 }
0x1427   : > { %v1817_v52 = vadd.f32 %v18807_v7, %v1816_v39  ;;  %v15747_v53 = vpop.f32.mrb[23].mxu0 }
0x1429   : > { %18397 = vtanh.f32 %v1817_v52 }
0x1433   : > { %v18398_v54 = vpop.eup %18397 }
0x1434   : > { %15757 = vmatmul.mubr.msk.f32.vlgmr.msra.gmra.mrb[22].mxu1 %vm166_vm2, %v18398_v54 }
0x1435   : > { %17508 = vmatpush3.bf16.msra.mxu1 %v18863_v17  ;;  %15774 = vmatprep.mubr.msk.f32.mxu1 %vm18704_vm1, %v18705_v16 }
0x1436   : > { %17509 = vmatprep.subr.bf16.mxu1 %v18703_v15 }
0x1439   : > { %17511 = vmatpush3.bf16.msra.mxu1 %v18868_v18 }
0x143a   : > { %17518 = vmatprep.subr.bf16.mxu1 %v18703_v15 }
0x1507   : > { %v1890_v55 = vpop.f32.mrb[22].mxu1 }
0x1508   : > { %v1891_v56 = vadd.f32 %v18832_v12, %v1890_v55  ;;  %v15758_v57 = vpop.f32.mrb[23].mxu1 }
0x150a   : > { %v1894_v58 = vmul.f32 %v1891_v56, %v18931_v43 }
0x150c   : > { %v19095_v59 = vadd.f32 %v1894_v58, %v1670_v45 }
0x150e   : > { %15764 = vmatmul.mubr.msk.f32.vlgmr.msra.gmra.mrb[24].mxu0 %vm78_vm0, %v19095_v59 }
0x150f   : > { %17514 = vmatpush3.bf16.msra.mxu0 %v18881_v23  ;;  %15785 = vmatprep.mubr.msk.f32.mxu0 %vm18704_vm1, %v18705_v16 }
0x1510   : > { %17515 = vmatprep.subr.bf16.mxu0 %v18703_v15 }
0x1513   : > { %17517 = vmatpush3.bf16.msra.mxu0 %v18886_v24 }
0x1514   : > { %17521 = vmatprep.subr.bf16.mxu0 %v18703_v15 }
0x15e1   : > { %v1965_v60 = vpop.f32.mrb[24].mxu0 }
0x15e2   : > { %v1966_v61 = vadd.f32 %v18782_v2, %v1965_v60  ;;  %v15765_v62 = vpop.f32.mrb[25].mxu0 }
0x15e4   : > { %18399 = vtanh.f32 %v1966_v61 }
0x15ee   : > { %v18400_v19 = vpop.eup %18399 }
0x15ef   : > { %15775 = vmatmul.mubr.msk.f32.vlgmr.msra.gmra.mrb[24].mxu1 %vm166_vm2, %v18400_v19 }
0x15f0   : > { %17520 = vmatpush3.bf16.msra.mxu1 %v18847_v14  ;;  %15792 = vmatprep.mubr.msk.f32.mxu1 %vm18704_vm1, %v18705_v16 }
0x15f1   : > { %17527 = vmatprep.subr.bf16.mxu1 %v18703_v15 }
0x16c2   : > { %v2039_v20 = vpop.f32.mrb[24].mxu1 }
0x16c3   : > { %v2040_v21 = vadd.f32 %v18807_v7, %v2039_v20  ;;  %v15776_v22 = vpop.f32.mrb[25].mxu1 }
0x16c5   : > { %18401 = vtanh.f32 %v2040_v21 }
0x16cf   : > { %v18402_v25 = vpop.eup %18401 }
0x16d0   : > { %15786 = vmatmul.mubr.msk.f32.vlgmr.msra.gmra.mrb[26].mxu0 %vm166_vm2, %v18402_v25 }
0x16d1   : > { %17523 = vmatpush3.bf16.msra.mxu0 %v18863_v17  ;;  %15803 = vmatprep.mubr.msk.f32.mxu0 %vm18704_vm1, %v18705_v16 }
0x16d2   : > { %17524 = vmatprep.subr.bf16.mxu0 %v18703_v15 }
0x16d5   : > { %17526 = vmatpush3.bf16.msra.mxu0 %v18868_v18 }
0x16d6   : > { %17533 = vmatprep.subr.bf16.mxu0 %v18703_v15 }
0x17a3   : > { %v2113_v26 = vpop.f32.mrb[26].mxu0 }
0x17a4   : > { %v2114_v27 = vadd.f32 %v18832_v12, %v2113_v26  ;;  %v15787_v28 = vpop.f32.mrb[27].mxu0 }
0x17a6   : > { %v2119_v29 = vmul.f32 %v2114_v27, %v18904_v30  ;;  %v2117_v40 = vmul.f32 %v2114_v27, %v18931_v43 }
0x17a8   : > { %v2120_v31 = vadd.f32 %v2119_v29, %v19095_v59  ;;  %v2118_v45 = vadd.f32 %v2117_v40, %v19095_v59 }
0x17aa   : > { %15793 = vmatmul.mubr.msk.f32.vlgmr.msra.gmra.mrb[26].mxu1 %vm78_vm0, %v2120_v31 }
0x17ab   : > { %17529 = vmatpush3.bf16.msra.mxu1 %v18881_v23  ;;  %15814 = vmatprep.mubr.msk.f32.mxu1 %vm18704_vm1, %v18705_v16 }
0x17ac   : > { %17530 = vmatprep.subr.bf16.mxu1 %v18703_v15 }
0x17af   : > { %17532 = vmatpush3.bf16.msra.mxu1 %v18886_v24 }
0x17b0   : > { %17536 = vmatprep.subr.bf16.mxu1 %v18703_v15 }
0x187d   : > { %v2190_v13 = vpop.f32.mrb[26].mxu1 }
0x187e   : > { %v2191_v32 = vadd.f32 %v18782_v2, %v2190_v13  ;;  %v15794_v33 = vpop.f32.mrb[27].mxu1 }
0x1880   : > { %18403 = vtanh.f32 %v2191_v32 }
0x188a   : > { %v18404_v34 = vpop.eup %18403 }
0x188b   : > { %15804 = vmatmul.mubr.msk.f32.vlgmr.msra.gmra.mrb[28].mxu0 %vm166_vm2, %v18404_v34 }
0x188c   : > { %17535 = vmatpush3.bf16.msra.mxu0 %v18847_v14  ;;  %15821 = vmatprep.mubr.msk.f32.mxu0 %vm18704_vm1, %v18705_v16 }
0x188d   : > { %17542 = vmatprep.subr.bf16.mxu0 %v18703_v15 }
0x195e   : > { %v2264_v35 = vpop.f32.mrb[28].mxu0 }
0x195f   : > { %v2265_v36 = vadd.f32 %v18807_v7, %v2264_v35  ;;  %v15805_v37 = vpop.f32.mrb[29].mxu0 }
0x1961   : > { %18405 = vtanh.f32 %v2265_v36 }
0x196b   : > { %v18406_v38 = vpop.eup %18405 }
0x196c   : > { %15815 = vmatmul.mubr.msk.f32.vlgmr.msra.gmra.mrb[28].mxu1 %vm166_vm2, %v18406_v38 }
0x196d   : > { %17538 = vmatpush3.bf16.msra.mxu1 %v18863_v17  ;;  %15832 = vmatprep.mubr.msk.f32.mxu1 %vm18704_vm1, %v18705_v16 }
0x196e   : > { %17539 = vmatprep.subr.bf16.mxu1 %v18703_v15 }
0x1971   : > { %17541 = vmatpush3.bf16.msra.mxu1 %v18868_v18 }
0x1972   : > { %17548 = vmatprep.subr.bf16.mxu1 %v18703_v15 }
0x1a3f   : > { %v2338_v41 = vpop.f32.mrb[28].mxu1 }
0x1a40   : > { %v2339_v42 = vadd.f32 %v18832_v12, %v2338_v41  ;;  %v15816_v44 = vpop.f32.mrb[29].mxu1 }
0x1a42   : > { %v2342_v47 = vmul.f32 %v2339_v42, %v18935_v46  ;;  %v2344_v48 = vmul.f32 %v2339_v42, %v18904_v30 }
0x1a44   : > { %v2343_v49 = vadd.f32 %v2342_v47, %v2118_v45  ;;  %v2345_v50 = vadd.f32 %v2344_v48, %v19095_v59 }
0x1a46   : > { %15822 = vmatmul.mubr.msk.f32.vlgmr.msra.gmra.mrb[30].mxu0 %vm78_vm0, %v2345_v50 }
0x1a47   : > { %17544 = vmatpush3.bf16.msra.mxu0 %v18881_v23  ;;  %15843 = vmatprep.mubr.msk.f32.mxu0 %vm18704_vm1, %v18705_v16 }
0x1a48   : > { %17545 = vmatprep.subr.bf16.mxu0 %v18703_v15 }
0x1a4b   : > { %17547 = vmatpush3.bf16.msra.mxu0 %v18886_v24 }
0x1a4c   : > { %17551 = vmatprep.subr.bf16.mxu0 %v18703_v15 }
0x1b19   : > { %v2415_v51 = vpop.f32.mrb[30].mxu0 }
0x1b1a   : > { %v2416_v39 = vadd.f32 %v18782_v2, %v2415_v51  ;;  %v15823_v52 = vpop.f32.mrb[31].mxu0 }
0x1b1c   : > { %18407 = vtanh.f32 %v2416_v39 }
0x1b26   : > { %v18408_v53 = vpop.eup %18407 }
0x1b27   : > { %15833 = vmatmul.mubr.msk.f32.vlgmr.msra.gmra.mrb[30].mxu1 %vm166_vm2, %v18408_v53 }
0x1b28   : > { %17550 = vmatpush3.bf16.msra.mxu1 %v18847_v14  ;;  %15850 = vmatprep.mubr.msk.f32.mxu1 %vm18704_vm1, %v18705_v16 }
0x1b29   : > { %17557 = vmatprep.subr.bf16.mxu1 %v18703_v15 }
0x1bfa   : > { %v2489_v54 = vpop.f32.mrb[30].mxu1 }
0x1bfb   : > { %v2490_v55 = vadd.f32 %v18807_v7, %v2489_v54  ;;  %v15834_v56 = vpop.f32.mrb[31].mxu1 }
0x1bfd   : > { %18409 = vtanh.f32 %v2490_v55 }
0x1c07   : > { %v18410_v57 = vpop.eup %18409 }
0x1c08   : > { %15844 = vmatmul.mubr.msk.f32.vlgmr.msra.gmra.mrb[32].mxu0 %vm166_vm2, %v18410_v57 }
0x1c09   : > { %17553 = vmatpush3.bf16.msra.mxu0 %v18863_v17  ;;  %15861 = vmatprep.mubr.msk.f32.mxu0 %vm18704_vm1, %v18705_v16 }
0x1c0a   : > { %17554 = vmatprep.subr.bf16.mxu0 %v18703_v15 }
0x1c0d   : > { %17556 = vmatpush3.bf16.msra.mxu0 %v18868_v18 }
0x1c0e   : > { %17563 = vmatprep.subr.bf16.mxu0 %v18703_v15 }
0x1cdb   : > { %v2563_v58 = vpop.f32.mrb[32].mxu0 }
0x1cdc   : > { %v2564_v60 = vadd.f32 %v18832_v12, %v2563_v58  ;;  %v15845_v61 = vpop.f32.mrb[33].mxu0 }
0x1cde   : > { %v2567_v62 = vmul.f32 %v2564_v60, %v18935_v46  ;;  %v2569_v19 = vmul.f32 %v2564_v60, %v18964_v63 }
0x1ce0   : > { %v2568_v20 = vadd.f32 %v2567_v62, %v2343_v49  ;;  %v2570_v21 = vadd.f32 %v2569_v19, %v19095_v59 }
0x1ce2   : > { %15851 = vmatmul.mubr.msk.f32.vlgmr.msra.gmra.mrb[32].mxu1 %vm78_vm0, %v2570_v21 }
0x1ce3   : > { %17559 = vmatpush3.bf16.msra.mxu1 %v18881_v23  ;;  %15872 = vmatprep.mubr.msk.f32.mxu1 %vm18704_vm1, %v18705_v16 }
0x1ce4   : > { %17560 = vmatprep.subr.bf16.mxu1 %v18703_v15 }
0x1ce7   : > { %17562 = vmatpush3.bf16.msra.mxu1 %v18886_v24 }
0x1ce8   : > { %17566 = vmatprep.subr.bf16.mxu1 %v18703_v15 }
0x1db5   : > { %v2640_v22 = vpop.f32.mrb[32].mxu1 }
0x1db6   : > { %v2641_v25 = vadd.f32 %v18782_v2, %v2640_v22  ;;  %v15852_v26 = vpop.f32.mrb[33].mxu1 }
0x1db8   : > { %18411 = vtanh.f32 %v2641_v25 }
0x1dc2   : > { %v18412_v27 = vpop.eup %18411 }
0x1dc3   : > { %15862 = vmatmul.mubr.msk.f32.vlgmr.msra.gmra.mrb[34].mxu0 %vm166_vm2, %v18412_v27 }
0x1dc4   : > { %17565 = vmatpush3.bf16.msra.mxu0 %v18847_v14  ;;  %15879 = vmatprep.mubr.msk.f32.mxu0 %vm18704_vm1, %v18705_v16 }
0x1dc5   : > { %17572 = vmatprep.subr.bf16.mxu0 %v18703_v15 }
0x1e96   : > { %v2714_v59 = vpop.f32.mrb[34].mxu0 }
0x1e97   : > { %v2715_v28 = vadd.f32 %v18807_v7, %v2714_v59  ;;  %v15863_v29 = vpop.f32.mrb[35].mxu0 }
0x1e99   : > { %18413 = vtanh.f32 %v2715_v28 }
0x1ea3   : > { %v18414_v31 = vpop.eup %18413 }
0x1ea4   : > { %15873 = vmatmul.mubr.msk.f32.vlgmr.msra.gmra.mrb[34].mxu1 %vm166_vm2, %v18414_v31 }
0x1ea5   : > { %17568 = vmatpush3.bf16.msra.mxu1 %v18863_v17  ;;  %15890 = vmatprep.mubr.msk.f32.mxu1 %vm18704_vm1, %v18705_v16 }
0x1ea6   : > { %17569 = vmatprep.subr.bf16.mxu1 %v18703_v15 }
0x1ea9   : > { %17571 = vmatpush3.bf16.msra.mxu1 %v18868_v18 }
0x1eaa   : > { %17578 = vmatprep.subr.bf16.mxu1 %v18703_v15 }
0x1f77   : > { %v2788_v13 = vpop.f32.mrb[34].mxu1 }
0x1f78   : > { %v2789_v32 = vadd.f32 %v18832_v12, %v2788_v13  ;;  %v15874_v33 = vpop.f32.mrb[35].mxu1 }
0x1f7a   : > { %v2792_v34 = vmul.f32 %v2789_v32, %v18931_v43 }
0x1f7c   : > { %v19197_v35 = vadd.f32 %v2792_v34, %v2568_v20 }
0x1f7e   : > { %15880 = vmatmul.mubr.msk.f32.vlgmr.msra.gmra.mrb[36].mxu0 %vm78_vm0, %v19197_v35 }
0x1f7f   : > { %17574 = vmatpush3.bf16.msra.mxu0 %v18881_v23  ;;  %15901 = vmatprep.mubr.msk.f32.mxu0 %vm18704_vm1, %v18705_v16 }
0x1f80   : > { %17575 = vmatprep.subr.bf16.mxu0 %v18703_v15 }
0x1f83   : > { %17577 = vmatpush3.bf16.msra.mxu0 %v18886_v24 }
0x1f84   : > { %17581 = vmatprep.subr.bf16.mxu0 %v18703_v15 }
0x2051   : > { %v2863_v36 = vpop.f32.mrb[36].mxu0 }
0x2052   : > { %v2864_v37 = vadd.f32 %v18782_v2, %v2863_v36  ;;  %v15881_v38 = vpop.f32.mrb[37].mxu0 }
0x2054   : > { %18415 = vtanh.f32 %v2864_v37 }
0x205e   : > { %v18416_v40 = vpop.eup %18415 }
0x205f   : > { %15891 = vmatmul.mubr.msk.f32.vlgmr.msra.gmra.mrb[36].mxu1 %vm166_vm2, %v18416_v40 }
0x2060   : > { %17580 = vmatpush3.bf16.msra.mxu1 %v18847_v14  ;;  %15908 = vmatprep.mubr.msk.f32.mxu1 %vm18704_vm1, %v18705_v16 }
0x2061   : > { %17587 = vmatprep.subr.bf16.mxu1 %v18703_v15 }
0x2132   : > { %v2937_v41 = vpop.f32.mrb[36].mxu1 }
0x2133   : > { %v2938_v42 = vadd.f32 %v18807_v7, %v2937_v41  ;;  %v15892_v44 = vpop.f32.mrb[37].mxu1 }
0x2135   : > { %18417 = vtanh.f32 %v2938_v42 }
0x213f   : > { %v18418_v45 = vpop.eup %18417 }
0x2140   : > { %15902 = vmatmul.mubr.msk.f32.vlgmr.msra.gmra.mrb[38].mxu0 %vm166_vm2, %v18418_v45 }
0x2141   : > { %17583 = vmatpush3.bf16.msra.mxu0 %v18863_v17  ;;  %15919 = vmatprep.mubr.msk.f32.mxu0 %vm18704_vm1, %v18705_v16 }
0x2142   : > { %17584 = vmatprep.subr.bf16.mxu0 %v18703_v15 }
0x2145   : > { %17586 = vmatpush3.bf16.msra.mxu0 %v18868_v18 }
0x2146   : > { %17593 = vmatprep.subr.bf16.mxu0 %v18703_v15 }
0x2213   : > { %v3011_v47 = vpop.f32.mrb[38].mxu0 }
0x2214   : > { %v3012_v48 = vadd.f32 %v18832_v12, %v3011_v47  ;;  %v15903_v49 = vpop.f32.mrb[39].mxu0 }
0x2216   : > { %v3017_v50 = vmul.f32 %v3012_v48, %v18904_v30  ;;  %v3015_v60 = vmul.f32 %v3012_v48, %v18931_v43 }
0x2218   : > { %v3018_v51 = vadd.f32 %v3017_v50, %v19197_v35  ;;  %v3016_v20 = vadd.f32 %v3015_v60, %v19197_v35 }
0x221a   : > { %15909 = vmatmul.mubr.msk.f32.vlgmr.msra.gmra.mrb[38].mxu1 %vm78_vm0, %v3018_v51 }
0x221b   : > { %17589 = vmatpush3.bf16.msra.mxu1 %v18881_v23  ;;  %15930 = vmatprep.mubr.msk.f32.mxu1 %vm18704_vm1, %v18705_v16 }
0x221c   : > { %17590 = vmatprep.subr.bf16.mxu1 %v18703_v15 }
0x221f   : > { %17592 = vmatpush3.bf16.msra.mxu1 %v18886_v24 }
0x2220   : > { %17596 = vmatprep.subr.bf16.mxu1 %v18703_v15 }
0x22ed   : > { %v3088_v39 = vpop.f32.mrb[38].mxu1 }
0x22ee   : > { %v3089_v52 = vadd.f32 %v18782_v2, %v3088_v39  ;;  %v15910_v53 = vpop.f32.mrb[39].mxu1 }
0x22f0   : > { %18419 = vtanh.f32 %v3089_v52 }
0x22fa   : > { %v18420_v54 = vpop.eup %18419 }
0x22fb   : > { %15920 = vmatmul.mubr.msk.f32.vlgmr.msra.gmra.mrb[40].mxu0 %vm166_vm2, %v18420_v54 }
0x22fc   : > { %17595 = vmatpush3.bf16.msra.mxu0 %v18847_v14  ;;  %15937 = vmatprep.mubr.msk.f32.mxu0 %vm18704_vm1, %v18705_v16 }
0x22fd   : > { %17602 = vmatprep.subr.bf16.mxu0 %v18703_v15 }
0x23ce   : > { %v3162_v55 = vpop.f32.mrb[40].mxu0 }
0x23cf   : > { %v3163_v56 = vadd.f32 %v18807_v7, %v3162_v55  ;;  %v15921_v57 = vpop.f32.mrb[41].mxu0 }
0x23d1   : > { %18421 = vtanh.f32 %v3163_v56 }
0x23db   : > { %v18422_v58 = vpop.eup %18421 }
0x23dc   : > { %15931 = vmatmul.mubr.msk.f32.vlgmr.msra.gmra.mrb[40].mxu1 %vm166_vm2, %v18422_v58 }
0x23dd   : > { %17598 = vmatpush3.bf16.msra.mxu1 %v18863_v17  ;;  %15948 = vmatprep.mubr.msk.f32.mxu1 %vm18704_vm1, %v18705_v16 }
0x23de   : > { %17599 = vmatprep.subr.bf16.mxu1 %v18703_v15 }
0x23e1   : > { %17601 = vmatpush3.bf16.msra.mxu1 %v18868_v18 }
0x23e2   : > { %17608 = vmatprep.subr.bf16.mxu1 %v18703_v15 }
0x24af   : > { %v3236_v61 = vpop.f32.mrb[40].mxu1 }
0x24b0   : > { %v3237_v62 = vadd.f32 %v18832_v12, %v3236_v61  ;;  %v15932_v19 = vpop.f32.mrb[41].mxu1 }
0x24b2   : > { %v3240_v21 = vmul.f32 %v3237_v62, %v18935_v46  ;;  %v3242_v22 = vmul.f32 %v3237_v62, %v18904_v30 }
0x24b4   : > { %v3241_v25 = vadd.f32 %v3240_v21, %v3016_v20  ;;  %v3243_v26 = vadd.f32 %v3242_v22, %v19197_v35 }
0x24b6   : > { %15938 = vmatmul.mubr.msk.f32.vlgmr.msra.gmra.mrb[42].mxu0 %vm78_vm0, %v3243_v26 }
0x24b7   : > { %17604 = vmatpush3.bf16.msra.mxu0 %v18881_v23  ;;  %15959 = vmatprep.mubr.msk.f32.mxu0 %vm18704_vm1, %v18705_v16 }
0x24b8   : > { %17605 = vmatprep.subr.bf16.mxu0 %v18703_v15 }
0x24bb   : > { %17607 = vmatpush3.bf16.msra.mxu0 %v18886_v24 }
0x24bc   : > { %17611 = vmatprep.subr.bf16.mxu0 %v18703_v15 }
0x2589   : > { %v3313_v27 = vpop.f32.mrb[42].mxu0 }
0x258a   : > { %v3314_v59 = vadd.f32 %v18782_v2, %v3313_v27  ;;  %v15939_v28 = vpop.f32.mrb[43].mxu0 }
0x258c   : > { %18423 = vtanh.f32 %v3314_v59 }
0x2596   : > { %v18424_v29 = vpop.eup %18423 }
0x2597   : > { %15949 = vmatmul.mubr.msk.f32.vlgmr.msra.gmra.mrb[42].mxu1 %vm166_vm2, %v18424_v29 }
0x2598   : > { %17610 = vmatpush3.bf16.msra.mxu1 %v18847_v14  ;;  %15966 = vmatprep.mubr.msk.f32.mxu1 %vm18704_vm1, %v18705_v16 }
0x2599   : > { %17617 = vmatprep.subr.bf16.mxu1 %v18703_v15 }
0x266a   : > { %v3387_v31 = vpop.f32.mrb[42].mxu1 }
0x266b   : > { %v3388_v13 = vadd.f32 %v18807_v7, %v3387_v31  ;;  %v15950_v32 = vpop.f32.mrb[43].mxu1 }
0x266d   : > { %18425 = vtanh.f32 %v3388_v13 }
0x2677   : > { %v18426_v33 = vpop.eup %18425 }
0x2678   : > { %15960 = vmatmul.mubr.msk.f32.vlgmr.msra.gmra.mrb[44].mxu0 %vm166_vm2, %v18426_v33 }
0x2679   : > { %17613 = vmatpush3.bf16.msra.mxu0 %v18863_v17  ;;  %15977 = vmatprep.mubr.msk.f32.mxu0 %vm18704_vm1, %v18705_v16 }
0x267a   : > { %17614 = vmatprep.subr.bf16.mxu0 %v18703_v15 }
0x267d   : > { %17616 = vmatpush3.bf16.msra.mxu0 %v18868_v18 }
0x267e   : > { %17623 = vmatprep.subr.bf16.mxu0 %v18703_v15 }
0x274b   : > { %v3461_v34 = vpop.f32.mrb[44].mxu0 }
0x274c   : > { %v3462_v36 = vadd.f32 %v18832_v12, %v3461_v34  ;;  %v15961_v37 = vpop.f32.mrb[45].mxu0 }
0x274e   : > { %v3465_v38 = vmul.f32 %v3462_v36, %v18935_v46  ;;  %v3467_v40 = vmul.f32 %v3462_v36, %v18964_v63 }
0x2750   : > { %v3466_v41 = vadd.f32 %v3465_v38, %v3241_v25  ;;  %v3468_v42 = vadd.f32 %v3467_v40, %v19197_v35 }
0x2752   : > { %15967 = vmatmul.mubr.msk.f32.vlgmr.msra.gmra.mrb[44].mxu1 %vm78_vm0, %v3468_v42 }
0x2753   : > { %17619 = vmatpush3.bf16.msra.mxu1 %v18881_v23  ;;  %15988 = vmatprep.mubr.msk.f32.mxu1 %vm18704_vm1, %v18705_v16 }
0x2754   : > { %17620 = vmatprep.subr.bf16.mxu1 %v18703_v15 }
0x2757   : > { %17622 = vmatpush3.bf16.msra.mxu1 %v18886_v24 }
0x2758   : > { %17626 = vmatprep.subr.bf16.mxu1 %v18703_v15 }
0x2825   : > { %v3538_v44 = vpop.f32.mrb[44].mxu1 }
0x2826   : > { %v3539_v45 = vadd.f32 %v18782_v2, %v3538_v44  ;;  %v15968_v47 = vpop.f32.mrb[45].mxu1 }
0x2828   : > { %18427 = vtanh.f32 %v3539_v45 }
0x2832   : > { %v18428_v48 = vpop.eup %18427 }
0x2833   : > { %15978 = vmatmul.mubr.msk.f32.vlgmr.msra.gmra.mrb[46].mxu0 %vm166_vm2, %v18428_v48 }
0x2834   : > { %17625 = vmatpush3.bf16.msra.mxu0 %v18847_v14  ;;  %15995 = vmatprep.mubr.msk.f32.mxu0 %vm18704_vm1, %v18705_v16 }
0x2835   : > { %17632 = vmatprep.subr.bf16.mxu0 %v18703_v15 }
0x2906   : > { %v3612_v35 = vpop.f32.mrb[46].mxu0 }
0x2907   : > { %v3613_v49 = vadd.f32 %v18807_v7, %v3612_v35  ;;  %v15979_v50 = vpop.f32.mrb[47].mxu0 }
0x2909   : > { %18429 = vtanh.f32 %v3613_v49 }
0x2913   : > { %v18430_v51 = vpop.eup %18429 }
0x2914   : > { %15989 = vmatmul.mubr.msk.f32.vlgmr.msra.gmra.mrb[46].mxu1 %vm166_vm2, %v18430_v51 }
0x2915   : > { %17628 = vmatpush3.bf16.msra.mxu1 %v18863_v17  ;;  %16006 = vmatprep.mubr.msk.f32.mxu1 %vm18704_vm1, %v18705_v16 }
0x2916   : > { %17629 = vmatprep.subr.bf16.mxu1 %v18703_v15 }
0x2919   : > { %17631 = vmatpush3.bf16.msra.mxu1 %v18868_v18 }
0x291a   : > { %17638 = vmatprep.subr.bf16.mxu1 %v18703_v15 }
0x29e7   : > { %v3686_v39 = vpop.f32.mrb[46].mxu1 }
0x29e8   : > { %v3687_v52 = vadd.f32 %v18832_v12, %v3686_v39  ;;  %v15990_v53 = vpop.f32.mrb[47].mxu1 }
0x29ea   : > { %v3690_v54 = vmul.f32 %v3687_v52, %v18931_v43 }
0x29ec   : > { %v19299_v55 = vadd.f32 %v3690_v54, %v3466_v41 }
0x29ee   : > { %15996 = vmatmul.mubr.msk.f32.vlgmr.msra.gmra.mrb[48].mxu0 %vm78_vm0, %v19299_v55 }
0x29ef   : > { %17634 = vmatpush3.bf16.msra.mxu0 %v18881_v23  ;;  %16017 = vmatprep.mubr.msk.f32.mxu0 %vm18704_vm1, %v18705_v16 }
0x29f0   : > { %17635 = vmatprep.subr.bf16.mxu0 %v18703_v15 }
0x29f3   : > { %17637 = vmatpush3.bf16.msra.mxu0 %v18886_v24 }
0x29f4   : > { %17641 = vmatprep.subr.bf16.mxu0 %v18703_v15 }
0x2ac1   : > { %v3761_v56 = vpop.f32.mrb[48].mxu0 }
0x2ac2   : > { %v3762_v57 = vadd.f32 %v18782_v2, %v3761_v56  ;;  %v15997_v58 = vpop.f32.mrb[49].mxu0 }
0x2ac4   : > { %18431 = vtanh.f32 %v3762_v57 }
0x2ace   : > { %v18432_v60 = vpop.eup %18431 }
0x2acf   : > { %16007 = vmatmul.mubr.msk.f32.vlgmr.msra.gmra.mrb[48].mxu1 %vm166_vm2, %v18432_v60 }
0x2ad0   : > { %17640 = vmatpush3.bf16.msra.mxu1 %v18847_v14  ;;  %16024 = vmatprep.mubr.msk.f32.mxu1 %vm18704_vm1, %v18705_v16 }
0x2ad1   : > { %17647 = vmatprep.subr.bf16.mxu1 %v18703_v15 }
0x2ba2   : > { %v3835_v61 = vpop.f32.mrb[48].mxu1 }
0x2ba3   : > { %v3836_v62 = vadd.f32 %v18807_v7, %v3835_v61  ;;  %v16008_v19 = vpop.f32.mrb[49].mxu1 }
0x2ba5   : > { %18433 = vtanh.f32 %v3836_v62 }
0x2baf   : > { %v18434_v20 = vpop.eup %18433 }
0x2bb0   : > { %16018 = vmatmul.mubr.msk.f32.vlgmr.msra.gmra.mrb[50].mxu0 %vm166_vm2, %v18434_v20 }
0x2bb1   : > { %17643 = vmatpush3.bf16.msra.mxu0 %v18863_v17  ;;  %16035 = vmatprep.mubr.msk.f32.mxu0 %vm18704_vm1, %v18705_v16 }
0x2bb2   : > { %17644 = vmatprep.subr.bf16.mxu0 %v18703_v15 }
0x2bb5   : > { %17646 = vmatpush3.bf16.msra.mxu0 %v18868_v18 }
0x2bb6   : > { %17653 = vmatprep.subr.bf16.mxu0 %v18703_v15 }
0x2c83   : > { %v3909_v21 = vpop.f32.mrb[50].mxu0 }
0x2c84   : > { %v3910_v22 = vadd.f32 %v18832_v12, %v3909_v21  ;;  %v16019_v25 = vpop.f32.mrb[51].mxu0 }
0x2c86   : > { %v3915_v26 = vmul.f32 %v3910_v22, %v18904_v30  ;;  %v3913_v36 = vmul.f32 %v3910_v22, %v18931_v43 }
0x2c88   : > { %v3916_v27 = vadd.f32 %v3915_v26, %v19299_v55  ;;  %v3914_v41 = vadd.f32 %v3913_v36, %v19299_v55 }
0x2c8a   : > { %16025 = vmatmul.mubr.msk.f32.vlgmr.msra.gmra.mrb[50].mxu1 %vm78_vm0, %v3916_v27 }
0x2c8b   : > { %17649 = vmatpush3.bf16.msra.mxu1 %v18881_v23  ;;  %16046 = vmatprep.mubr.msk.f32.mxu1 %vm18704_vm1, %v18705_v16 }
0x2c8c   : > { %17650 = vmatprep.subr.bf16.mxu1 %v18703_v15 }
0x2c8f   : > { %17652 = vmatpush3.bf16.msra.mxu1 %v18886_v24 }
0x2c90   : > { %17656 = vmatprep.subr.bf16.mxu1 %v18703_v15 }
0x2d5d   : > { %v3986_v59 = vpop.f32.mrb[50].mxu1 }
0x2d5e   : > { %v3987_v28 = vadd.f32 %v18782_v2, %v3986_v59  ;;  %v16026_v29 = vpop.f32.mrb[51].mxu1 }
0x2d60   : > { %18435 = vtanh.f32 %v3987_v28 }
0x2d6a   : > { %v18436_v31 = vpop.eup %18435 }
0x2d6b   : > { %16036 = vmatmul.mubr.msk.f32.vlgmr.msra.gmra.mrb[52].mxu0 %vm166_vm2, %v18436_v31 }
0x2d6c   : > { %17655 = vmatpush3.bf16.msra.mxu0 %v18847_v14  ;;  %16053 = vmatprep.mubr.msk.f32.mxu0 %vm18704_vm1, %v18705_v16 }
0x2d6d   : > { %17662 = vmatprep.subr.bf16.mxu0 %v18703_v15 }
0x2e3e   : > { %v4060_v13 = vpop.f32.mrb[52].mxu0 }
0x2e3f   : > { %v4061_v32 = vadd.f32 %v18807_v7, %v4060_v13  ;;  %v16037_v33 = vpop.f32.mrb[53].mxu0 }
0x2e41   : > { %18437 = vtanh.f32 %v4061_v32 }
0x2e4b   : > { %v18438_v34 = vpop.eup %18437 }
0x2e4c   : > { %16047 = vmatmul.mubr.msk.f32.vlgmr.msra.gmra.mrb[52].mxu1 %vm166_vm2, %v18438_v34 }
0x2e4d   : > { %17658 = vmatpush3.bf16.msra.mxu1 %v18863_v17  ;;  %16064 = vmatprep.mubr.msk.f32.mxu1 %vm18704_vm1, %v18705_v16 }
0x2e4e   : > { %17659 = vmatprep.subr.bf16.mxu1 %v18703_v15 }
0x2e51   : > { %17661 = vmatpush3.bf16.msra.mxu1 %v18868_v18 }
0x2e52   : > { %17668 = vmatprep.subr.bf16.mxu1 %v18703_v15 }
0x2f1f   : > { %v4134_v37 = vpop.f32.mrb[52].mxu1 }
0x2f20   : > { %v4135_v38 = vadd.f32 %v18832_v12, %v4134_v37  ;;  %v16048_v40 = vpop.f32.mrb[53].mxu1 }
0x2f22   : > { %v4138_v42 = vmul.f32 %v4135_v38, %v18935_v46  ;;  %v4140_v44 = vmul.f32 %v4135_v38, %v18904_v30 }
0x2f24   : > { %v4139_v45 = vadd.f32 %v4138_v42, %v3914_v41  ;;  %v4141_v47 = vadd.f32 %v4140_v44, %v19299_v55 }
0x2f26   : > { %16054 = vmatmul.mubr.msk.f32.vlgmr.msra.gmra.mrb[54].mxu0 %vm78_vm0, %v4141_v47 }
0x2f27   : > { %17664 = vmatpush3.bf16.msra.mxu0 %v18881_v23  ;;  %16075 = vmatprep.mubr.msk.f32.mxu0 %vm18704_vm1, %v18705_v16 }
0x2f28   : > { %17665 = vmatprep.subr.bf16.mxu0 %v18703_v15 }
0x2f2b   : > { %17667 = vmatpush3.bf16.msra.mxu0 %v18886_v24 }
0x2f2c   : > { %17671 = vmatprep.subr.bf16.mxu0 %v18703_v15 }
0x2ff9   : > { %v4211_v48 = vpop.f32.mrb[54].mxu0 }
0x2ffa   : > { %v4212_v35 = vadd.f32 %v18782_v2, %v4211_v48  ;;  %v16055_v49 = vpop.f32.mrb[55].mxu0 }
0x2ffc   : > { %18439 = vtanh.f32 %v4212_v35 }
0x3006   : > { %v18440_v50 = vpop.eup %18439 }
0x3007   : > { %16065 = vmatmul.mubr.msk.f32.vlgmr.msra.gmra.mrb[54].mxu1 %vm166_vm2, %v18440_v50 }
0x3008   : > { %17670 = vmatpush3.bf16.msra.mxu1 %v18847_v14  ;;  %16082 = vmatprep.mubr.msk.f32.mxu1 %vm18704_vm1, %v18705_v16 }
0x3009   : > { %17677 = vmatprep.subr.bf16.mxu1 %v18703_v15 }
0x30da   : > { %v4285_v51 = vpop.f32.mrb[54].mxu1 }
0x30db   : > { %v4286_v39 = vadd.f32 %v18807_v7, %v4285_v51  ;;  %v16066_v52 = vpop.f32.mrb[55].mxu1 }
0x30dd   : > { %18441 = vtanh.f32 %v4286_v39 }
0x30e7   : > { %v18442_v53 = vpop.eup %18441 }
0x30e8   : > { %16076 = vmatmul.mubr.msk.f32.vlgmr.msra.gmra.mrb[56].mxu0 %vm166_vm2, %v18442_v53 }
0x30e9   : > { %17673 = vmatpush3.bf16.msra.mxu0 %v18863_v17  ;;  %16093 = vmatprep.mubr.msk.f32.mxu0 %vm18704_vm1, %v18705_v16 }
0x30ea   : > { %17674 = vmatprep.subr.bf16.mxu0 %v18703_v15 }
0x30ed   : > { %17676 = vmatpush3.bf16.msra.mxu0 %v18868_v18 }
0x30ee   : > { %17683 = vmatprep.subr.bf16.mxu0 %v18703_v15 }
0x31bb   : > { %v4359_v54 = vpop.f32.mrb[56].mxu0 }
0x31bc   : > { %v4360_v56 = vadd.f32 %v18832_v12, %v4359_v54  ;;  %v16077_v57 = vpop.f32.mrb[57].mxu0 }
0x31be   : > { %v4363_v58 = vmul.f32 %v4360_v56, %v18935_v46  ;;  %v4365_v60 = vmul.f32 %v4360_v56, %v18964_v63 }
0x31c0   : > { %v4364_v61 = vadd.f32 %v4363_v58, %v4139_v45  ;;  %v4366_v62 = vadd.f32 %v4365_v60, %v19299_v55 }
0x31c2   : > { %16083 = vmatmul.mubr.msk.f32.vlgmr.msra.gmra.mrb[56].mxu1 %vm78_vm0, %v4366_v62 }
0x31c3   : > { %17679 = vmatpush3.bf16.msra.mxu1 %v18881_v23  ;;  %16104 = vmatprep.mubr.msk.f32.mxu1 %vm18704_vm1, %v18705_v16 }
0x31c4   : > { %17680 = vmatprep.subr.bf16.mxu1 %v18703_v15 }
0x31c7   : > { %17682 = vmatpush3.bf16.msra.mxu1 %v18886_v24 }
0x31c8   : > { %17686 = vmatprep.subr.bf16.mxu1 %v18703_v15 }
0x3295   : > { %v4436_v19 = vpop.f32.mrb[56].mxu1 }
0x3296   : > { %v4437_v20 = vadd.f32 %v18782_v2, %v4436_v19  ;;  %v16084_v21 = vpop.f32.mrb[57].mxu1 }
0x3298   : > { %18443 = vtanh.f32 %v4437_v20 }
0x32a2   : > { %v18444_v22 = vpop.eup %18443 }
0x32a3   : > { %16094 = vmatmul.mubr.msk.f32.vlgmr.msra.gmra.mrb[58].mxu0 %vm166_vm2, %v18444_v22 }
0x32a4   : > { %17685 = vmatpush3.bf16.msra.mxu0 %v18847_v14  ;;  %16111 = vmatprep.mubr.msk.f32.mxu0 %vm18704_vm1, %v18705_v16 }
0x32a5   : > { %17692 = vmatprep.subr.bf16.mxu0 %v18703_v15 }
0x3376   : > { %v4510_v55 = vpop.f32.mrb[58].mxu0 }
0x3377   : > { %v4511_v25 = vadd.f32 %v18807_v7, %v4510_v55  ;;  %v16095_v26 = vpop.f32.mrb[59].mxu0 }
0x3379   : > { %18445 = vtanh.f32 %v4511_v25 }
0x3383   : > { %v18446_v27 = vpop.eup %18445 }
0x3384   : > { %16105 = vmatmul.mubr.msk.f32.vlgmr.msra.gmra.mrb[58].mxu1 %vm166_vm2, %v18446_v27 }
0x3385   : > { %17688 = vmatpush3.bf16.msra.mxu1 %v18863_v17  ;;  %16122 = vmatprep.mubr.msk.f32.mxu1 %vm18704_vm1, %v18705_v16 }
0x3386   : > { %17689 = vmatprep.subr.bf16.mxu1 %v18703_v15 }
0x3389   : > { %17691 = vmatpush3.bf16.msra.mxu1 %v18868_v18 }
0x338a   : > { %17698 = vmatprep.subr.bf16.mxu1 %v18703_v15 }
0x3457   : > { %v4584_v59 = vpop.f32.mrb[58].mxu1 }
0x3458   : > { %v4585_v28 = vadd.f32 %v18832_v12, %v4584_v59  ;;  %v16106_v29 = vpop.f32.mrb[59].mxu1 }
0x345a   : > { %v4588_v31 = vmul.f32 %v4585_v28, %v18931_v43 }
0x345c   : > { %v19401_v13 = vadd.f32 %v4588_v31, %v4364_v61 }
0x345e   : > { %16112 = vmatmul.mubr.msk.f32.vlgmr.msra.gmra.mrb[60].mxu0 %vm78_vm0, %v19401_v13 }
0x345f   : > { %17694 = vmatpush3.bf16.msra.mxu0 %v18881_v23  ;;  %16133 = vmatprep.mubr.msk.f32.mxu0 %vm18704_vm1, %v18705_v16 }
0x3460   : > { %17695 = vmatprep.subr.bf16.mxu0 %v18703_v15 }
0x3463   : > { %17697 = vmatpush3.bf16.msra.mxu0 %v18886_v24 }
0x3464   : > { %17701 = vmatprep.subr.bf16.mxu0 %v18703_v15 }
0x3531   : > { %v4659_v32 = vpop.f32.mrb[60].mxu0 }
0x3532   : > { %v4660_v33 = vadd.f32 %v18782_v2, %v4659_v32  ;;  %v16113_v34 = vpop.f32.mrb[61].mxu0 }
0x3534   : > { %18447 = vtanh.f32 %v4660_v33 }
0x353e   : > { %v18448_v36 = vpop.eup %18447 }
0x353f   : > { %16123 = vmatmul.mubr.msk.f32.vlgmr.msra.gmra.mrb[60].mxu1 %vm166_vm2, %v18448_v36 }
0x3540   : > { %17700 = vmatpush3.bf16.msra.mxu1 %v18847_v14  ;;  %16140 = vmatprep.mubr.msk.f32.mxu1 %vm18704_vm1, %v18705_v16 }
0x3541   : > { %17707 = vmatprep.subr.bf16.mxu1 %v18703_v15 }
0x3612   : > { %v4733_v37 = vpop.f32.mrb[60].mxu1 }
0x3613   : > { %v4734_v38 = vadd.f32 %v18807_v7, %v4733_v37  ;;  %v16124_v40 = vpop.f32.mrb[61].mxu1 }
0x3615   : > { %18449 = vtanh.f32 %v4734_v38 }
0x361f   : > { %v18450_v41 = vpop.eup %18449 }
0x3620   : > { %16134 = vmatmul.mubr.msk.f32.vlgmr.msra.gmra.mrb[62].mxu0 %vm166_vm2, %v18450_v41 }
0x3621   : > { %17703 = vmatpush3.bf16.msra.mxu0 %v18863_v17  ;;  %16151 = vmatprep.mubr.msk.f32.mxu0 %vm18704_vm1, %v18705_v16 }
0x3622   : > { %17704 = vmatprep.subr.bf16.mxu0 %v18703_v15 }
0x3625   : > { %17706 = vmatpush3.bf16.msra.mxu0 %v18868_v18 }
0x3626   : > { %17713 = vmatprep.subr.bf16.mxu0 %v18703_v15 }
0x36f3   : > { %v4807_v42 = vpop.f32.mrb[62].mxu0 }
0x36f4   : > { %v4808_v44 = vadd.f32 %v18832_v12, %v4807_v42  ;;  %v16135_v45 = vpop.f32.mrb[63].mxu0 }
0x36f6   : > { %v4813_v47 = vmul.f32 %v4808_v44, %v18904_v30  ;;  %v4811_v56 = vmul.f32 %v4808_v44, %v18931_v43 }
0x36f8   : > { %v4814_v48 = vadd.f32 %v4813_v47, %v19401_v13  ;;  %v4812_v61 = vadd.f32 %v4811_v56, %v19401_v13 }
0x36fa   : > { %16141 = vmatmul.mubr.msk.f32.vlgmr.msra.gmra.mrb[62].mxu1 %vm78_vm0, %v4814_v48 }
0x36fb   : > { %17709 = vmatpush3.bf16.msra.mxu1 %v18881_v23  ;;  %16162 = vmatprep.mubr.msk.f32.mxu1 %vm18704_vm1, %v18705_v16 }
0x36fc   : > { %17710 = vmatprep.subr.bf16.mxu1 %v18703_v15 }
0x36ff   : > { %17712 = vmatpush3.bf16.msra.mxu1 %v18886_v24 }
0x3700   : > { %17716 = vmatprep.subr.bf16.mxu1 %v18703_v15 }
0x37cd   : > { %v4884_v35 = vpop.f32.mrb[62].mxu1 }
0x37ce   : > { %v4885_v49 = vadd.f32 %v18782_v2, %v4884_v35  ;;  %v16142_v50 = vpop.f32.mrb[63].mxu1 }
0x37d0   : > { %18451 = vtanh.f32 %v4885_v49 }
0x37da   : > { %v18452_v51 = vpop.eup %18451 }
0x37db   : > { %16152 = vmatmul.mubr.msk.f32.vlgmr.msra.gmra.mrb[64].mxu0 %vm166_vm2, %v18452_v51 }
0x37dc   : > { %17715 = vmatpush3.bf16.msra.mxu0 %v18847_v14  ;;  %16169 = vmatprep.mubr.msk.f32.mxu0 %vm18704_vm1, %v18705_v16 }
0x37dd   : > { %17722 = vmatprep.subr.bf16.mxu0 %v18703_v15 }
0x38ae   : > { %v4958_v39 = vpop.f32.mrb[64].mxu0 }
0x38af   : > { %v4959_v52 = vadd.f32 %v18807_v7, %v4958_v39  ;;  %v16153_v53 = vpop.f32.mrb[65].mxu0 }
0x38b1   : > { %18453 = vtanh.f32 %v4959_v52 }
0x38bb   : > { %v18454_v54 = vpop.eup %18453 }
0x38bc   : > { %16163 = vmatmul.mubr.msk.f32.vlgmr.msra.gmra.mrb[64].mxu1 %vm166_vm2, %v18454_v54 }
0x38bd   : > { %17718 = vmatpush3.bf16.msra.mxu1 %v18863_v17  ;;  %16180 = vmatprep.mubr.msk.f32.mxu1 %vm18704_vm1, %v18705_v16 }
0x38be   : > { %17719 = vmatprep.subr.bf16.mxu1 %v18703_v15 }
0x38c1   : > { %17721 = vmatpush3.bf16.msra.mxu1 %v18868_v18 }
0x38c2   : > { %17728 = vmatprep.subr.bf16.mxu1 %v18703_v15 }
0x398f   : > { %v5032_v57 = vpop.f32.mrb[64].mxu1 }
0x3990   : > { %v5033_v58 = vadd.f32 %v18832_v12, %v5032_v57  ;;  %v16164_v60 = vpop.f32.mrb[65].mxu1 }
0x3992   : > { %v5036_v62 = vmul.f32 %v5033_v58, %v18935_v46  ;;  %v5038_v19 = vmul.f32 %v5033_v58, %v18904_v30 }
0x3994   : > { %v5037_v20 = vadd.f32 %v5036_v62, %v4812_v61  ;;  %v5039_v21 = vadd.f32 %v5038_v19, %v19401_v13 }
0x3996   : > { %16170 = vmatmul.mubr.msk.f32.vlgmr.msra.gmra.mrb[66].mxu0 %vm78_vm0, %v5039_v21 }
0x3997   : > { %17724 = vmatpush3.bf16.msra.mxu0 %v18881_v23  ;;  %16191 = vmatprep.mubr.msk.f32.mxu0 %vm18704_vm1, %v18705_v16 }
0x3998   : > { %17725 = vmatprep.subr.bf16.mxu0 %v18703_v15 }
0x399b   : > { %17727 = vmatpush3.bf16.msra.mxu0 %v18886_v24 }
0x399c   : > { %17731 = vmatprep.subr.bf16.mxu0 %v18703_v15 }
0x3a69   : > { %v5109_v22 = vpop.f32.mrb[66].mxu0 }
0x3a6a   : > { %v5110_v55 = vadd.f32 %v18782_v2, %v5109_v22  ;;  %v16171_v25 = vpop.f32.mrb[67].mxu0 }
0x3a6c   : > { %18455 = vtanh.f32 %v5110_v55 }
0x3a76   : > { %v18456_v26 = vpop.eup %18455 }
0x3a77   : > { %16181 = vmatmul.mubr.msk.f32.vlgmr.msra.gmra.mrb[66].mxu1 %vm166_vm2, %v18456_v26 }
0x3a78   : > { %17730 = vmatpush3.bf16.msra.mxu1 %v18847_v14  ;;  %16198 = vmatprep.mubr.msk.f32.mxu1 %vm18704_vm1, %v18705_v16 }
0x3a79   : > { %17737 = vmatprep.subr.bf16.mxu1 %v18703_v15 }
0x3b4a   : > { %v5183_v27 = vpop.f32.mrb[66].mxu1 }
0x3b4b   : > { %v5184_v59 = vadd.f32 %v18807_v7, %v5183_v27  ;;  %v16182_v28 = vpop.f32.mrb[67].mxu1 }
0x3b4d   : > { %18457 = vtanh.f32 %v5184_v59 }
0x3b57   : > { %v18458_v29 = vpop.eup %18457 }
0x3b58   : > { %16192 = vmatmul.mubr.msk.f32.vlgmr.msra.gmra.mrb[68].mxu0 %vm166_vm2, %v18458_v29 }
0x3b59   : > { %17733 = vmatpush3.bf16.msra.mxu0 %v18863_v17  ;;  %16209 = vmatprep.mubr.msk.f32.mxu0 %vm18704_vm1, %v18705_v16 }
0x3b5a   : > { %17734 = vmatprep.subr.bf16.mxu0 %v18703_v15 }
0x3b5d   : > { %17736 = vmatpush3.bf16.msra.mxu0 %v18868_v18 }
0x3b5e   : > { %17743 = vmatprep.subr.bf16.mxu0 %v18703_v15 }
0x3c2b   : > { %v5257_v31 = vpop.f32.mrb[68].mxu0 }
0x3c2c   : > { %v5258_v32 = vadd.f32 %v18832_v12, %v5257_v31  ;;  %v16193_v33 = vpop.f32.mrb[69].mxu0 }
0x3c2e   : > { %v5261_v34 = vmul.f32 %v5258_v32, %v18935_v46  ;;  %v5263_v36 = vmul.f32 %v5258_v32, %v18964_v63 }
0x3c30   : > { %v5262_v37 = vadd.f32 %v5261_v34, %v5037_v20  ;;  %v5264_v38 = vadd.f32 %v5263_v36, %v19401_v13 }
0x3c32   : > { %16199 = vmatmul.mubr.msk.f32.vlgmr.msra.gmra.mrb[68].mxu1 %vm78_vm0, %v5264_v38 }
0x3c33   : > { %17739 = vmatpush3.bf16.msra.mxu1 %v18881_v23  ;;  %16220 = vmatprep.mubr.msk.f32.mxu1 %vm18704_vm1, %v18705_v16 }
0x3c34   : > { %17740 = vmatprep.subr.bf16.mxu1 %v18703_v15 }
0x3c37   : > { %17742 = vmatpush3.bf16.msra.mxu1 %v18886_v24 }
0x3c38   : > { %17746 = vmatprep.subr.bf16.mxu1 %v18703_v15 }
0x3d05   : > { %v5334_v40 = vpop.f32.mrb[68].mxu1 }
0x3d06   : > { %v5335_v41 = vadd.f32 %v18782_v2, %v5334_v40  ;;  %v16200_v42 = vpop.f32.mrb[69].mxu1 }
0x3d08   : > { %18459 = vtanh.f32 %v5335_v41 }
0x3d12   : > { %v18460_v44 = vpop.eup %18459 }
0x3d13   : > { %16210 = vmatmul.mubr.msk.f32.vlgmr.msra.gmra.mrb[70].mxu0 %vm166_vm2, %v18460_v44 }
0x3d14   : > { %17745 = vmatpush3.bf16.msra.mxu0 %v18847_v14  ;;  %16227 = vmatprep.mubr.msk.f32.mxu0 %vm18704_vm1, %v18705_v16 }
0x3d15   : > { %17752 = vmatprep.subr.bf16.mxu0 %v18703_v15 }
0x3de6   : > { %v5408_v13 = vpop.f32.mrb[70].mxu0 }
0x3de7   : > { %v5409_v45 = vadd.f32 %v18807_v7, %v5408_v13  ;;  %v16211_v47 = vpop.f32.mrb[71].mxu0 }
0x3de9   : > { %18461 = vtanh.f32 %v5409_v45 }
0x3df3   : > { %v18462_v48 = vpop.eup %18461 }
0x3df4   : > { %16221 = vmatmul.mubr.msk.f32.vlgmr.msra.gmra.mrb[70].mxu1 %vm166_vm2, %v18462_v48 }
0x3df5   : > { %17748 = vmatpush3.bf16.msra.mxu1 %v18863_v17  ;;  %16238 = vmatprep.mubr.msk.f32.mxu1 %vm18704_vm1, %v18705_v16 }
0x3df6   : > { %17749 = vmatprep.subr.bf16.mxu1 %v18703_v15 }
0x3df9   : > { %17751 = vmatpush3.bf16.msra.mxu1 %v18868_v18 }
0x3dfa   : > { %17758 = vmatprep.subr.bf16.mxu1 %v18703_v15 }
0x3ec7   : > { %v5482_v35 = vpop.f32.mrb[70].mxu1 }
0x3ec8   : > { %v5483_v49 = vadd.f32 %v18832_v12, %v5482_v35  ;;  %v16222_v50 = vpop.f32.mrb[71].mxu1 }
0x3eca   : > { %v5486_v51 = vmul.f32 %v5483_v49, %v18931_v43 }
0x3ecc   : > { %v19503_v39 = vadd.f32 %v5486_v51, %v5262_v37 }
0x3ece   : > { %16228 = vmatmul.mubr.msk.f32.vlgmr.msra.gmra.mrb[72].mxu0 %vm78_vm0, %v19503_v39 }
0x3ecf   : > { %17754 = vmatpush3.bf16.msra.mxu0 %v18881_v23  ;;  %16249 = vmatprep.mubr.msk.f32.mxu0 %vm18704_vm1, %v18705_v16 }
0x3ed0   : > { %17755 = vmatprep.subr.bf16.mxu0 %v18703_v15 }
0x3ed3   : > { %17757 = vmatpush3.bf16.msra.mxu0 %v18886_v24 }
0x3ed4   : > { %17761 = vmatprep.subr.bf16.mxu0 %v18703_v15 }
0x3fa1   : > { %v5557_v52 = vpop.f32.mrb[72].mxu0 }
0x3fa2   : > { %v5558_v53 = vadd.f32 %v18782_v2, %v5557_v52  ;;  %v16229_v54 = vpop.f32.mrb[73].mxu0 }
0x3fa4   : > { %18463 = vtanh.f32 %v5558_v53 }
0x3fae   : > { %v18464_v56 = vpop.eup %18463 }
0x3faf   : > { %16239 = vmatmul.mubr.msk.f32.vlgmr.msra.gmra.mrb[72].mxu1 %vm166_vm2, %v18464_v56 }
0x3fb0   : > { %17760 = vmatpush3.bf16.msra.mxu1 %v18847_v14  ;;  %16256 = vmatprep.mubr.msk.f32.mxu1 %vm18704_vm1, %v18705_v16 }
0x3fb1   : > { %17767 = vmatprep.subr.bf16.mxu1 %v18703_v15 }
0x4082   : > { %v5631_v57 = vpop.f32.mrb[72].mxu1 }
0x4083   : > { %v5632_v58 = vadd.f32 %v18807_v7, %v5631_v57  ;;  %v16240_v60 = vpop.f32.mrb[73].mxu1 }
0x4085   : > { %18465 = vtanh.f32 %v5632_v58 }
0x408f   : > { %v18466_v61 = vpop.eup %18465 }
0x4090   : > { %16250 = vmatmul.mubr.msk.f32.vlgmr.msra.gmra.mrb[74].mxu0 %vm166_vm2, %v18466_v61 }
0x4091   : > { %17763 = vmatpush3.bf16.msra.mxu0 %v18863_v17  ;;  %16267 = vmatprep.mubr.msk.f32.mxu0 %vm18704_vm1, %v18705_v16 }
0x4092   : > { %17764 = vmatprep.subr.bf16.mxu0 %v18703_v15 }
0x4095   : > { %17766 = vmatpush3.bf16.msra.mxu0 %v18868_v18 }
0x4096   : > { %17773 = vmatprep.subr.bf16.mxu0 %v18703_v15 }
0x4163   : > { %v5705_v62 = vpop.f32.mrb[74].mxu0 }
0x4164   : > { %v5706_v19 = vadd.f32 %v18832_v12, %v5705_v62  ;;  %v16251_v20 = vpop.f32.mrb[75].mxu0 }
0x4166   : > { %v5711_v21 = vmul.f32 %v5706_v19, %v18904_v30  ;;  %v5709_v32 = vmul.f32 %v5706_v19, %v18931_v43 }
0x4168   : > { %v5712_v22 = vadd.f32 %v5711_v21, %v19503_v39  ;;  %v5710_v37 = vadd.f32 %v5709_v32, %v19503_v39 }
0x416a   : > { %16257 = vmatmul.mubr.msk.f32.vlgmr.msra.gmra.mrb[74].mxu1 %vm78_vm0, %v5712_v22 }
0x416b   : > { %17769 = vmatpush3.bf16.msra.mxu1 %v18881_v23  ;;  %16278 = vmatprep.mubr.msk.f32.mxu1 %vm18704_vm1, %v18705_v16 }
0x416c   : > { %17770 = vmatprep.subr.bf16.mxu1 %v18703_v15 }
0x416f   : > { %17772 = vmatpush3.bf16.msra.mxu1 %v18886_v24 }
0x4170   : > { %17776 = vmatprep.subr.bf16.mxu1 %v18703_v15 }
0x423d   : > { %v5782_v55 = vpop.f32.mrb[74].mxu1 }
0x423e   : > { %v5783_v25 = vadd.f32 %v18782_v2, %v5782_v55  ;;  %v16258_v26 = vpop.f32.mrb[75].mxu1 }
0x4240   : > { %18467 = vtanh.f32 %v5783_v25 }
0x424a   : > { %v18468_v27 = vpop.eup %18467 }
0x424b   : > { %16268 = vmatmul.mubr.msk.f32.vlgmr.msra.gmra.mrb[76].mxu0 %vm166_vm2, %v18468_v27 }
0x424c   : > { %17775 = vmatpush3.bf16.msra.mxu0 %v18847_v14  ;;  %16285 = vmatprep.mubr.msk.f32.mxu0 %vm18704_vm1, %v18705_v16 }
0x424d   : > { %17782 = vmatprep.subr.bf16.mxu0 %v18703_v15 }
0x431e   : > { %v5856_v59 = vpop.f32.mrb[76].mxu0 }
0x431f   : > { %v5857_v28 = vadd.f32 %v18807_v7, %v5856_v59  ;;  %v16269_v29 = vpop.f32.mrb[77].mxu0 }
0x4321   : > { %18469 = vtanh.f32 %v5857_v28 }
0x432b   : > { %v18470_v31 = vpop.eup %18469 }
0x432c   : > { %16279 = vmatmul.mubr.msk.f32.vlgmr.msra.gmra.mrb[76].mxu1 %vm166_vm2, %v18470_v31 }
0x432d   : > { %17778 = vmatpush3.bf16.msra.mxu1 %v18863_v17  ;;  %16296 = vmatprep.mubr.msk.f32.mxu1 %vm18704_vm1, %v18705_v16 }
0x432e   : > { %17779 = vmatprep.subr.bf16.mxu1 %v18703_v15 }
0x4331   : > { %17781 = vmatpush3.bf16.msra.mxu1 %v18868_v18 }
0x4332   : > { %17788 = vmatprep.subr.bf16.mxu1 %v18703_v15 }
0x43ff   : > { %v5930_v33 = vpop.f32.mrb[76].mxu1 }
0x4400   : > { %v5931_v34 = vadd.f32 %v18832_v12, %v5930_v33  ;;  %v16280_v36 = vpop.f32.mrb[77].mxu1 }
0x4402   : > { %v5934_v38 = vmul.f32 %v5931_v34, %v18935_v46  ;;  %v5936_v40 = vmul.f32 %v5931_v34, %v18904_v30 }
0x4404   : > { %v5935_v41 = vadd.f32 %v5934_v38, %v5710_v37  ;;  %v5937_v42 = vadd.f32 %v5936_v40, %v19503_v39 }
0x4406   : > { %16286 = vmatmul.mubr.msk.f32.vlgmr.msra.gmra.mrb[78].mxu0 %vm78_vm0, %v5937_v42 }
0x4407   : > { %17784 = vmatpush3.bf16.msra.mxu0 %v18881_v23  ;;  %16307 = vmatprep.mubr.msk.f32.mxu0 %vm18704_vm1, %v18705_v16 }
0x4408   : > { %17785 = vmatprep.subr.bf16.mxu0 %v18703_v15 }
0x440b   : > { %17787 = vmatpush3.bf16.msra.mxu0 %v18886_v24 }
0x440c   : > { %17791 = vmatprep.subr.bf16.mxu0 %v18703_v15 }
0x44d9   : > { %v6007_v44 = vpop.f32.mrb[78].mxu0 }
0x44da   : > { %v6008_v13 = vadd.f32 %v18782_v2, %v6007_v44  ;;  %v16287_v45 = vpop.f32.mrb[79].mxu0 }
0x44dc   : > { %18471 = vtanh.f32 %v6008_v13 }
0x44e6   : > { %v18472_v47 = vpop.eup %18471 }
0x44e7   : > { %16297 = vmatmul.mubr.msk.f32.vlgmr.msra.gmra.mrb[78].mxu1 %vm166_vm2, %v18472_v47 }
0x44e8   : > { %17790 = vmatpush3.bf16.msra.mxu1 %v18847_v14  ;;  %16314 = vmatprep.mubr.msk.f32.mxu1 %vm18704_vm1, %v18705_v16 }
0x44e9   : > { %17797 = vmatprep.subr.bf16.mxu1 %v18703_v15 }
0x45ba   : > { %v6081_v48 = vpop.f32.mrb[78].mxu1 }
0x45bb   : > { %v6082_v35 = vadd.f32 %v18807_v7, %v6081_v48  ;;  %v16298_v49 = vpop.f32.mrb[79].mxu1 }
0x45bd   : > { %18473 = vtanh.f32 %v6082_v35 }
0x45c7   : > { %v18474_v50 = vpop.eup %18473 }
0x45c8   : > { %16308 = vmatmul.mubr.msk.f32.vlgmr.msra.gmra.mrb[80].mxu0 %vm166_vm2, %v18474_v50 }
0x45c9   : > { %17793 = vmatpush3.bf16.msra.mxu0 %v18863_v17  ;;  %16325 = vmatprep.mubr.msk.f32.mxu0 %vm18704_vm1, %v18705_v16 }
0x45ca   : > { %17794 = vmatprep.subr.bf16.mxu0 %v18703_v15 }
0x45cd   : > { %17796 = vmatpush3.bf16.msra.mxu0 %v18868_v18 }
0x45ce   : > { %17803 = vmatprep.subr.bf16.mxu0 %v18703_v15 }
0x469b   : > { %v6155_v51 = vpop.f32.mrb[80].mxu0 }
0x469c   : > { %v6156_v52 = vadd.f32 %v18832_v12, %v6155_v51  ;;  %v16309_v53 = vpop.f32.mrb[81].mxu0 }
0x469e   : > { %v6159_v54 = vmul.f32 %v6156_v52, %v18935_v46  ;;  %v6161_v56 = vmul.f32 %v6156_v52, %v18964_v63 }
0x46a0   : > { %v6160_v57 = vadd.f32 %v6159_v54, %v5935_v41  ;;  %v6162_v58 = vadd.f32 %v6161_v56, %v19503_v39 }
0x46a2   : > { %16315 = vmatmul.mubr.msk.f32.vlgmr.msra.gmra.mrb[80].mxu1 %vm78_vm0, %v6162_v58 }
0x46a3   : > { %17799 = vmatpush3.bf16.msra.mxu1 %v18881_v23  ;;  %16336 = vmatprep.mubr.msk.f32.mxu1 %vm18704_vm1, %v18705_v16 }
0x46a4   : > { %17800 = vmatprep.subr.bf16.mxu1 %v18703_v15 }
0x46a7   : > { %17802 = vmatpush3.bf16.msra.mxu1 %v18886_v24 }
0x46a8   : > { %17806 = vmatprep.subr.bf16.mxu1 %v18703_v15 }
0x4775   : > { %v6232_v60 = vpop.f32.mrb[80].mxu1 }
0x4776   : > { %v6233_v61 = vadd.f32 %v18782_v2, %v6232_v60  ;;  %v16316_v62 = vpop.f32.mrb[81].mxu1 }
0x4778   : > { %18475 = vtanh.f32 %v6233_v61 }
0x4782   : > { %v18476_v19 = vpop.eup %18475 }
0x4783   : > { %16326 = vmatmul.mubr.msk.f32.vlgmr.msra.gmra.mrb[82].mxu0 %vm166_vm2, %v18476_v19 }
0x4784   : > { %17805 = vmatpush3.bf16.msra.mxu0 %v18847_v14  ;;  %16343 = vmatprep.mubr.msk.f32.mxu0 %vm18704_vm1, %v18705_v16 }
0x4785   : > { %17812 = vmatprep.subr.bf16.mxu0 %v18703_v15 }
0x4856   : > { %v6306_v39 = vpop.f32.mrb[82].mxu0 }
0x4857   : > { %v6307_v20 = vadd.f32 %v18807_v7, %v6306_v39  ;;  %v16327_v21 = vpop.f32.mrb[83].mxu0 }
0x4859   : > { %18477 = vtanh.f32 %v6307_v20 }
0x4863   : > { %v18478_v22 = vpop.eup %18477 }
0x4864   : > { %16337 = vmatmul.mubr.msk.f32.vlgmr.msra.gmra.mrb[82].mxu1 %vm166_vm2, %v18478_v22 }
0x4865   : > { %17808 = vmatpush3.bf16.msra.mxu1 %v18863_v17  ;;  %16354 = vmatprep.mubr.msk.f32.mxu1 %vm18704_vm1, %v18705_v16 }
0x4866   : > { %17809 = vmatprep.subr.bf16.mxu1 %v18703_v15 }
0x4869   : > { %17811 = vmatpush3.bf16.msra.mxu1 %v18868_v18 }
0x486a   : > { %17818 = vmatprep.subr.bf16.mxu1 %v18703_v15 }
0x4937   : > { %v6380_v55 = vpop.f32.mrb[82].mxu1 }
0x4938   : > { %v6381_v25 = vadd.f32 %v18832_v12, %v6380_v55  ;;  %v16338_v26 = vpop.f32.mrb[83].mxu1 }
0x493a   : > { %v6384_v27 = vmul.f32 %v6381_v25, %v18931_v43 }
0x493c   : > { %v19605_v59 = vadd.f32 %v6384_v27, %v6160_v57 }
0x493e   : > { %16344 = vmatmul.mubr.msk.f32.vlgmr.msra.gmra.mrb[84].mxu0 %vm78_vm0, %v19605_v59 }
0x493f   : > { %17814 = vmatpush3.bf16.msra.mxu0 %v18881_v23  ;;  %16365 = vmatprep.mubr.msk.f32.mxu0 %vm18704_vm1, %v18705_v16 }
0x4940   : > { %17815 = vmatprep.subr.bf16.mxu0 %v18703_v15 }
0x4943   : > { %17817 = vmatpush3.bf16.msra.mxu0 %v18886_v24 }
0x4944   : > { %17821 = vmatprep.subr.bf16.mxu0 %v18703_v15 }
0x4a11   : > { %v6455_v28 = vpop.f32.mrb[84].mxu0 }
0x4a12   : > { %v6456_v29 = vadd.f32 %v18782_v2, %v6455_v28  ;;  %v16345_v31 = vpop.f32.mrb[85].mxu0 }
0x4a14   : > { %18479 = vtanh.f32 %v6456_v29 }
0x4a1e   : > { %v18480_v32 = vpop.eup %18479 }
0x4a1f   : > { %16355 = vmatmul.mubr.msk.f32.vlgmr.msra.gmra.mrb[84].mxu1 %vm166_vm2, %v18480_v32 }
0x4a20   : > { %17820 = vmatpush3.bf16.msra.mxu1 %v18847_v14  ;;  %16372 = vmatprep.mubr.msk.f32.mxu1 %vm18704_vm1, %v18705_v16 }
0x4a21   : > { %17827 = vmatprep.subr.bf16.mxu1 %v18703_v15 }
0x4af2   : > { %v6529_v33 = vpop.f32.mrb[84].mxu1 }
0x4af3   : > { %v6530_v34 = vadd.f32 %v18807_v7, %v6529_v33  ;;  %v16356_v36 = vpop.f32.mrb[85].mxu1 }
0x4af5   : > { %18481 = vtanh.f32 %v6530_v34 }
0x4aff   : > { %v18482_v37 = vpop.eup %18481 }
0x4b00   : > { %16366 = vmatmul.mubr.msk.f32.vlgmr.msra.gmra.mrb[86].mxu0 %vm166_vm2, %v18482_v37 }
0x4b01   : > { %17823 = vmatpush3.bf16.msra.mxu0 %v18863_v17  ;;  %16383 = vmatprep.mubr.msk.f32.mxu0 %vm18704_vm1, %v18705_v16 }
0x4b02   : > { %17824 = vmatprep.subr.bf16.mxu0 %v18703_v15 }
0x4b05   : > { %17826 = vmatpush3.bf16.msra.mxu0 %v18868_v18 }
0x4b06   : > { %17833 = vmatprep.subr.bf16.mxu0 %v18703_v15 }
0x4bd3   : > { %v6603_v38 = vpop.f32.mrb[86].mxu0 }
0x4bd4   : > { %v6604_v40 = vadd.f32 %v18832_v12, %v6603_v38  ;;  %v16367_v41 = vpop.f32.mrb[87].mxu0 }
0x4bd6   : > { %v6609_v42 = vmul.f32 %v6604_v40, %v18904_v30  ;;  %v6607_v52 = vmul.f32 %v6604_v40, %v18931_v43 }
0x4bd8   : > { %v6610_v44 = vadd.f32 %v6609_v42, %v19605_v59  ;;  %v6608_v57 = vadd.f32 %v6607_v52, %v19605_v59 }
0x4bda   : > { %16373 = vmatmul.mubr.msk.f32.vlgmr.msra.gmra.mrb[86].mxu1 %vm78_vm0, %v6610_v44 }
0x4bdb   : > { %17829 = vmatpush3.bf16.msra.mxu1 %v18881_v23  ;;  %16394 = vmatprep.mubr.msk.f32.mxu1 %vm18704_vm1, %v18705_v16 }
0x4bdc   : > { %17830 = vmatprep.subr.bf16.mxu1 %v18703_v15 }
0x4bdf   : > { %17832 = vmatpush3.bf16.msra.mxu1 %v18886_v24 }
0x4be0   : > { %17836 = vmatprep.subr.bf16.mxu1 %v18703_v15 }
0x4cad   : > { %v6680_v13 = vpop.f32.mrb[86].mxu1 }
0x4cae   : > { %v6681_v45 = vadd.f32 %v18782_v2, %v6680_v13  ;;  %v16374_v47 = vpop.f32.mrb[87].mxu1 }
0x4cb0   : > { %18483 = vtanh.f32 %v6681_v45 }
0x4cba   : > { %v18484_v48 = vpop.eup %18483 }
0x4cbb   : > { %16384 = vmatmul.mubr.msk.f32.vlgmr.msra.gmra.mrb[88].mxu0 %vm166_vm2, %v18484_v48 }
0x4cbc   : > { %17835 = vmatpush3.bf16.msra.mxu0 %v18847_v14  ;;  %16401 = vmatprep.mubr.msk.f32.mxu0 %vm18704_vm1, %v18705_v16 }
0x4cbd   : > { %17842 = vmatprep.subr.bf16.mxu0 %v18703_v15 }
0x4d8e   : > { %v6754_v35 = vpop.f32.mrb[88].mxu0 }
0x4d8f   : > { %v6755_v49 = vadd.f32 %v18807_v7, %v6754_v35  ;;  %v16385_v50 = vpop.f32.mrb[89].mxu0 }
0x4d91   : > { %18485 = vtanh.f32 %v6755_v49 }
0x4d9b   : > { %v18486_v51 = vpop.eup %18485 }
0x4d9c   : > { %16395 = vmatmul.mubr.msk.f32.vlgmr.msra.gmra.mrb[88].mxu1 %vm166_vm2, %v18486_v51 }
0x4d9d   : > { %17838 = vmatpush3.bf16.msra.mxu1 %v18863_v17  ;;  %16412 = vmatprep.mubr.msk.f32.mxu1 %vm18704_vm1, %v18705_v16 }
0x4d9e   : > { %17839 = vmatprep.subr.bf16.mxu1 %v18703_v15 }
0x4da1   : > { %17841 = vmatpush3.bf16.msra.mxu1 %v18868_v18 }
0x4da2   : > { %17848 = vmatprep.subr.bf16.mxu1 %v18703_v15 }
0x4e6f   : > { %v6828_v53 = vpop.f32.mrb[88].mxu1 }
0x4e70   : > { %v6829_v54 = vadd.f32 %v18832_v12, %v6828_v53  ;;  %v16396_v56 = vpop.f32.mrb[89].mxu1 }
0x4e72   : > { %v6832_v58 = vmul.f32 %v6829_v54, %v18935_v46  ;;  %v6834_v60 = vmul.f32 %v6829_v54, %v18904_v30 }
0x4e74   : > { %v6833_v61 = vadd.f32 %v6832_v58, %v6608_v57  ;;  %v6835_v62 = vadd.f32 %v6834_v60, %v19605_v59 }
0x4e76   : > { %16402 = vmatmul.mubr.msk.f32.vlgmr.msra.gmra.mrb[90].mxu0 %vm78_vm0, %v6835_v62 }
0x4e77   : > { %17844 = vmatpush3.bf16.msra.mxu0 %v18881_v23  ;;  %16423 = vmatprep.mubr.msk.f32.mxu0 %vm18704_vm1, %v18705_v16 }
0x4e78   : > { %17845 = vmatprep.subr.bf16.mxu0 %v18703_v15 }
0x4e7b   : > { %17847 = vmatpush3.bf16.msra.mxu0 %v18886_v24 }
0x4e7c   : > { %17851 = vmatprep.subr.bf16.mxu0 %v18703_v15 }
0x4f49   : > { %v6905_v19 = vpop.f32.mrb[90].mxu0 }
0x4f4a   : > { %v6906_v39 = vadd.f32 %v18782_v2, %v6905_v19  ;;  %v16403_v20 = vpop.f32.mrb[91].mxu0 }
0x4f4c   : > { %18487 = vtanh.f32 %v6906_v39 }
0x4f56   : > { %v18488_v21 = vpop.eup %18487 }
0x4f57   : > { %16413 = vmatmul.mubr.msk.f32.vlgmr.msra.gmra.mrb[90].mxu1 %vm166_vm2, %v18488_v21 }
0x4f58   : > { %17850 = vmatpush3.bf16.msra.mxu1 %v18847_v14  ;;  %16430 = vmatprep.mubr.msk.f32.mxu1 %vm18704_vm1, %v18705_v16 }
0x4f59   : > { %17857 = vmatprep.subr.bf16.mxu1 %v18703_v15 }
0x502a   : > { %v6979_v22 = vpop.f32.mrb[90].mxu1 }
0x502b   : > { %v6980_v55 = vadd.f32 %v18807_v7, %v6979_v22  ;;  %v16414_v25 = vpop.f32.mrb[91].mxu1 }
0x502d   : > { %18489 = vtanh.f32 %v6980_v55 }
0x5037   : > { %v18490_v26 = vpop.eup %18489 }
0x5038   : > { %16424 = vmatmul.mubr.msk.f32.vlgmr.msra.gmra.mrb[92].mxu0 %vm166_vm2, %v18490_v26 }
0x5039   : > { %17853 = vmatpush3.bf16.msra.mxu0 %v18863_v17  ;;  %16441 = vmatprep.mubr.msk.f32.mxu0 %vm18704_vm1, %v18705_v16 }
0x503a   : > { %17854 = vmatprep.subr.bf16.mxu0 %v18703_v15 }
0x503d   : > { %17856 = vmatpush3.bf16.msra.mxu0 %v18868_v18 }
0x503e   : > { %17863 = vmatprep.subr.bf16.mxu0 %v18703_v15 }
0x510b   : > { %v7053_v27 = vpop.f32.mrb[92].mxu0 }
0x510c   : > { %v7054_v28 = vadd.f32 %v18832_v12, %v7053_v27  ;;  %v16425_v29 = vpop.f32.mrb[93].mxu0 }
0x510e   : > { %v7057_v31 = vmul.f32 %v7054_v28, %v18935_v46  ;;  %v7059_v32 = vmul.f32 %v7054_v28, %v18964_v63 }
0x5110   : > { %v7058_v33 = vadd.f32 %v7057_v31, %v6833_v61  ;;  %v7060_v34 = vadd.f32 %v7059_v32, %v19605_v59 }
0x5112   : > { %16431 = vmatmul.mubr.msk.f32.vlgmr.msra.gmra.mrb[92].mxu1 %vm78_vm0, %v7060_v34 }
0x5113   : > { %17859 = vmatpush3.bf16.msra.mxu1 %v18881_v23  ;;  %16452 = vmatprep.mubr.msk.f32.mxu1 %vm18704_vm1, %v18705_v16 }
0x5114   : > { %17860 = vmatprep.subr.bf16.mxu1 %v18703_v15 }
0x5117   : > { %17862 = vmatpush3.bf16.msra.mxu1 %v18886_v24 }
0x5118   : > { %17866 = vmatprep.subr.bf16.mxu1 %v18703_v15 }
0x51e5   : > { %v7130_v36 = vpop.f32.mrb[92].mxu1 }
0x51e6   : > { %v7131_v37 = vadd.f32 %v18782_v2, %v7130_v36  ;;  %v16432_v38 = vpop.f32.mrb[93].mxu1 }
0x51e8   : > { %18491 = vtanh.f32 %v7131_v37 }
0x51f2   : > { %v18492_v40 = vpop.eup %18491 }
0x51f3   : > { %16442 = vmatmul.mubr.msk.f32.vlgmr.msra.gmra.mrb[94].mxu0 %vm166_vm2, %v18492_v40 }
0x51f4   : > { %17865 = vmatpush3.bf16.msra.mxu0 %v18847_v14  ;;  %16459 = vmatprep.mubr.msk.f32.mxu0 %vm18704_vm1, %v18705_v16 }
0x51f5   : > { %17872 = vmatprep.subr.bf16.mxu0 %v18703_v15 }
0x52c6   : > { %v7204_v59 = vpop.f32.mrb[94].mxu0 }
0x52c7   : > { %v7205_v41 = vadd.f32 %v18807_v7, %v7204_v59  ;;  %v16443_v42 = vpop.f32.mrb[95].mxu0 }
0x52c9   : > { %18493 = vtanh.f32 %v7205_v41 }
0x52d3   : > { %v18494_v44 = vpop.eup %18493 }
0x52d4   : > { %16453 = vmatmul.mubr.msk.f32.vlgmr.msra.gmra.mrb[94].mxu1 %vm166_vm2, %v18494_v44 }
0x52d5   : > { %17868 = vmatpush3.bf16.msra.mxu1 %v18863_v17  ;;  %16470 = vmatprep.mubr.msk.f32.mxu1 %vm18704_vm1, %v18705_v16 }
0x52d6   : > { %17869 = vmatprep.subr.bf16.mxu1 %v18703_v15 }
0x52d9   : > { %17871 = vmatpush3.bf16.msra.mxu1 %v18868_v18 }
0x52da   : > { %17878 = vmatprep.subr.bf16.mxu1 %v18703_v15 }
0x53a7   : > { %v7278_v13 = vpop.f32.mrb[94].mxu1 }
0x53a8   : > { %v7279_v45 = vadd.f32 %v18832_v12, %v7278_v13  ;;  %v16454_v47 = vpop.f32.mrb[95].mxu1 }
0x53aa   : > { %v7282_v48 = vmul.f32 %v7279_v45, %v18931_v43 }
0x53ac   : > { %v19707_v35 = vadd.f32 %v7282_v48, %v7058_v33 }
0x53ae   : > { %16460 = vmatmul.mubr.msk.f32.vlgmr.msra.gmra.mrb[96].mxu0 %vm78_vm0, %v19707_v35 }
0x53af   : > { %17874 = vmatpush3.bf16.msra.mxu0 %v18881_v23  ;;  %16481 = vmatprep.mubr.msk.f32.mxu0 %vm18704_vm1, %v18705_v16 }
0x53b0   : > { %17875 = vmatprep.subr.bf16.mxu0 %v18703_v15 }
0x53b3   : > { %17877 = vmatpush3.bf16.msra.mxu0 %v18886_v24 }
0x53b4   : > { %17881 = vmatprep.subr.bf16.mxu0 %v18703_v15 }
0x5481   : > { %v7353_v49 = vpop.f32.mrb[96].mxu0 }
0x5482   : > { %v7354_v50 = vadd.f32 %v18782_v2, %v7353_v49  ;;  %v16461_v51 = vpop.f32.mrb[97].mxu0 }
0x5484   : > { %18495 = vtanh.f32 %v7354_v50 }
0x548e   : > { %v18496_v52 = vpop.eup %18495 }
0x548f   : > { %16471 = vmatmul.mubr.msk.f32.vlgmr.msra.gmra.mrb[96].mxu1 %vm166_vm2, %v18496_v52 }
0x5490   : > { %17880 = vmatpush3.bf16.msra.mxu1 %v18847_v14  ;;  %16488 = vmatprep.mubr.msk.f32.mxu1 %vm18704_vm1, %v18705_v16 }
0x5491   : > { %17887 = vmatprep.subr.bf16.mxu1 %v18703_v15 }
0x5562   : > { %v7427_v53 = vpop.f32.mrb[96].mxu1 }
0x5563   : > { %v7428_v54 = vadd.f32 %v18807_v7, %v7427_v53  ;;  %v16472_v56 = vpop.f32.mrb[97].mxu1 }
0x5565   : > { %18497 = vtanh.f32 %v7428_v54 }
0x556f   : > { %v18498_v57 = vpop.eup %18497 }
0x5570   : > { %16482 = vmatmul.mubr.msk.f32.vlgmr.msra.gmra.mrb[98].mxu0 %vm166_vm2, %v18498_v57 }
0x5571   : > { %17883 = vmatpush3.bf16.msra.mxu0 %v18863_v17  ;;  %16499 = vmatprep.mubr.msk.f32.mxu0 %vm18704_vm1, %v18705_v16 }
0x5572   : > { %17884 = vmatprep.subr.bf16.mxu0 %v18703_v15 }
0x5575   : > { %17886 = vmatpush3.bf16.msra.mxu0 %v18868_v18 }
0x5576   : > { %17893 = vmatprep.subr.bf16.mxu0 %v18703_v15 }
0x5643   : > { %v7501_v58 = vpop.f32.mrb[98].mxu0 }
0x5644   : > { %v7502_v60 = vadd.f32 %v18832_v12, %v7501_v58  ;;  %v16483_v61 = vpop.f32.mrb[99].mxu0 }
0x5646   : > { %v7507_v62 = vmul.f32 %v7502_v60, %v18904_v30  ;;  %v7505_v28 = vmul.f32 %v7502_v60, %v18931_v43 }
0x5648   : > { %v7508_v19 = vadd.f32 %v7507_v62, %v19707_v35  ;;  %v7506_v33 = vadd.f32 %v7505_v28, %v19707_v35 }
0x564a   : > { %16489 = vmatmul.mubr.msk.f32.vlgmr.msra.gmra.mrb[98].mxu1 %vm78_vm0, %v7508_v19 }
0x564b   : > { %17889 = vmatpush3.bf16.msra.mxu1 %v18881_v23  ;;  %16510 = vmatprep.mubr.msk.f32.mxu1 %vm18704_vm1, %v18705_v16 }
0x564c   : > { %17890 = vmatprep.subr.bf16.mxu1 %v18703_v15 }
0x564f   : > { %17892 = vmatpush3.bf16.msra.mxu1 %v18886_v24 }
0x5650   : > { %17896 = vmatprep.subr.bf16.mxu1 %v18703_v15 }
0x571d   : > { %v7578_v39 = vpop.f32.mrb[98].mxu1 }
0x571e   : > { %v7579_v20 = vadd.f32 %v18782_v2, %v7578_v39  ;;  %v16490_v21 = vpop.f32.mrb[99].mxu1 }
0x5720   : > { %18499 = vtanh.f32 %v7579_v20 }
0x572a   : > { %v18500_v22 = vpop.eup %18499 }
0x572b   : > { %16500 = vmatmul.mubr.msk.f32.vlgmr.msra.gmra.mrb[100].mxu0 %vm166_vm2, %v18500_v22 }
0x572c   : > { %17895 = vmatpush3.bf16.msra.mxu0 %v18847_v14  ;;  %16517 = vmatprep.mubr.msk.f32.mxu0 %vm18704_vm1, %v18705_v16 }
0x572d   : > { %17902 = vmatprep.subr.bf16.mxu0 %v18703_v15 }
0x57fe   : > { %v7652_v55 = vpop.f32.mrb[100].mxu0 }
0x57ff   : > { %v7653_v25 = vadd.f32 %v18807_v7, %v7652_v55  ;;  %v16501_v26 = vpop.f32.mrb[101].mxu0 }
0x5801   : > { %18501 = vtanh.f32 %v7653_v25 }
0x580b   : > { %v18502_v27 = vpop.eup %18501 }
0x580c   : > { %16511 = vmatmul.mubr.msk.f32.vlgmr.msra.gmra.mrb[100].mxu1 %vm166_vm2, %v18502_v27 }
0x580d   : > { %17898 = vmatpush3.bf16.msra.mxu1 %v18863_v17  ;;  %16528 = vmatprep.mubr.msk.f32.mxu1 %vm18704_vm1, %v18705_v16 }
0x580e   : > { %17899 = vmatprep.subr.bf16.mxu1 %v18703_v15 }
0x5811   : > { %17901 = vmatpush3.bf16.msra.mxu1 %v18868_v18 }
0x5812   : > { %17908 = vmatprep.subr.bf16.mxu1 %v18703_v15 }
0x58df   : > { %v7726_v29 = vpop.f32.mrb[100].mxu1 }
0x58e0   : > { %v7727_v31 = vadd.f32 %v18832_v12, %v7726_v29  ;;  %v16512_v32 = vpop.f32.mrb[101].mxu1 }
0x58e2   : > { %v7730_v34 = vmul.f32 %v7727_v31, %v18935_v46  ;;  %v7732_v36 = vmul.f32 %v7727_v31, %v18904_v30 }
0x58e4   : > { %v7731_v37 = vadd.f32 %v7730_v34, %v7506_v33  ;;  %v7733_v38 = vadd.f32 %v7732_v36, %v19707_v35 }
0x58e6   : > { %16518 = vmatmul.mubr.msk.f32.vlgmr.msra.gmra.mrb[102].mxu0 %vm78_vm0, %v7733_v38 }
0x58e7   : > { %17904 = vmatpush3.bf16.msra.mxu0 %v18881_v23  ;;  %16539 = vmatprep.mubr.msk.f32.mxu0 %vm18704_vm1, %v18705_v16 }
0x58e8   : > { %17905 = vmatprep.subr.bf16.mxu0 %v18703_v15 }
0x58eb   : > { %17907 = vmatpush3.bf16.msra.mxu0 %v18886_v24 }
0x58ec   : > { %17911 = vmatprep.subr.bf16.mxu0 %v18703_v15 }
0x59b9   : > { %v7803_v40 = vpop.f32.mrb[102].mxu0 }
0x59ba   : > { %v7804_v59 = vadd.f32 %v18782_v2, %v7803_v40  ;;  %v16519_v41 = vpop.f32.mrb[103].mxu0 }
0x59bc   : > { %18503 = vtanh.f32 %v7804_v59 }
0x59c6   : > { %v18504_v42 = vpop.eup %18503 }
0x59c7   : > { %16529 = vmatmul.mubr.msk.f32.vlgmr.msra.gmra.mrb[102].mxu1 %vm166_vm2, %v18504_v42 }
0x59c8   : > { %17910 = vmatpush3.bf16.msra.mxu1 %v18847_v14  ;;  %16546 = vmatprep.mubr.msk.f32.mxu1 %vm18704_vm1, %v18705_v16 }
0x59c9   : > { %17917 = vmatprep.subr.bf16.mxu1 %v18703_v15 }
0x5a9a   : > { %v7877_v44 = vpop.f32.mrb[102].mxu1 }
0x5a9b   : > { %v7878_v13 = vadd.f32 %v18807_v7, %v7877_v44  ;;  %v16530_v45 = vpop.f32.mrb[103].mxu1 }
0x5a9d   : > { %18505 = vtanh.f32 %v7878_v13 }
0x5aa7   : > { %v18506_v47 = vpop.eup %18505 }
0x5aa8   : > { %16540 = vmatmul.mubr.msk.f32.vlgmr.msra.gmra.mrb[104].mxu0 %vm166_vm2, %v18506_v47 }
0x5aa9   : > { %17913 = vmatpush3.bf16.msra.mxu0 %v18863_v17  ;;  %16557 = vmatprep.mubr.msk.f32.mxu0 %vm18704_vm1, %v18705_v16 }
0x5aaa   : > { %17914 = vmatprep.subr.bf16.mxu0 %v18703_v15 }
0x5aad   : > { %17916 = vmatpush3.bf16.msra.mxu0 %v18868_v18 }
0x5aae   : > { %17923 = vmatprep.subr.bf16.mxu0 %v18703_v15 }
0x5b7b   : > { %v7951_v48 = vpop.f32.mrb[104].mxu0 }
0x5b7c   : > { %v7952_v49 = vadd.f32 %v18832_v12, %v7951_v48  ;;  %v16541_v50 = vpop.f32.mrb[105].mxu0 }
0x5b7e   : > { %v7955_v51 = vmul.f32 %v7952_v49, %v18935_v46  ;;  %v7957_v52 = vmul.f32 %v7952_v49, %v18964_v63 }
0x5b80   : > { %v7956_v53 = vadd.f32 %v7955_v51, %v7731_v37  ;;  %v7958_v54 = vadd.f32 %v7957_v52, %v19707_v35 }
0x5b82   : > { %16547 = vmatmul.mubr.msk.f32.vlgmr.msra.gmra.mrb[104].mxu1 %vm78_vm0, %v7958_v54 }
0x5b83   : > { %17919 = vmatpush3.bf16.msra.mxu1 %v18881_v23  ;;  %16568 = vmatprep.mubr.msk.f32.mxu1 %vm18704_vm1, %v18705_v16 }
0x5b84   : > { %17920 = vmatprep.subr.bf16.mxu1 %v18703_v15 }
0x5b87   : > { %17922 = vmatpush3.bf16.msra.mxu1 %v18886_v24 }
0x5b88   : > { %17926 = vmatprep.subr.bf16.mxu1 %v18703_v15 }
0x5c55   : > { %v8028_v56 = vpop.f32.mrb[104].mxu1 }
0x5c56   : > { %v8029_v57 = vadd.f32 %v18782_v2, %v8028_v56  ;;  %v16548_v58 = vpop.f32.mrb[105].mxu1 }
0x5c58   : > { %18507 = vtanh.f32 %v8029_v57 }
0x5c62   : > { %v18508_v60 = vpop.eup %18507 }
0x5c63   : > { %16558 = vmatmul.mubr.msk.f32.vlgmr.msra.gmra.mrb[106].mxu0 %vm166_vm2, %v18508_v60 }
0x5c64   : > { %17925 = vmatpush3.bf16.msra.mxu0 %v18847_v14  ;;  %16575 = vmatprep.mubr.msk.f32.mxu0 %vm18704_vm1, %v18705_v16 }
0x5c65   : > { %17932 = vmatprep.subr.bf16.mxu0 %v18703_v15 }
0x5d36   : > { %v8102_v35 = vpop.f32.mrb[106].mxu0 }
0x5d37   : > { %v8103_v61 = vadd.f32 %v18807_v7, %v8102_v35  ;;  %v16559_v62 = vpop.f32.mrb[107].mxu0 }
0x5d39   : > { %18509 = vtanh.f32 %v8103_v61 }
0x5d43   : > { %v18510_v19 = vpop.eup %18509 }
0x5d44   : > { %16569 = vmatmul.mubr.msk.f32.vlgmr.msra.gmra.mrb[106].mxu1 %vm166_vm2, %v18510_v19 }
0x5d45   : > { %17928 = vmatpush3.bf16.msra.mxu1 %v18863_v17  ;;  %16586 = vmatprep.mubr.msk.f32.mxu1 %vm18704_vm1, %v18705_v16 }
0x5d46   : > { %17929 = vmatprep.subr.bf16.mxu1 %v18703_v15 }
0x5d49   : > { %17931 = vmatpush3.bf16.msra.mxu1 %v18868_v18 }
0x5d4a   : > { %17938 = vmatprep.subr.bf16.mxu1 %v18703_v15 }
0x5e17   : > { %v8176_v39 = vpop.f32.mrb[106].mxu1 }
0x5e18   : > { %v8177_v20 = vadd.f32 %v18832_v12, %v8176_v39  ;;  %v16570_v21 = vpop.f32.mrb[107].mxu1 }
0x5e1a   : > { %v8180_v22 = vmul.f32 %v8177_v20, %v18931_v43 }
0x5e1c   : > { %v19809_v55 = vadd.f32 %v8180_v22, %v7956_v53 }
0x5e1e   : > { %16576 = vmatmul.mubr.msk.f32.vlgmr.msra.gmra.mrb[108].mxu0 %vm78_vm0, %v19809_v55 }
0x5e1f   : > { %17934 = vmatpush3.bf16.msra.mxu0 %v18881_v23  ;;  %16597 = vmatprep.mubr.msk.f32.mxu0 %vm18704_vm1, %v18705_v16 }
0x5e20   : > { %17935 = vmatprep.subr.bf16.mxu0 %v18703_v15 }
0x5e23   : > { %17937 = vmatpush3.bf16.msra.mxu0 %v18886_v24 }
0x5e24   : > { %17941 = vmatprep.subr.bf16.mxu0 %v18703_v15 }
0x5ef1   : > { %v8251_v25 = vpop.f32.mrb[108].mxu0 }
0x5ef2   : > { %v8252_v26 = vadd.f32 %v18782_v2, %v8251_v25  ;;  %v16577_v27 = vpop.f32.mrb[109].mxu0 }
0x5ef4   : > { %18511 = vtanh.f32 %v8252_v26 }
0x5efe   : > { %v18512_v28 = vpop.eup %18511 }
0x5eff   : > { %16587 = vmatmul.mubr.msk.f32.vlgmr.msra.gmra.mrb[108].mxu1 %vm166_vm2, %v18512_v28 }
0x5f00   : > { %17940 = vmatpush3.bf16.msra.mxu1 %v18847_v14  ;;  %16604 = vmatprep.mubr.msk.f32.mxu1 %vm18704_vm1, %v18705_v16 }
0x5f01   : > { %17947 = vmatprep.subr.bf16.mxu1 %v18703_v15 }
0x5fd2   : > { %v8325_v29 = vpop.f32.mrb[108].mxu1 }
0x5fd3   : > { %v8326_v31 = vadd.f32 %v18807_v7, %v8325_v29  ;;  %v16588_v32 = vpop.f32.mrb[109].mxu1 }
0x5fd5   : > { %18513 = vtanh.f32 %v8326_v31 }
0x5fdf   : > { %v18514_v33 = vpop.eup %18513 }
0x5fe0   : > { %16598 = vmatmul.mubr.msk.f32.vlgmr.msra.gmra.mrb[110].mxu0 %vm166_vm2, %v18514_v33 }
0x5fe1   : > { %17943 = vmatpush3.bf16.msra.mxu0 %v18863_v17  ;;  %16615 = vmatprep.mubr.msk.f32.mxu0 %vm18704_vm1, %v18705_v16 }
0x5fe2   : > { %17944 = vmatprep.subr.bf16.mxu0 %v18703_v15 }
0x5fe5   : > { %17946 = vmatpush3.bf16.msra.mxu0 %v18868_v18 }
0x5fe6   : > { %17953 = vmatprep.subr.bf16.mxu0 %v18703_v15 }
0x60b3   : > { %v8399_v34 = vpop.f32.mrb[110].mxu0 }
0x60b4   : > { %v8400_v36 = vadd.f32 %v18832_v12, %v8399_v34  ;;  %v16599_v37 = vpop.f32.mrb[111].mxu0 }
0x60b6   : > { %v8405_v38 = vmul.f32 %v8400_v36, %v18904_v30  ;;  %v8403_v49 = vmul.f32 %v8400_v36, %v18931_v43 }
0x60b8   : > { %v8406_v40 = vadd.f32 %v8405_v38, %v19809_v55  ;;  %v8404_v53 = vadd.f32 %v8403_v49, %v19809_v55 }
0x60ba   : > { %16605 = vmatmul.mubr.msk.f32.vlgmr.msra.gmra.mrb[110].mxu1 %vm78_vm0, %v8406_v40 }
0x60bb   : > { %17949 = vmatpush3.bf16.msra.mxu1 %v18881_v23  ;;  %16626 = vmatprep.mubr.msk.f32.mxu1 %vm18704_vm1, %v18705_v16 }
0x60bc   : > { %17950 = vmatprep.subr.bf16.mxu1 %v18703_v15 }
0x60bf   : > { %17952 = vmatpush3.bf16.msra.mxu1 %v18886_v24 }
0x60c0   : > { %17956 = vmatprep.subr.bf16.mxu1 %v18703_v15 }
0x618d   : > { %v8476_v59 = vpop.f32.mrb[110].mxu1 }
0x618e   : > { %v8477_v41 = vadd.f32 %v18782_v2, %v8476_v59  ;;  %v16606_v42 = vpop.f32.mrb[111].mxu1 }
0x6190   : > { %18515 = vtanh.f32 %v8477_v41 }
0x619a   : > { %v18516_v44 = vpop.eup %18515 }
0x619b   : > { %16616 = vmatmul.mubr.msk.f32.vlgmr.msra.gmra.mrb[112].mxu0 %vm166_vm2, %v18516_v44 }
0x619c   : > { %17955 = vmatpush3.bf16.msra.mxu0 %v18847_v14  ;;  %16633 = vmatprep.mubr.msk.f32.mxu0 %vm18704_vm1, %v18705_v16 }
0x619d   : > { %17962 = vmatprep.subr.bf16.mxu0 %v18703_v15 }
0x626e   : > { %v8550_v13 = vpop.f32.mrb[112].mxu0 }
0x626f   : > { %v8551_v45 = vadd.f32 %v18807_v7, %v8550_v13  ;;  %v16617_v47 = vpop.f32.mrb[113].mxu0 }
0x6271   : > { %18517 = vtanh.f32 %v8551_v45 }
0x627b   : > { %v18518_v48 = vpop.eup %18517 }
0x627c   : > { %16627 = vmatmul.mubr.msk.f32.vlgmr.msra.gmra.mrb[112].mxu1 %vm166_vm2, %v18518_v48 }
0x627d   : > { %17958 = vmatpush3.bf16.msra.mxu1 %v18863_v17  ;;  %16644 = vmatprep.mubr.msk.f32.mxu1 %vm18704_vm1, %v18705_v16 }
0x627e   : > { %17959 = vmatprep.subr.bf16.mxu1 %v18703_v15 }
0x6281   : > { %17961 = vmatpush3.bf16.msra.mxu1 %v18868_v18 }
0x6282   : > { %17968 = vmatprep.subr.bf16.mxu1 %v18703_v15 }
0x634f   : > { %v8624_v50 = vpop.f32.mrb[112].mxu1 }
0x6350   : > { %v8625_v51 = vadd.f32 %v18832_v12, %v8624_v50  ;;  %v16628_v52 = vpop.f32.mrb[113].mxu1 }
0x6352   : > { %v8628_v54 = vmul.f32 %v8625_v51, %v18935_v46  ;;  %v8630_v56 = vmul.f32 %v8625_v51, %v18904_v30 }
0x6354   : > { %v8629_v57 = vadd.f32 %v8628_v54, %v8404_v53  ;;  %v8631_v58 = vadd.f32 %v8630_v56, %v19809_v55 }
0x6356   : > { %16634 = vmatmul.mubr.msk.f32.vlgmr.msra.gmra.mrb[114].mxu0 %vm78_vm0, %v8631_v58 }
0x6357   : > { %17964 = vmatpush3.bf16.msra.mxu0 %v18881_v23  ;;  %16655 = vmatprep.mubr.msk.f32.mxu0 %vm18704_vm1, %v18705_v16 }
0x6358   : > { %17965 = vmatprep.subr.bf16.mxu0 %v18703_v15 }
0x635b   : > { %17967 = vmatpush3.bf16.msra.mxu0 %v18886_v24 }
0x635c   : > { %17971 = vmatprep.subr.bf16.mxu0 %v18703_v15 }
0x6429   : > { %v8701_v60 = vpop.f32.mrb[114].mxu0 }
0x642a   : > { %v8702_v35 = vadd.f32 %v18782_v2, %v8701_v60  ;;  %v16635_v61 = vpop.f32.mrb[115].mxu0 }
0x642c   : > { %18519 = vtanh.f32 %v8702_v35 }
0x6436   : > { %v18520_v62 = vpop.eup %18519 }
0x6437   : > { %16645 = vmatmul.mubr.msk.f32.vlgmr.msra.gmra.mrb[114].mxu1 %vm166_vm2, %v18520_v62 }
0x6438   : > { %17970 = vmatpush3.bf16.msra.mxu1 %v18847_v14  ;;  %16662 = vmatprep.mubr.msk.f32.mxu1 %vm18704_vm1, %v18705_v16 }
0x6439   : > { %17977 = vmatprep.subr.bf16.mxu1 %v18703_v15 }
0x650a   : > { %v8775_v19 = vpop.f32.mrb[114].mxu1 }
0x650b   : > { %v8776_v39 = vadd.f32 %v18807_v7, %v8775_v19  ;;  %v16646_v20 = vpop.f32.mrb[115].mxu1 }
0x650d   : > { %18521 = vtanh.f32 %v8776_v39 }
0x6517   : > { %v18522_v21 = vpop.eup %18521 }
0x6518   : > { %16656 = vmatmul.mubr.msk.f32.vlgmr.msra.gmra.mrb[116].mxu0 %vm166_vm2, %v18522_v21 }
0x6519   : > { %17973 = vmatpush3.bf16.msra.mxu0 %v18863_v17  ;;  %16673 = vmatprep.mubr.msk.f32.mxu0 %vm18704_vm1, %v18705_v16 }
0x651a   : > { %17974 = vmatprep.subr.bf16.mxu0 %v18703_v15 }
0x651d   : > { %17976 = vmatpush3.bf16.msra.mxu0 %v18868_v18 }
0x651e   : > { %17983 = vmatprep.subr.bf16.mxu0 %v18703_v15 }
0x65eb   : > { %v8849_v22 = vpop.f32.mrb[116].mxu0 }
0x65ec   : > { %v8850_v25 = vadd.f32 %v18832_v12, %v8849_v22  ;;  %v16657_v26 = vpop.f32.mrb[117].mxu0 }
0x65ee   : > { %v8853_v27 = vmul.f32 %v8850_v25, %v18935_v46  ;;  %v8855_v28 = vmul.f32 %v8850_v25, %v18964_v63 }
0x65f0   : > { %v8854_v29 = vadd.f32 %v8853_v27, %v8629_v57  ;;  %v8856_v31 = vadd.f32 %v8855_v28, %v19809_v55 }
0x65f2   : > { %16663 = vmatmul.mubr.msk.f32.vlgmr.msra.gmra.mrb[116].mxu1 %vm78_vm0, %v8856_v31 }
0x65f3   : > { %17979 = vmatpush3.bf16.msra.mxu1 %v18881_v23  ;;  %16684 = vmatprep.mubr.msk.f32.mxu1 %vm18704_vm1, %v18705_v16 }
0x65f4   : > { %17980 = vmatprep.subr.bf16.mxu1 %v18703_v15 }
0x65f7   : > { %17982 = vmatpush3.bf16.msra.mxu1 %v18886_v24 }
0x65f8   : > { %17986 = vmatprep.subr.bf16.mxu1 %v18703_v15 }
0x66c5   : > { %v8926_v32 = vpop.f32.mrb[116].mxu1 }
0x66c6   : > { %v8927_v33 = vadd.f32 %v18782_v2, %v8926_v32  ;;  %v16664_v34 = vpop.f32.mrb[117].mxu1 }
0x66c8   : > { %18523 = vtanh.f32 %v8927_v33 }
0x66d2   : > { %v18524_v36 = vpop.eup %18523 }
0x66d3   : > { %16674 = vmatmul.mubr.msk.f32.vlgmr.msra.gmra.mrb[118].mxu0 %vm166_vm2, %v18524_v36 }
0x66d4   : > { %17985 = vmatpush3.bf16.msra.mxu0 %v18847_v14  ;;  %16691 = vmatprep.mubr.msk.f32.mxu0 %vm18704_vm1, %v18705_v16 }
0x66d5   : > { %17992 = vmatprep.subr.bf16.mxu0 %v18703_v15 }
0x67a6   : > { %v9000_v55 = vpop.f32.mrb[118].mxu0 }
0x67a7   : > { %v9001_v37 = vadd.f32 %v18807_v7, %v9000_v55  ;;  %v16675_v38 = vpop.f32.mrb[119].mxu0 }
0x67a9   : > { %18525 = vtanh.f32 %v9001_v37 }
0x67b3   : > { %v18526_v40 = vpop.eup %18525 }
0x67b4   : > { %16685 = vmatmul.mubr.msk.f32.vlgmr.msra.gmra.mrb[118].mxu1 %vm166_vm2, %v18526_v40 }
0x67b5   : > { %17988 = vmatpush3.bf16.msra.mxu1 %v18863_v17  ;;  %16702 = vmatprep.mubr.msk.f32.mxu1 %vm18704_vm1, %v18705_v16 }
0x67b6   : > { %17989 = vmatprep.subr.bf16.mxu1 %v18703_v15 }
0x67b9   : > { %17991 = vmatpush3.bf16.msra.mxu1 %v18868_v18 }
0x67ba   : > { %17998 = vmatprep.subr.bf16.mxu1 %v18703_v15 }
0x6887   : > { %v9074_v59 = vpop.f32.mrb[118].mxu1 }
0x6888   : > { %v9075_v41 = vadd.f32 %v18832_v12, %v9074_v59  ;;  %v16686_v42 = vpop.f32.mrb[119].mxu1 }
0x688a   : > { %v9078_v44 = vmul.f32 %v9075_v41, %v18931_v43 }
0x688c   : > { %v19911_v13 = vadd.f32 %v9078_v44, %v8854_v29 }
0x688e   : > { %16692 = vmatmul.mubr.msk.f32.vlgmr.msra.gmra.mrb[120].mxu0 %vm78_vm0, %v19911_v13 }
0x688f   : > { %17994 = vmatpush3.bf16.msra.mxu0 %v18881_v23  ;;  %16713 = vmatprep.mubr.msk.f32.mxu0 %vm18704_vm1, %v18705_v16 }
0x6890   : > { %17995 = vmatprep.subr.bf16.mxu0 %v18703_v15 }
0x6893   : > { %17997 = vmatpush3.bf16.msra.mxu0 %v18886_v24 }
0x6894   : > { %18001 = vmatprep.subr.bf16.mxu0 %v18703_v15 }
0x6961   : > { %v9149_v45 = vpop.f32.mrb[120].mxu0 }
0x6962   : > { %v9150_v47 = vadd.f32 %v18782_v2, %v9149_v45  ;;  %v16693_v48 = vpop.f32.mrb[121].mxu0 }
0x6964   : > { %18527 = vtanh.f32 %v9150_v47 }
0x696e   : > { %v18528_v49 = vpop.eup %18527 }
0x696f   : > { %16703 = vmatmul.mubr.msk.f32.vlgmr.msra.gmra.mrb[120].mxu1 %vm166_vm2, %v18528_v49 }
0x6970   : > { %18000 = vmatpush3.bf16.msra.mxu1 %v18847_v14  ;;  %16720 = vmatprep.mubr.msk.f32.mxu1 %vm18704_vm1, %v18705_v16 }
0x6971   : > { %18007 = vmatprep.subr.bf16.mxu1 %v18703_v15 }
0x6a42   : > { %v9223_v50 = vpop.f32.mrb[120].mxu1 }
0x6a43   : > { %v9224_v51 = vadd.f32 %v18807_v7, %v9223_v50  ;;  %v16704_v52 = vpop.f32.mrb[121].mxu1 }
0x6a45   : > { %18529 = vtanh.f32 %v9224_v51 }
0x6a4f   : > { %v18530_v53 = vpop.eup %18529 }
0x6a50   : > { %16714 = vmatmul.mubr.msk.f32.vlgmr.msra.gmra.mrb[122].mxu0 %vm166_vm2, %v18530_v53 }
0x6a51   : > { %18003 = vmatpush3.bf16.msra.mxu0 %v18863_v17  ;;  %16731 = vmatprep.mubr.msk.f32.mxu0 %vm18704_vm1, %v18705_v16 }
0x6a52   : > { %18004 = vmatprep.subr.bf16.mxu0 %v18703_v15 }
0x6a55   : > { %18006 = vmatpush3.bf16.msra.mxu0 %v18868_v18 }
0x6a56   : > { %18013 = vmatprep.subr.bf16.mxu0 %v18703_v15 }
0x6b23   : > { %v9297_v54 = vpop.f32.mrb[122].mxu0 }
0x6b24   : > { %v9298_v56 = vadd.f32 %v18832_v12, %v9297_v54  ;;  %v16715_v57 = vpop.f32.mrb[123].mxu0 }
0x6b26   : > { %v9303_v58 = vmul.f32 %v9298_v56, %v18904_v30  ;;  %v9301_v25 = vmul.f32 %v9298_v56, %v18931_v43 }
0x6b28   : > { %v9304_v60 = vadd.f32 %v9303_v58, %v19911_v13  ;;  %v9302_v29 = vadd.f32 %v9301_v25, %v19911_v13 }
0x6b2a   : > { %16721 = vmatmul.mubr.msk.f32.vlgmr.msra.gmra.mrb[122].mxu1 %vm78_vm0, %v9304_v60 }
0x6b2b   : > { %18009 = vmatpush3.bf16.msra.mxu1 %v18881_v23  ;;  %16742 = vmatprep.mubr.msk.f32.mxu1 %vm18704_vm1, %v18705_v16 }
0x6b2c   : > { %18010 = vmatprep.subr.bf16.mxu1 %v18703_v15 }
0x6b2f   : > { %18012 = vmatpush3.bf16.msra.mxu1 %v18886_v24 }
0x6b30   : > { %18016 = vmatprep.subr.bf16.mxu1 %v18703_v15 }
0x6bfd   : > { %v9374_v35 = vpop.f32.mrb[122].mxu1 }
0x6bfe   : > { %v9375_v61 = vadd.f32 %v18782_v2, %v9374_v35  ;;  %v16722_v62 = vpop.f32.mrb[123].mxu1 }
0x6c00   : > { %18531 = vtanh.f32 %v9375_v61 }
0x6c0a   : > { %v18532_v19 = vpop.eup %18531 }
0x6c0b   : > { %16732 = vmatmul.mubr.msk.f32.vlgmr.msra.gmra.mrb[124].mxu0 %vm166_vm2, %v18532_v19 }
0x6c0c   : > { %18015 = vmatpush3.bf16.msra.mxu0 %v18847_v14  ;;  %16749 = vmatprep.mubr.msk.f32.mxu0 %vm18704_vm1, %v18705_v16 }
0x6c0d   : > { %18022 = vmatprep.subr.bf16.mxu0 %v18703_v15 }
0x6cde   : > { %v9448_v39 = vpop.f32.mrb[124].mxu0 }
0x6cdf   : > { %v9449_v20 = vadd.f32 %v18807_v7, %v9448_v39  ;;  %v16733_v21 = vpop.f32.mrb[125].mxu0 }
0x6ce1   : > { %18533 = vtanh.f32 %v9449_v20 }
0x6ceb   : > { %v18534_v22 = vpop.eup %18533 }
0x6cec   : > { %16743 = vmatmul.mubr.msk.f32.vlgmr.msra.gmra.mrb[124].mxu1 %vm166_vm2, %v18534_v22 }
0x6ced   : > { %18018 = vmatpush3.bf16.msra.mxu1 %v18863_v17  ;;  %16760 = vmatprep.mubr.msk.f32.mxu1 %vm18704_vm1, %v18705_v16 }
0x6cee   : > { %18019 = vmatprep.subr.bf16.mxu1 %v18703_v15 }
0x6cf1   : > { %18021 = vmatpush3.bf16.msra.mxu1 %v18868_v18 }
0x6cf2   : > { %18028 = vmatprep.subr.bf16.mxu1 %v18703_v15 }
0x6dbf   : > { %v9522_v26 = vpop.f32.mrb[124].mxu1 }
0x6dc0   : > { %v9523_v27 = vadd.f32 %v18832_v12, %v9522_v26  ;;  %v16744_v28 = vpop.f32.mrb[125].mxu1 }
0x6dc2   : > { %v9526_v31 = vmul.f32 %v9523_v27, %v18935_v46  ;;  %v9528_v32 = vmul.f32 %v9523_v27, %v18904_v30 }
0x6dc4   : > { %v9527_v33 = vadd.f32 %v9526_v31, %v9302_v29  ;;  %v9529_v34 = vadd.f32 %v9528_v32, %v19911_v13 }
0x6dc6   : > { %16750 = vmatmul.mubr.msk.f32.vlgmr.msra.gmra.mrb[126].mxu0 %vm78_vm0, %v9529_v34 }
0x6dc7   : > { %18024 = vmatpush3.bf16.msra.mxu0 %v18881_v23  ;;  %16771 = vmatprep.mubr.msk.f32.mxu0 %vm18704_vm1, %v18705_v16 }
0x6dc8   : > { %18025 = vmatprep.subr.bf16.mxu0 %v18703_v15 }
0x6dcb   : > { %18027 = vmatpush3.bf16.msra.mxu0 %v18886_v24 }
0x6dcc   : > { %18031 = vmatprep.subr.bf16.mxu0 %v18703_v15 }
0x6e99   : > { %v9599_v36 = vpop.f32.mrb[126].mxu0 }
0x6e9a   : > { %v9600_v55 = vadd.f32 %v18782_v2, %v9599_v36  ;;  %v16751_v37 = vpop.f32.mrb[127].mxu0 }
0x6e9c   : > { %18535 = vtanh.f32 %v9600_v55 }
0x6ea6   : > { %v18536_v38 = vpop.eup %18535 }
0x6ea7   : > { %16761 = vmatmul.mubr.msk.f32.vlgmr.msra.gmra.mrb[126].mxu1 %vm166_vm2, %v18536_v38 }
0x6ea8   : > { %18030 = vmatpush3.bf16.msra.mxu1 %v18847_v14  ;;  %16778 = vmatprep.mubr.msk.f32.mxu1 %vm18704_vm1, %v18705_v16 }
0x6ea9   : > { %18037 = vmatprep.subr.bf16.mxu1 %v18703_v15 }
0x6f7a   : > { %v9673_v40 = vpop.f32.mrb[126].mxu1 }
0x6f7b   : > { %v9674_v59 = vadd.f32 %v18807_v7, %v9673_v40  ;;  %v16762_v41 = vpop.f32.mrb[127].mxu1 }
0x6f7d   : > { %18537 = vtanh.f32 %v9674_v59 }
0x6f87   : > { %v18538_v42 = vpop.eup %18537 }
0x6f88   : > { %16772 = vmatmul.mubr.msk.f32.vlgmr.msra.gmra.mrb[128].mxu0 %vm166_vm2, %v18538_v42 }
0x6f89   : > { %18033 = vmatpush3.bf16.msra.mxu0 %v18863_v17  ;;  %16789 = vmatprep.mubr.msk.f32.mxu0 %vm18704_vm1, %v18705_v16 }
0x6f8a   : > { %18034 = vmatprep.subr.bf16.mxu0 %v18703_v15 }
0x6f8d   : > { %18036 = vmatpush3.bf16.msra.mxu0 %v18868_v18 }
0x6f8e   : > { %18043 = vmatprep.subr.bf16.mxu0 %v18703_v15 }
0x705b   : > { %v9747_v44 = vpop.f32.mrb[128].mxu0 }
0x705c   : > { %v9748_v45 = vadd.f32 %v18832_v12, %v9747_v44  ;;  %v16773_v47 = vpop.f32.mrb[129].mxu0 }
0x705e   : > { %v9751_v48 = vmul.f32 %v9748_v45, %v18935_v46  ;;  %v9753_v49 = vmul.f32 %v9748_v45, %v18964_v63 }
0x7060   : > { %v9752_v50 = vadd.f32 %v9751_v48, %v9527_v33  ;;  %v9754_v51 = vadd.f32 %v9753_v49, %v19911_v13 }
0x7062   : > { %16779 = vmatmul.mubr.msk.f32.vlgmr.msra.gmra.mrb[128].mxu1 %vm78_vm0, %v9754_v51 }
0x7063   : > { %18039 = vmatpush3.bf16.msra.mxu1 %v18881_v23  ;;  %16800 = vmatprep.mubr.msk.f32.mxu1 %vm18704_vm1, %v18705_v16 }
0x7064   : > { %18040 = vmatprep.subr.bf16.mxu1 %v18703_v15 }
0x7067   : > { %18042 = vmatpush3.bf16.msra.mxu1 %v18886_v24 }
0x7068   : > { %18046 = vmatprep.subr.bf16.mxu1 %v18703_v15 }
0x7135   : > { %v9824_v52 = vpop.f32.mrb[128].mxu1 }
0x7136   : > { %v9825_v53 = vadd.f32 %v18782_v2, %v9824_v52  ;;  %v16780_v54 = vpop.f32.mrb[129].mxu1 }
0x7138   : > { %18539 = vtanh.f32 %v9825_v53 }
0x7142   : > { %v18540_v56 = vpop.eup %18539 }
0x7143   : > { %16790 = vmatmul.mubr.msk.f32.vlgmr.msra.gmra.mrb[130].mxu0 %vm166_vm2, %v18540_v56 }
0x7144   : > { %18045 = vmatpush3.bf16.msra.mxu0 %v18847_v14  ;;  %16807 = vmatprep.mubr.msk.f32.mxu0 %vm18704_vm1, %v18705_v16 }
0x7145   : > { %18052 = vmatprep.subr.bf16.mxu0 %v18703_v15 }
0x7216   : > { %v9898_v13 = vpop.f32.mrb[130].mxu0 }
0x7217   : > { %v9899_v57 = vadd.f32 %v18807_v7, %v9898_v13  ;;  %v16791_v58 = vpop.f32.mrb[131].mxu0 }
0x7219   : > { %18541 = vtanh.f32 %v9899_v57 }
0x7223   : > { %v18542_v60 = vpop.eup %18541 }
0x7224   : > { %16801 = vmatmul.mubr.msk.f32.vlgmr.msra.gmra.mrb[130].mxu1 %vm166_vm2, %v18542_v60 }
0x7225   : > { %18048 = vmatpush3.bf16.msra.mxu1 %v18863_v17  ;;  %16818 = vmatprep.mubr.msk.f32.mxu1 %vm18704_vm1, %v18705_v16 }
0x7226   : > { %18049 = vmatprep.subr.bf16.mxu1 %v18703_v15 }
0x7229   : > { %18051 = vmatpush3.bf16.msra.mxu1 %v18868_v18 }
0x722a   : > { %18058 = vmatprep.subr.bf16.mxu1 %v18703_v15 }
0x72f7   : > { %v9972_v35 = vpop.f32.mrb[130].mxu1 }
0x72f8   : > { %v9973_v61 = vadd.f32 %v18832_v12, %v9972_v35  ;;  %v16802_v62 = vpop.f32.mrb[131].mxu1 }
0x72fa   : > { %v9976_v19 = vmul.f32 %v9973_v61, %v18931_v43 }
0x72fc   : > { %v20013_v39 = vadd.f32 %v9976_v19, %v9752_v50 }
0x72fe   : > { %16808 = vmatmul.mubr.msk.f32.vlgmr.msra.gmra.mrb[132].mxu0 %vm78_vm0, %v20013_v39 }
0x72ff   : > { %18054 = vmatpush3.bf16.msra.mxu0 %v18881_v23  ;;  %16829 = vmatprep.mubr.msk.f32.mxu0 %vm18704_vm1, %v18705_v16 }
0x7300   : > { %18055 = vmatprep.subr.bf16.mxu0 %v18703_v15 }
0x7303   : > { %18057 = vmatpush3.bf16.msra.mxu0 %v18886_v24 }
0x7304   : > { %18061 = vmatprep.subr.bf16.mxu0 %v18703_v15 }
0x73d1   : > { %v10047_v20 = vpop.f32.mrb[132].mxu0 }
0x73d2   : > { %v10048_v21 = vadd.f32 %v18782_v2, %v10047_v20  ;;  %v16809_v22 = vpop.f32.mrb[133].mxu0 }
0x73d4   : > { %18543 = vtanh.f32 %v10048_v21 }
0x73de   : > { %v18544_v25 = vpop.eup %18543 }
0x73df   : > { %16819 = vmatmul.mubr.msk.f32.vlgmr.msra.gmra.mrb[132].mxu1 %vm166_vm2, %v18544_v25 }
0x73e0   : > { %18060 = vmatpush3.bf16.msra.mxu1 %v18847_v14  ;;  %16836 = vmatprep.mubr.msk.f32.mxu1 %vm18704_vm1, %v18705_v16 }
0x73e1   : > { %18067 = vmatprep.subr.bf16.mxu1 %v18703_v15 }
0x74b2   : > { %v10121_v26 = vpop.f32.mrb[132].mxu1 }
0x74b3   : > { %v10122_v27 = vadd.f32 %v18807_v7, %v10121_v26  ;;  %v16820_v28 = vpop.f32.mrb[133].mxu1 }
0x74b5   : > { %18545 = vtanh.f32 %v10122_v27 }
0x74bf   : > { %v18546_v29 = vpop.eup %18545 }
0x74c0   : > { %16830 = vmatmul.mubr.msk.f32.vlgmr.msra.gmra.mrb[134].mxu0 %vm166_vm2, %v18546_v29 }
0x74c1   : > { %18063 = vmatpush3.bf16.msra.mxu0 %v18863_v17  ;;  %16847 = vmatprep.mubr.msk.f32.mxu0 %vm18704_vm1, %v18705_v16 }
0x74c2   : > { %18064 = vmatprep.subr.bf16.mxu0 %v18703_v15 }
0x74c5   : > { %18066 = vmatpush3.bf16.msra.mxu0 %v18868_v18 }
0x74c6   : > { %18073 = vmatprep.subr.bf16.mxu0 %v18703_v15 }
0x7593   : > { %v10195_v31 = vpop.f32.mrb[134].mxu0 }
0x7594   : > { %v10196_v32 = vadd.f32 %v18832_v12, %v10195_v31  ;;  %v16831_v33 = vpop.f32.mrb[135].mxu0 }
0x7596   : > { %v10201_v34 = vmul.f32 %v10196_v32, %v18904_v30  ;;  %v10199_v45 = vmul.f32 %v10196_v32, %v18931_v43 }
0x7598   : > { %v10202_v36 = vadd.f32 %v10201_v34, %v20013_v39  ;;  %v10200_v50 = vadd.f32 %v10199_v45, %v20013_v39 }
0x759a   : > { %16837 = vmatmul.mubr.msk.f32.vlgmr.msra.gmra.mrb[134].mxu1 %vm78_vm0, %v10202_v36 }
0x759b   : > { %18069 = vmatpush3.bf16.msra.mxu1 %v18881_v23  ;;  %16858 = vmatprep.mubr.msk.f32.mxu1 %vm18704_vm1, %v18705_v16 }
0x759c   : > { %18070 = vmatprep.subr.bf16.mxu1 %v18703_v15 }
0x759f   : > { %18072 = vmatpush3.bf16.msra.mxu1 %v18886_v24 }
0x75a0   : > { %18076 = vmatprep.subr.bf16.mxu1 %v18703_v15 }
0x766d   : > { %v10272_v55 = vpop.f32.mrb[134].mxu1 }
0x766e   : > { %v10273_v37 = vadd.f32 %v18782_v2, %v10272_v55  ;;  %v16838_v38 = vpop.f32.mrb[135].mxu1 }
0x7670   : > { %18547 = vtanh.f32 %v10273_v37 }
0x767a   : > { %v18548_v40 = vpop.eup %18547 }
0x767b   : > { %16848 = vmatmul.mubr.msk.f32.vlgmr.msra.gmra.mrb[136].mxu0 %vm166_vm2, %v18548_v40 }
0x767c   : > { %18075 = vmatpush3.bf16.msra.mxu0 %v18847_v14  ;;  %16865 = vmatprep.mubr.msk.f32.mxu0 %vm18704_vm1, %v18705_v16 }
0x767d   : > { %18082 = vmatprep.subr.bf16.mxu0 %v18703_v15 }
0x774e   : > { %v10346_v59 = vpop.f32.mrb[136].mxu0 }
0x774f   : > { %v10347_v41 = vadd.f32 %v18807_v7, %v10346_v59  ;;  %v16849_v42 = vpop.f32.mrb[137].mxu0 }
0x7751   : > { %18549 = vtanh.f32 %v10347_v41 }
0x775b   : > { %v18550_v44 = vpop.eup %18549 }
0x775c   : > { %16859 = vmatmul.mubr.msk.f32.vlgmr.msra.gmra.mrb[136].mxu1 %vm166_vm2, %v18550_v44 }
0x775d   : > { %18078 = vmatpush3.bf16.msra.mxu1 %v18863_v17  ;;  %16876 = vmatprep.mubr.msk.f32.mxu1 %vm18704_vm1, %v18705_v16 }
0x775e   : > { %18079 = vmatprep.subr.bf16.mxu1 %v18703_v15 }
0x7761   : > { %18081 = vmatpush3.bf16.msra.mxu1 %v18868_v18 }
0x7762   : > { %18088 = vmatprep.subr.bf16.mxu1 %v18703_v15 }
0x782f   : > { %v10420_v47 = vpop.f32.mrb[136].mxu1 }
0x7830   : > { %v10421_v48 = vadd.f32 %v18832_v12, %v10420_v47  ;;  %v16860_v49 = vpop.f32.mrb[137].mxu1 }
0x7832   : > { %v10424_v51 = vmul.f32 %v10421_v48, %v18935_v46  ;;  %v10426_v52 = vmul.f32 %v10421_v48, %v18904_v30 }
0x7834   : > { %v10425_v53 = vadd.f32 %v10424_v51, %v10200_v50  ;;  %v10427_v54 = vadd.f32 %v10426_v52, %v20013_v39 }
0x7836   : > { %16866 = vmatmul.mubr.msk.f32.vlgmr.msra.gmra.mrb[138].mxu0 %vm78_vm0, %v10427_v54 }
0x7837   : > { %18084 = vmatpush3.bf16.msra.mxu0 %v18881_v23  ;;  %16887 = vmatprep.mubr.msk.f32.mxu0 %vm18704_vm1, %v18705_v16 }
0x7838   : > { %18085 = vmatprep.subr.bf16.mxu0 %v18703_v15 }
0x783b   : > { %18087 = vmatpush3.bf16.msra.mxu0 %v18886_v24 }
0x783c   : > { %18091 = vmatprep.subr.bf16.mxu0 %v18703_v15 }
0x7909   : > { %v10497_v56 = vpop.f32.mrb[138].mxu0 }
0x790a   : > { %v10498_v13 = vadd.f32 %v18782_v2, %v10497_v56  ;;  %v16867_v57 = vpop.f32.mrb[139].mxu0 }
0x790c   : > { %18551 = vtanh.f32 %v10498_v13 }
0x7916   : > { %v18552_v58 = vpop.eup %18551 }
0x7917   : > { %16877 = vmatmul.mubr.msk.f32.vlgmr.msra.gmra.mrb[138].mxu1 %vm166_vm2, %v18552_v58 }
0x7918   : > { %18090 = vmatpush3.bf16.msra.mxu1 %v18847_v14  ;;  %16894 = vmatprep.mubr.msk.f32.mxu1 %vm18704_vm1, %v18705_v16 }
0x7919   : > { %18097 = vmatprep.subr.bf16.mxu1 %v18703_v15 }
0x79ea   : > { %v10571_v60 = vpop.f32.mrb[138].mxu1 }
0x79eb   : > { %v10572_v35 = vadd.f32 %v18807_v7, %v10571_v60  ;;  %v16878_v61 = vpop.f32.mrb[139].mxu1 }
0x79ed   : > { %18553 = vtanh.f32 %v10572_v35 }
0x79f7   : > { %v18554_v62 = vpop.eup %18553 }
0x79f8   : > { %16888 = vmatmul.mubr.msk.f32.vlgmr.msra.gmra.mrb[140].mxu0 %vm166_vm2, %v18554_v62 }
0x79f9   : > { %18093 = vmatpush3.bf16.msra.mxu0 %v18863_v17  ;;  %16905 = vmatprep.mubr.msk.f32.mxu0 %vm18704_vm1, %v18705_v16 }
0x79fa   : > { %18094 = vmatprep.subr.bf16.mxu0 %v18703_v15 }
0x79fd   : > { %18096 = vmatpush3.bf16.msra.mxu0 %v18868_v18 }
0x79fe   : > { %18103 = vmatprep.subr.bf16.mxu0 %v18703_v15 }
0x7acb   : > { %v10645_v19 = vpop.f32.mrb[140].mxu0 }
0x7acc   : > { %v10646_v20 = vadd.f32 %v18832_v12, %v10645_v19  ;;  %v16889_v21 = vpop.f32.mrb[141].mxu0 }
0x7ace   : > { %v10649_v22 = vmul.f32 %v10646_v20, %v18935_v46  ;;  %v10651_v25 = vmul.f32 %v10646_v20, %v18964_v63 }
0x7ad0   : > { %v10650_v26 = vadd.f32 %v10649_v22, %v10425_v53  ;;  %v10652_v27 = vadd.f32 %v10651_v25, %v20013_v39 }
0x7ad2   : > { %16895 = vmatmul.mubr.msk.f32.vlgmr.msra.gmra.mrb[140].mxu1 %vm78_vm0, %v10652_v27 }
0x7ad3   : > { %18099 = vmatpush3.bf16.msra.mxu1 %v18881_v23  ;;  %16916 = vmatprep.mubr.msk.f32.mxu1 %vm18704_vm1, %v18705_v16 }
0x7ad4   : > { %18100 = vmatprep.subr.bf16.mxu1 %v18703_v15 }
0x7ad7   : > { %18102 = vmatpush3.bf16.msra.mxu1 %v18886_v24 }
0x7ad8   : > { %18106 = vmatprep.subr.bf16.mxu1 %v18703_v15 }
0x7ba5   : > { %v10722_v28 = vpop.f32.mrb[140].mxu1 }
0x7ba6   : > { %v10723_v29 = vadd.f32 %v18782_v2, %v10722_v28  ;;  %v16896_v31 = vpop.f32.mrb[141].mxu1 }
0x7ba8   : > { %18555 = vtanh.f32 %v10723_v29 }
0x7bb2   : > { %v18556_v32 = vpop.eup %18555 }
0x7bb3   : > { %16906 = vmatmul.mubr.msk.f32.vlgmr.msra.gmra.mrb[142].mxu0 %vm166_vm2, %v18556_v32 }
0x7bb4   : > { %18105 = vmatpush3.bf16.msra.mxu0 %v18847_v14  ;;  %16923 = vmatprep.mubr.msk.f32.mxu0 %vm18704_vm1, %v18705_v16 }
0x7bb5   : > { %18112 = vmatprep.subr.bf16.mxu0 %v18703_v15 }
0x7c86   : > { %v10796_v39 = vpop.f32.mrb[142].mxu0 }
0x7c87   : > { %v10797_v33 = vadd.f32 %v18807_v7, %v10796_v39  ;;  %v16907_v34 = vpop.f32.mrb[143].mxu0 }
0x7c89   : > { %18557 = vtanh.f32 %v10797_v33 }
0x7c93   : > { %v18558_v36 = vpop.eup %18557 }
0x7c94   : > { %16917 = vmatmul.mubr.msk.f32.vlgmr.msra.gmra.mrb[142].mxu1 %vm166_vm2, %v18558_v36 }
0x7c95   : > { %18108 = vmatpush3.bf16.msra.mxu1 %v18863_v17  ;;  %16934 = vmatprep.mubr.msk.f32.mxu1 %vm18704_vm1, %v18705_v16 }
0x7c96   : > { %18109 = vmatprep.subr.bf16.mxu1 %v18703_v15 }
0x7c99   : > { %18111 = vmatpush3.bf16.msra.mxu1 %v18868_v18 }
0x7c9a   : > { %18118 = vmatprep.subr.bf16.mxu1 %v18703_v15 }
0x7d67   : > { %v10870_v55 = vpop.f32.mrb[142].mxu1 }
0x7d68   : > { %v10871_v37 = vadd.f32 %v18832_v12, %v10870_v55  ;;  %v16918_v38 = vpop.f32.mrb[143].mxu1 }
0x7d6a   : > { %v10874_v40 = vmul.f32 %v10871_v37, %v18931_v43 }
0x7d6c   : > { %v20115_v59 = vadd.f32 %v10874_v40, %v10650_v26 }
0x7d6e   : > { %16924 = vmatmul.mubr.msk.f32.vlgmr.msra.gmra.mrb[144].mxu0 %vm78_vm0, %v20115_v59 }
0x7d6f   : > { %18114 = vmatpush3.bf16.msra.mxu0 %v18881_v23  ;;  %16945 = vmatprep.mubr.msk.f32.mxu0 %vm18704_vm1, %v18705_v16 }
0x7d70   : > { %18115 = vmatprep.subr.bf16.mxu0 %v18703_v15 }
0x7d73   : > { %18117 = vmatpush3.bf16.msra.mxu0 %v18886_v24 }
0x7d74   : > { %18121 = vmatprep.subr.bf16.mxu0 %v18703_v15 }
0x7e41   : > { %v10945_v41 = vpop.f32.mrb[144].mxu0 }
0x7e42   : > { %v10946_v42 = vadd.f32 %v18782_v2, %v10945_v41  ;;  %v16925_v44 = vpop.f32.mrb[145].mxu0 }
0x7e44   : > { %18559 = vtanh.f32 %v10946_v42 }
0x7e4e   : > { %v18560_v45 = vpop.eup %18559 }
0x7e4f   : > { %16935 = vmatmul.mubr.msk.f32.vlgmr.msra.gmra.mrb[144].mxu1 %vm166_vm2, %v18560_v45 }
0x7e50   : > { %18120 = vmatpush3.bf16.msra.mxu1 %v18847_v14  ;;  %16952 = vmatprep.mubr.msk.f32.mxu1 %vm18704_vm1, %v18705_v16 }
0x7e51   : > { %18127 = vmatprep.subr.bf16.mxu1 %v18703_v15 }
0x7f22   : > { %v11019_v47 = vpop.f32.mrb[144].mxu1 }
0x7f23   : > { %v11020_v48 = vadd.f32 %v18807_v7, %v11019_v47  ;;  %v16936_v49 = vpop.f32.mrb[145].mxu1 }
0x7f25   : > { %18561 = vtanh.f32 %v11020_v48 }
0x7f2f   : > { %v18562_v50 = vpop.eup %18561 }
0x7f30   : > { %16946 = vmatmul.mubr.msk.f32.vlgmr.msra.gmra.mrb[146].mxu0 %vm166_vm2, %v18562_v50 }
0x7f31   : > { %18123 = vmatpush3.bf16.msra.mxu0 %v18863_v17  ;;  %16963 = vmatprep.mubr.msk.f32.mxu0 %vm18704_vm1, %v18705_v16 }
0x7f32   : > { %18124 = vmatprep.subr.bf16.mxu0 %v18703_v15 }
0x7f35   : > { %18126 = vmatpush3.bf16.msra.mxu0 %v18868_v18 }
0x7f36   : > { %18133 = vmatprep.subr.bf16.mxu0 %v18703_v15 }
0x8003   : > { %v11093_v51 = vpop.f32.mrb[146].mxu0 }
0x8004   : > { %v11094_v52 = vadd.f32 %v18832_v12, %v11093_v51  ;;  %v16947_v53 = vpop.f32.mrb[147].mxu0 }
0x8006   : > { %v11099_v54 = vmul.f32 %v11094_v52, %v18904_v30  ;;  %v11097_v20 = vmul.f32 %v11094_v52, %v18931_v43 }
0x8008   : > { %v11100_v56 = vadd.f32 %v11099_v54, %v20115_v59  ;;  %v11098_v26 = vadd.f32 %v11097_v20, %v20115_v59 }
0x800a   : > { %16953 = vmatmul.mubr.msk.f32.vlgmr.msra.gmra.mrb[146].mxu1 %vm78_vm0, %v11100_v56 }
0x800b   : > { %18129 = vmatpush3.bf16.msra.mxu1 %v18881_v23  ;;  %16974 = vmatprep.mubr.msk.f32.mxu1 %vm18704_vm1, %v18705_v16 }
0x800c   : > { %18130 = vmatprep.subr.bf16.mxu1 %v18703_v15 }
0x800f   : > { %18132 = vmatpush3.bf16.msra.mxu1 %v18886_v24 }
0x8010   : > { %18136 = vmatprep.subr.bf16.mxu1 %v18703_v15 }
0x80dd   : > { %v11170_v13 = vpop.f32.mrb[146].mxu1 }
0x80de   : > { %v11171_v57 = vadd.f32 %v18782_v2, %v11170_v13  ;;  %v16954_v58 = vpop.f32.mrb[147].mxu1 }
0x80e0   : > { %18563 = vtanh.f32 %v11171_v57 }
0x80ea   : > { %v18564_v60 = vpop.eup %18563 }
0x80eb   : > { %16964 = vmatmul.mubr.msk.f32.vlgmr.msra.gmra.mrb[148].mxu0 %vm166_vm2, %v18564_v60 }
0x80ec   : > { %18135 = vmatpush3.bf16.msra.mxu0 %v18847_v14  ;;  %16981 = vmatprep.mubr.msk.f32.mxu0 %vm18704_vm1, %v18705_v16 }
0x80ed   : > { %18142 = vmatprep.subr.bf16.mxu0 %v18703_v15 }
0x81be   : > { %v11244_v35 = vpop.f32.mrb[148].mxu0 }
0x81bf   : > { %v11245_v61 = vadd.f32 %v18807_v7, %v11244_v35  ;;  %v16965_v62 = vpop.f32.mrb[149].mxu0 }
0x81c1   : > { %18565 = vtanh.f32 %v11245_v61 }
0x81cb   : > { %v18566_v19 = vpop.eup %18565 }
0x81cc   : > { %16975 = vmatmul.mubr.msk.f32.vlgmr.msra.gmra.mrb[148].mxu1 %vm166_vm2, %v18566_v19 }
0x81cd   : > { %18138 = vmatpush3.bf16.msra.mxu1 %v18863_v17  ;;  %16992 = vmatprep.mubr.msk.f32.mxu1 %vm18704_vm1, %v18705_v16 }
0x81ce   : > { %18139 = vmatprep.subr.bf16.mxu1 %v18703_v15 }
0x81d1   : > { %18141 = vmatpush3.bf16.msra.mxu1 %v18868_v18 }
0x81d2   : > { %18148 = vmatprep.subr.bf16.mxu1 %v18703_v15 }
0x829f   : > { %v11318_v21 = vpop.f32.mrb[148].mxu1 }
0x82a0   : > { %v11319_v22 = vadd.f32 %v18832_v12, %v11318_v21  ;;  %v16976_v25 = vpop.f32.mrb[149].mxu1 }
0x82a2   : > { %v11322_v27 = vmul.f32 %v11319_v22, %v18935_v46  ;;  %v11324_v28 = vmul.f32 %v11319_v22, %v18904_v30 }
0x82a4   : > { %v11323_v29 = vadd.f32 %v11322_v27, %v11098_v26  ;;  %v11325_v31 = vadd.f32 %v11324_v28, %v20115_v59 }
0x82a6   : > { %16982 = vmatmul.mubr.msk.f32.vlgmr.msra.gmra.mrb[150].mxu0 %vm78_vm0, %v11325_v31 }
0x82a7   : > { %18144 = vmatpush3.bf16.msra.mxu0 %v18881_v23  ;;  %17003 = vmatprep.mubr.msk.f32.mxu0 %vm18704_vm1, %v18705_v16 }
0x82a8   : > { %18145 = vmatprep.subr.bf16.mxu0 %v18703_v15 }
0x82ab   : > { %18147 = vmatpush3.bf16.msra.mxu0 %v18886_v24 }
0x82ac   : > { %18151 = vmatprep.subr.bf16.mxu0 %v18703_v15 }
0x8379   : > { %v11395_v32 = vpop.f32.mrb[150].mxu0 }
0x837a   : > { %v11396_v39 = vadd.f32 %v18782_v2, %v11395_v32  ;;  %v16983_v33 = vpop.f32.mrb[151].mxu0 }
0x837c   : > { %18567 = vtanh.f32 %v11396_v39 }
0x8386   : > { %v18568_v34 = vpop.eup %18567 }
0x8387   : > { %16993 = vmatmul.mubr.msk.f32.vlgmr.msra.gmra.mrb[150].mxu1 %vm166_vm2, %v18568_v34 }
0x8388   : > { %18150 = vmatpush3.bf16.msra.mxu1 %v18847_v14  ;;  %17010 = vmatprep.mubr.msk.f32.mxu1 %vm18704_vm1, %v18705_v16 }
0x8389   : > { %18157 = vmatprep.subr.bf16.mxu1 %v18703_v15 }
0x845a   : > { %v11469_v36 = vpop.f32.mrb[150].mxu1 }
0x845b   : > { %v11470_v55 = vadd.f32 %v18807_v7, %v11469_v36  ;;  %v16994_v37 = vpop.f32.mrb[151].mxu1 }
0x845d   : > { %18569 = vtanh.f32 %v11470_v55 }
0x8467   : > { %v18570_v38 = vpop.eup %18569 }
0x8468   : > { %17004 = vmatmul.mubr.msk.f32.vlgmr.msra.gmra.mrb[152].mxu0 %vm166_vm2, %v18570_v38 }
0x8469   : > { %18153 = vmatpush3.bf16.msra.mxu0 %v18863_v17  ;;  %17021 = vmatprep.mubr.msk.f32.mxu0 %vm18704_vm1, %v18705_v16 }
0x846a   : > { %18154 = vmatprep.subr.bf16.mxu0 %v18703_v15 }
0x846d   : > { %18156 = vmatpush3.bf16.msra.mxu0 %v18868_v18 }
0x846e   : > { %18163 = vmatprep.subr.bf16.mxu0 %v18703_v15 }
0x853b   : > { %v11543_v40 = vpop.f32.mrb[152].mxu0 }
0x853c   : > { %v11544_v41 = vadd.f32 %v18832_v12, %v11543_v40  ;;  %v17005_v42 = vpop.f32.mrb[153].mxu0 }
0x853e   : > { %v11547_v44 = vmul.f32 %v11544_v41, %v18935_v46  ;;  %v11549_v45 = vmul.f32 %v11544_v41, %v18964_v63 }
0x8540   : > { %v11548_v47 = vadd.f32 %v11547_v44, %v11323_v29  ;;  %v11550_v48 = vadd.f32 %v11549_v45, %v20115_v59 }
0x8542   : > { %17011 = vmatmul.mubr.msk.f32.vlgmr.msra.gmra.mrb[152].mxu1 %vm78_vm0, %v11550_v48 }
0x8543   : > { %18159 = vmatpush3.bf16.msra.mxu1 %v18881_v23  ;;  %17032 = vmatprep.mubr.msk.f32.mxu1 %vm18704_vm1, %v18705_v16 }
0x8544   : > { %18160 = vmatprep.subr.bf16.mxu1 %v18703_v15 }
0x8547   : > { %18162 = vmatpush3.bf16.msra.mxu1 %v18886_v24 }
0x8548   : > { %18166 = vmatprep.subr.bf16.mxu1 %v18703_v15 }
0x8615   : > { %v11620_v49 = vpop.f32.mrb[152].mxu1 }
0x8616   : > { %v11621_v50 = vadd.f32 %v18782_v2, %v11620_v49  ;;  %v17012_v51 = vpop.f32.mrb[153].mxu1 }
0x8618   : > { %18571 = vtanh.f32 %v11621_v50 }
0x8622   : > { %v18572_v52 = vpop.eup %18571 }
0x8623   : > { %17022 = vmatmul.mubr.msk.f32.vlgmr.msra.gmra.mrb[154].mxu0 %vm166_vm2, %v18572_v52 }
0x8624   : > { %18165 = vmatpush3.bf16.msra.mxu0 %v18847_v14  ;;  %17039 = vmatprep.mubr.msk.f32.mxu0 %vm18704_vm1, %v18705_v16 }
0x8625   : > { %18172 = vmatprep.subr.bf16.mxu0 %v18703_v15 }
0x86f6   : > { %v11694_v59 = vpop.f32.mrb[154].mxu0 }
0x86f7   : > { %v11695_v53 = vadd.f32 %v18807_v7, %v11694_v59  ;;  %v17023_v54 = vpop.f32.mrb[155].mxu0 }
0x86f9   : > { %18573 = vtanh.f32 %v11695_v53 }
0x8703   : > { %v18574_v56 = vpop.eup %18573 }
0x8704   : > { %17033 = vmatmul.mubr.msk.f32.vlgmr.msra.gmra.mrb[154].mxu1 %vm166_vm2, %v18574_v56 }
0x8705   : > { %18168 = vmatpush3.bf16.msra.mxu1 %v18863_v17  ;;  %17050 = vmatprep.mubr.msk.f32.mxu1 %vm18704_vm1, %v18705_v16 }
0x8706   : > { %18169 = vmatprep.subr.bf16.mxu1 %v18703_v15 }
0x8709   : > { %18171 = vmatpush3.bf16.msra.mxu1 %v18868_v18 }
0x870a   : > { %18178 = vmatprep.subr.bf16.mxu1 %v18703_v15 }
0x87d7   : > { %v11768_v13 = vpop.f32.mrb[154].mxu1 }
0x87d8   : > { %v11769_v57 = vadd.f32 %v18832_v12, %v11768_v13  ;;  %v17034_v58 = vpop.f32.mrb[155].mxu1 }
0x87da   : > { %v11772_v60 = vmul.f32 %v11769_v57, %v18931_v43 }
0x87dc   : > { %v20217_v35 = vadd.f32 %v11772_v60, %v11548_v47 }
0x87de   : > { %17040 = vmatmul.mubr.msk.f32.vlgmr.msra.gmra.mrb[156].mxu0 %vm78_vm0, %v20217_v35 }
0x87df   : > { %18174 = vmatpush3.bf16.msra.mxu0 %v18881_v23  ;;  %17061 = vmatprep.mubr.msk.f32.mxu0 %vm18704_vm1, %v18705_v16 }
0x87e0   : > { %18175 = vmatprep.subr.bf16.mxu0 %v18703_v15 }
0x87e3   : > { %18177 = vmatpush3.bf16.msra.mxu0 %v18886_v24 }
0x87e4   : > { %18181 = vmatprep.subr.bf16.mxu0 %v18703_v15 }
0x88b1   : > { %v11843_v61 = vpop.f32.mrb[156].mxu0 }
0x88b2   : > { %v11844_v62 = vadd.f32 %v18782_v2, %v11843_v61  ;;  %v17041_v19 = vpop.f32.mrb[157].mxu0 }
0x88b4   : > { %18575 = vtanh.f32 %v11844_v62 }
0x88be   : > { %v18576_v20 = vpop.eup %18575 }
0x88bf   : > { %17051 = vmatmul.mubr.msk.f32.vlgmr.msra.gmra.mrb[156].mxu1 %vm166_vm2, %v18576_v20 }
0x88c0   : > { %18180 = vmatpush3.bf16.msra.mxu1 %v18847_v14  ;;  %17068 = vmatprep.mubr.msk.f32.mxu1 %vm18704_vm1, %v18705_v16 }
0x88c1   : > { %18187 = vmatprep.subr.bf16.mxu1 %v18703_v15 }
0x8992   : > { %v11917_v21 = vpop.f32.mrb[156].mxu1 }
0x8993   : > { %v11918_v22 = vadd.f32 %v18807_v7, %v11917_v21  ;;  %v17052_v25 = vpop.f32.mrb[157].mxu1 }
0x8995   : > { %18577 = vtanh.f32 %v11918_v22 }
0x899f   : > { %v18578_v26 = vpop.eup %18577 }
0x89a0   : > { %17062 = vmatmul.mubr.msk.f32.vlgmr.msra.gmra.mrb[158].mxu0 %vm166_vm2, %v18578_v26 }
0x89a1   : > { %18183 = vmatpush3.bf16.msra.mxu0 %v18863_v17  ;;  %17079 = vmatprep.mubr.msk.f32.mxu0 %vm18704_vm1, %v18705_v16 }
0x89a2   : > { %18184 = vmatprep.subr.bf16.mxu0 %v18703_v15 }
0x89a5   : > { %18186 = vmatpush3.bf16.msra.mxu0 %v18868_v18 }
0x89a6   : > { %18193 = vmatprep.subr.bf16.mxu0 %v18703_v15 }
0x8a73   : > { %v11991_v27 = vpop.f32.mrb[158].mxu0 }
0x8a74   : > { %v11992_v28 = vadd.f32 %v18832_v12, %v11991_v27  ;;  %v17063_v29 = vpop.f32.mrb[159].mxu0 }
0x8a76   : > { %v11997_v31 = vmul.f32 %v11992_v28, %v18904_v30  ;;  %v11995_v41 = vmul.f32 %v11992_v28, %v18931_v43 }
0x8a78   : > { %v11998_v32 = vadd.f32 %v11997_v31, %v20217_v35  ;;  %v11996_v47 = vadd.f32 %v11995_v41, %v20217_v35 }
0x8a7a   : > { %17069 = vmatmul.mubr.msk.f32.vlgmr.msra.gmra.mrb[158].mxu1 %vm78_vm0, %v11998_v32 }
0x8a7b   : > { %18189 = vmatpush3.bf16.msra.mxu1 %v18881_v23  ;;  %17090 = vmatprep.mubr.msk.f32.mxu1 %vm18704_vm1, %v18705_v16 }
0x8a7c   : > { %18190 = vmatprep.subr.bf16.mxu1 %v18703_v15 }
0x8a7f   : > { %18192 = vmatpush3.bf16.msra.mxu1 %v18886_v24 }
0x8a80   : > { %18196 = vmatprep.subr.bf16.mxu1 %v18703_v15 }
0x8b4d   : > { %v12068_v39 = vpop.f32.mrb[158].mxu1 }
0x8b4e   : > { %v12069_v33 = vadd.f32 %v18782_v2, %v12068_v39  ;;  %v17070_v34 = vpop.f32.mrb[159].mxu1 }
0x8b50   : > { %18579 = vtanh.f32 %v12069_v33 }
0x8b5a   : > { %v18580_v36 = vpop.eup %18579 }
0x8b5b   : > { %17080 = vmatmul.mubr.msk.f32.vlgmr.msra.gmra.mrb[160].mxu0 %vm166_vm2, %v18580_v36 }
0x8b5c   : > { %18195 = vmatpush3.bf16.msra.mxu0 %v18847_v14  ;;  %17097 = vmatprep.mubr.msk.f32.mxu0 %vm18704_vm1, %v18705_v16 }
0x8b5d   : > { %18202 = vmatprep.subr.bf16.mxu0 %v18703_v15 }
0x8c2e   : > { %v12142_v55 = vpop.f32.mrb[160].mxu0 }
0x8c2f   : > { %v12143_v37 = vadd.f32 %v18807_v7, %v12142_v55  ;;  %v17081_v38 = vpop.f32.mrb[161].mxu0 }
0x8c31   : > { %18581 = vtanh.f32 %v12143_v37 }
0x8c3b   : > { %v18582_v40 = vpop.eup %18581 }
0x8c3c   : > { %17091 = vmatmul.mubr.msk.f32.vlgmr.msra.gmra.mrb[160].mxu1 %vm166_vm2, %v18582_v40 }
0x8c3d   : > { %18198 = vmatpush3.bf16.msra.mxu1 %v18863_v17  ;;  %17108 = vmatprep.mubr.msk.f32.mxu1 %vm18704_vm1, %v18705_v16 }
0x8c3e   : > { %18199 = vmatprep.subr.bf16.mxu1 %v18703_v15 }
0x8c41   : > { %18201 = vmatpush3.bf16.msra.mxu1 %v18868_v18 }
0x8c42   : > { %18208 = vmatprep.subr.bf16.mxu1 %v18703_v15 }
0x8d0f   : > { %v12216_v42 = vpop.f32.mrb[160].mxu1 }
0x8d10   : > { %v12217_v44 = vadd.f32 %v18832_v12, %v12216_v42  ;;  %v17092_v45 = vpop.f32.mrb[161].mxu1 }
0x8d12   : > { %v12220_v48 = vmul.f32 %v12217_v44, %v18935_v46  ;;  %v12222_v49 = vmul.f32 %v12217_v44, %v18904_v30 }
0x8d14   : > { %v12221_v50 = vadd.f32 %v12220_v48, %v11996_v47  ;;  %v12223_v51 = vadd.f32 %v12222_v49, %v20217_v35 }
0x8d16   : > { %17098 = vmatmul.mubr.msk.f32.vlgmr.msra.gmra.mrb[162].mxu0 %vm78_vm0, %v12223_v51 }
0x8d17   : > { %18204 = vmatpush3.bf16.msra.mxu0 %v18881_v23  ;;  %17119 = vmatprep.mubr.msk.f32.mxu0 %vm18704_vm1, %v18705_v16 }
0x8d18   : > { %18205 = vmatprep.subr.bf16.mxu0 %v18703_v15 }
0x8d1b   : > { %18207 = vmatpush3.bf16.msra.mxu0 %v18886_v24 }
0x8d1c   : > { %18211 = vmatprep.subr.bf16.mxu0 %v18703_v15 }
0x8de9   : > { %v12293_v52 = vpop.f32.mrb[162].mxu0 }
0x8dea   : > { %v12294_v59 = vadd.f32 %v18782_v2, %v12293_v52  ;;  %v17099_v53 = vpop.f32.mrb[163].mxu0 }
0x8dec   : > { %18583 = vtanh.f32 %v12294_v59 }
0x8df6   : > { %v18584_v54 = vpop.eup %18583 }
0x8df7   : > { %17109 = vmatmul.mubr.msk.f32.vlgmr.msra.gmra.mrb[162].mxu1 %vm166_vm2, %v18584_v54 }
0x8df8   : > { %18210 = vmatpush3.bf16.msra.mxu1 %v18847_v14  ;;  %17126 = vmatprep.mubr.msk.f32.mxu1 %vm18704_vm1, %v18705_v16 }
0x8df9   : > { %18217 = vmatprep.subr.bf16.mxu1 %v18703_v15 }
0x8eca   : > { %v12367_v56 = vpop.f32.mrb[162].mxu1 }
0x8ecb   : > { %v12368_v13 = vadd.f32 %v18807_v7, %v12367_v56  ;;  %v17110_v57 = vpop.f32.mrb[163].mxu1 }
0x8ecd   : > { %18585 = vtanh.f32 %v12368_v13 }
0x8ed7   : > { %v18586_v58 = vpop.eup %18585 }
0x8ed8   : > { %17120 = vmatmul.mubr.msk.f32.vlgmr.msra.gmra.mrb[164].mxu0 %vm166_vm2, %v18586_v58 }
0x8ed9   : > { %18213 = vmatpush3.bf16.msra.mxu0 %v18863_v17  ;;  %17137 = vmatprep.mubr.msk.f32.mxu0 %vm18704_vm1, %v18705_v16 }
0x8eda   : > { %18214 = vmatprep.subr.bf16.mxu0 %v18703_v15 }
0x8edd   : > { %18216 = vmatpush3.bf16.msra.mxu0 %v18868_v18 }
0x8ede   : > { %18223 = vmatprep.subr.bf16.mxu0 %v18703_v15 }
0x8fab   : > { %v12441_v60 = vpop.f32.mrb[164].mxu0 }
0x8fac   : > { %v12442_v61 = vadd.f32 %v18832_v12, %v12441_v60  ;;  %v17121_v62 = vpop.f32.mrb[165].mxu0 }
0x8fae   : > { %v12445_v19 = vmul.f32 %v12442_v61, %v18935_v46  ;;  %v12447_v20 = vmul.f32 %v12442_v61, %v18964_v63 }
0x8fb0   : > { %v12446_v21 = vadd.f32 %v12445_v19, %v12221_v50  ;;  %v12448_v22 = vadd.f32 %v12447_v20, %v20217_v35 }
0x8fb2   : > { %17127 = vmatmul.mubr.msk.f32.vlgmr.msra.gmra.mrb[164].mxu1 %vm78_vm0, %v12448_v22 }
0x8fb3   : > { %18219 = vmatpush3.bf16.msra.mxu1 %v18881_v23  ;;  %17148 = vmatprep.mubr.msk.f32.mxu1 %vm18704_vm1, %v18705_v16 }
0x8fb4   : > { %18220 = vmatprep.subr.bf16.mxu1 %v18703_v15 }
0x8fb7   : > { %18222 = vmatpush3.bf16.msra.mxu1 %v18886_v24 }
0x8fb8   : > { %18226 = vmatprep.subr.bf16.mxu1 %v18703_v15 }
0x9085   : > { %v12518_v25 = vpop.f32.mrb[164].mxu1 }
0x9086   : > { %v12519_v26 = vadd.f32 %v18782_v2, %v12518_v25  ;;  %v17128_v27 = vpop.f32.mrb[165].mxu1 }
0x9088   : > { %18587 = vtanh.f32 %v12519_v26 }
0x9092   : > { %v18588_v28 = vpop.eup %18587 }
0x9093   : > { %17138 = vmatmul.mubr.msk.f32.vlgmr.msra.gmra.mrb[166].mxu0 %vm166_vm2, %v18588_v28 }
0x9094   : > { %18225 = vmatpush3.bf16.msra.mxu0 %v18847_v14  ;;  %17155 = vmatprep.mubr.msk.f32.mxu0 %vm18704_vm1, %v18705_v16 }
0x9095   : > { %18232 = vmatprep.subr.bf16.mxu0 %v18703_v15 }
0x9166   : > { %v12592_v35 = vpop.f32.mrb[166].mxu0 }
0x9167   : > { %v12593_v29 = vadd.f32 %v18807_v7, %v12592_v35  ;;  %v17139_v31 = vpop.f32.mrb[167].mxu0 }
0x9169   : > { %18589 = vtanh.f32 %v12593_v29 }
0x9173   : > { %v18590_v32 = vpop.eup %18589 }
0x9174   : > { %17149 = vmatmul.mubr.msk.f32.vlgmr.msra.gmra.mrb[166].mxu1 %vm166_vm2, %v18590_v32 }
0x9175   : > { %18228 = vmatpush3.bf16.msra.mxu1 %v18863_v17  ;;  %17166 = vmatprep.mubr.msk.f32.mxu1 %vm18704_vm1, %v18705_v16 }
0x9176   : > { %18229 = vmatprep.subr.bf16.mxu1 %v18703_v15 }
0x9179   : > { %18231 = vmatpush3.bf16.msra.mxu1 %v18868_v18 }
0x917a   : > { %18238 = vmatprep.subr.bf16.mxu1 %v18703_v15 }
0x9247   : > { %v12666_v39 = vpop.f32.mrb[166].mxu1 }
0x9248   : > { %v12667_v33 = vadd.f32 %v18832_v12, %v12666_v39  ;;  %v17150_v34 = vpop.f32.mrb[167].mxu1 }
0x924a   : > { %v12670_v36 = vmul.f32 %v12667_v33, %v18931_v43 }
0x924c   : > { %v20319_v55 = vadd.f32 %v12670_v36, %v12446_v21 }
0x924e   : > { %17156 = vmatmul.mubr.msk.f32.vlgmr.msra.gmra.mrb[168].mxu0 %vm78_vm0, %v20319_v55 }
0x924f   : > { %18234 = vmatpush3.bf16.msra.mxu0 %v18881_v23  ;;  %17177 = vmatprep.mubr.msk.f32.mxu0 %vm18704_vm1, %v18705_v16 }
0x9250   : > { %18235 = vmatprep.subr.bf16.mxu0 %v18703_v15 }
0x9253   : > { %18237 = vmatpush3.bf16.msra.mxu0 %v18886_v24 }
0x9254   : > { %18241 = vmatprep.subr.bf16.mxu0 %v18703_v15 }
0x9321   : > { %v12741_v37 = vpop.f32.mrb[168].mxu0 }
0x9322   : > { %v12742_v38 = vadd.f32 %v18782_v2, %v12741_v37  ;;  %v17157_v40 = vpop.f32.mrb[169].mxu0 }
0x9324   : > { %18591 = vtanh.f32 %v12742_v38 }
0x932e   : > { %v18592_v41 = vpop.eup %18591 }
0x932f   : > { %17167 = vmatmul.mubr.msk.f32.vlgmr.msra.gmra.mrb[168].mxu1 %vm166_vm2, %v18592_v41 }
0x9330   : > { %18240 = vmatpush3.bf16.msra.mxu1 %v18847_v14  ;;  %17184 = vmatprep.mubr.msk.f32.mxu1 %vm18704_vm1, %v18705_v16 }
0x9331   : > { %18247 = vmatprep.subr.bf16.mxu1 %v18703_v15 }
0x9402   : > { %v12815_v42 = vpop.f32.mrb[168].mxu1 }
0x9403   : > { %v12816_v44 = vadd.f32 %v18807_v7, %v12815_v42  ;;  %v17168_v45 = vpop.f32.mrb[169].mxu1 }
0x9405   : > { %18593 = vtanh.f32 %v12816_v44 }
0x940f   : > { %v18594_v47 = vpop.eup %18593 }
0x9410   : > { %17178 = vmatmul.mubr.msk.f32.vlgmr.msra.gmra.mrb[170].mxu0 %vm166_vm2, %v18594_v47 }
0x9411   : > { %18243 = vmatpush3.bf16.msra.mxu0 %v18863_v17  ;;  %17195 = vmatprep.mubr.msk.f32.mxu0 %vm18704_vm1, %v18705_v16 }
0x9412   : > { %18244 = vmatprep.subr.bf16.mxu0 %v18703_v15 }
0x9415   : > { %18246 = vmatpush3.bf16.msra.mxu0 %v18868_v18 }
0x9416   : > { %18253 = vmatprep.subr.bf16.mxu0 %v18703_v15 }
0x94e3   : > { %v12889_v48 = vpop.f32.mrb[170].mxu0 }
0x94e4   : > { %v12890_v49 = vadd.f32 %v18832_v12, %v12889_v48  ;;  %v17179_v50 = vpop.f32.mrb[171].mxu0 }
0x94e6   : > { %v12895_v51 = vmul.f32 %v12890_v49, %v18904_v30  ;;  %v12893_v61 = vmul.f32 %v12890_v49, %v18931_v43 }
0x94e8   : > { %v12896_v52 = vadd.f32 %v12895_v51, %v20319_v55  ;;  %v12894_v21 = vadd.f32 %v12893_v61, %v20319_v55 }
0x94ea   : > { %17185 = vmatmul.mubr.msk.f32.vlgmr.msra.gmra.mrb[170].mxu1 %vm78_vm0, %v12896_v52 }
0x94eb   : > { %18249 = vmatpush3.bf16.msra.mxu1 %v18881_v23  ;;  %17206 = vmatprep.mubr.msk.f32.mxu1 %vm18704_vm1, %v18705_v16 }
0x94ec   : > { %18250 = vmatprep.subr.bf16.mxu1 %v18703_v15 }
0x94ef   : > { %18252 = vmatpush3.bf16.msra.mxu1 %v18886_v24 }
0x94f0   : > { %18256 = vmatprep.subr.bf16.mxu1 %v18703_v15 }
0x95bd   : > { %v12966_v59 = vpop.f32.mrb[170].mxu1 }
0x95be   : > { %v12967_v53 = vadd.f32 %v18782_v2, %v12966_v59  ;;  %v17186_v54 = vpop.f32.mrb[171].mxu1 }
0x95c0   : > { %18595 = vtanh.f32 %v12967_v53 }
0x95ca   : > { %v18596_v56 = vpop.eup %18595 }
0x95cb   : > { %17196 = vmatmul.mubr.msk.f32.vlgmr.msra.gmra.mrb[172].mxu0 %vm166_vm2, %v18596_v56 }
0x95cc   : > { %18255 = vmatpush3.bf16.msra.mxu0 %v18847_v14  ;;  %17213 = vmatprep.mubr.msk.f32.mxu0 %vm18704_vm1, %v18705_v16 }
0x95cd   : > { %18262 = vmatprep.subr.bf16.mxu0 %v18703_v15 }
0x969e   : > { %v13040_v13 = vpop.f32.mrb[172].mxu0 }
0x969f   : > { %v13041_v57 = vadd.f32 %v18807_v7, %v13040_v13  ;;  %v17197_v58 = vpop.f32.mrb[173].mxu0 }
0x96a1   : > { %18597 = vtanh.f32 %v13041_v57 }
0x96ab   : > { %v18598_v60 = vpop.eup %18597 }
0x96ac   : > { %17207 = vmatmul.mubr.msk.f32.vlgmr.msra.gmra.mrb[172].mxu1 %vm166_vm2, %v18598_v60 }
0x96ad   : > { %18258 = vmatpush3.bf16.msra.mxu1 %v18863_v17  ;;  %17224 = vmatprep.mubr.msk.f32.mxu1 %vm18704_vm1, %v18705_v16 }
0x96ae   : > { %18259 = vmatprep.subr.bf16.mxu1 %v18703_v15 }
0x96b1   : > { %18261 = vmatpush3.bf16.msra.mxu1 %v18868_v18 }
0x96b2   : > { %18268 = vmatprep.subr.bf16.mxu1 %v18703_v15 }
0x977f   : > { %v13114_v62 = vpop.f32.mrb[172].mxu1 }
0x9780   : > { %v13115_v19 = vadd.f32 %v18832_v12, %v13114_v62  ;;  %v17208_v20 = vpop.f32.mrb[173].mxu1 }
0x9782   : > { %v13118_v22 = vmul.f32 %v13115_v19, %v18935_v46  ;;  %v13120_v25 = vmul.f32 %v13115_v19, %v18904_v30 }
0x9784   : > { %v13119_v26 = vadd.f32 %v13118_v22, %v12894_v21  ;;  %v13121_v27 = vadd.f32 %v13120_v25, %v20319_v55 }
0x9786   : > { %17214 = vmatmul.mubr.msk.f32.vlgmr.msra.gmra.mrb[174].mxu0 %vm78_vm0, %v13121_v27 }
0x9787   : > { %18264 = vmatpush3.bf16.msra.mxu0 %v18881_v23  ;;  %17235 = vmatprep.mubr.msk.f32.mxu0 %vm18704_vm1, %v18705_v16 }
0x9788   : > { %18265 = vmatprep.subr.bf16.mxu0 %v18703_v15 }
0x978b   : > { %18267 = vmatpush3.bf16.msra.mxu0 %v18886_v24 }
0x978c   : > { %18271 = vmatprep.subr.bf16.mxu0 %v18703_v15 }
0x9859   : > { %v13191_v28 = vpop.f32.mrb[174].mxu0 }
0x985a   : > { %v13192_v35 = vadd.f32 %v18782_v2, %v13191_v28  ;;  %v17215_v29 = vpop.f32.mrb[175].mxu0 }
0x985c   : > { %18599 = vtanh.f32 %v13192_v35 }
0x9866   : > { %v18600_v31 = vpop.eup %18599 }
0x9867   : > { %17225 = vmatmul.mubr.msk.f32.vlgmr.msra.gmra.mrb[174].mxu1 %vm166_vm2, %v18600_v31 }
0x9868   : > { %18270 = vmatpush3.bf16.msra.mxu1 %v18847_v14  ;;  %17242 = vmatprep.mubr.msk.f32.mxu1 %vm18704_vm1, %v18705_v16 }
0x9869   : > { %18277 = vmatprep.subr.bf16.mxu1 %v18703_v15 }
0x993a   : > { %v13265_v32 = vpop.f32.mrb[174].mxu1 }
0x993b   : > { %v13266_v39 = vadd.f32 %v18807_v7, %v13265_v32  ;;  %v17226_v33 = vpop.f32.mrb[175].mxu1 }
0x993d   : > { %18601 = vtanh.f32 %v13266_v39 }
0x9947   : > { %v18602_v34 = vpop.eup %18601 }
0x9948   : > { %17236 = vmatmul.mubr.msk.f32.vlgmr.msra.gmra.mrb[176].mxu0 %vm166_vm2, %v18602_v34 }
0x9949   : > { %18273 = vmatpush3.bf16.msra.mxu0 %v18863_v17  ;;  %17253 = vmatprep.mubr.msk.f32.mxu0 %vm18704_vm1, %v18705_v16 }
0x994a   : > { %18274 = vmatprep.subr.bf16.mxu0 %v18703_v15 }
0x994d   : > { %18276 = vmatpush3.bf16.msra.mxu0 %v18868_v18 }
0x994e   : > { %18283 = vmatprep.subr.bf16.mxu0 %v18703_v15 }
0x9a1b   : > { %v13339_v36 = vpop.f32.mrb[176].mxu0 }
0x9a1c   : > { %v13340_v37 = vadd.f32 %v18832_v12, %v13339_v36  ;;  %v17237_v38 = vpop.f32.mrb[177].mxu0 }
0x9a1e   : > { %v13343_v40 = vmul.f32 %v13340_v37, %v18935_v46  ;;  %v13345_v41 = vmul.f32 %v13340_v37, %v18964_v63 }
0x9a20   : > { %v13344_v42 = vadd.f32 %v13343_v40, %v13119_v26  ;;  %v13346_v44 = vadd.f32 %v13345_v41, %v20319_v55 }
0x9a22   : > { %17243 = vmatmul.mubr.msk.f32.vlgmr.msra.gmra.mrb[176].mxu1 %vm78_vm0, %v13346_v44 }
0x9a23   : > { %18279 = vmatpush3.bf16.msra.mxu1 %v18881_v23  ;;  %17264 = vmatprep.mubr.msk.f32.mxu1 %vm18704_vm1, %v18705_v16 }
0x9a24   : > { %18280 = vmatprep.subr.bf16.mxu1 %v18703_v15 }
0x9a27   : > { %18282 = vmatpush3.bf16.msra.mxu1 %v18886_v24 }
0x9a28   : > { %18286 = vmatprep.subr.bf16.mxu1 %v18703_v15 }
0x9af5   : > { %v13416_v45 = vpop.f32.mrb[176].mxu1 }
0x9af6   : > { %v13417_v47 = vadd.f32 %v18782_v2, %v13416_v45  ;;  %v17244_v48 = vpop.f32.mrb[177].mxu1 }
0x9af8   : > { %18603 = vtanh.f32 %v13417_v47 }
0x9b02   : > { %v18604_v49 = vpop.eup %18603 }
0x9b03   : > { %17254 = vmatmul.mubr.msk.f32.vlgmr.msra.gmra.mrb[178].mxu0 %vm166_vm2, %v18604_v49 }
0x9b04   : > { %18285 = vmatpush3.bf16.msra.mxu0 %v18847_v14  ;;  %17271 = vmatprep.mubr.msk.f32.mxu0 %vm18704_vm1, %v18705_v16 }
0x9b05   : > { %18292 = vmatprep.subr.bf16.mxu0 %v18703_v15 }
0x9bd6   : > { %v13490_v55 = vpop.f32.mrb[178].mxu0 }
0x9bd7   : > { %v13491_v50 = vadd.f32 %v18807_v7, %v13490_v55  ;;  %v17255_v51 = vpop.f32.mrb[179].mxu0 }
0x9bd9   : > { %18605 = vtanh.f32 %v13491_v50 }
0x9be3   : > { %v18606_v52 = vpop.eup %18605 }
0x9be4   : > { %17265 = vmatmul.mubr.msk.f32.vlgmr.msra.gmra.mrb[178].mxu1 %vm166_vm2, %v18606_v52 }
0x9be5   : > { %18288 = vmatpush3.bf16.msra.mxu1 %v18863_v17  ;;  %17282 = vmatprep.mubr.msk.f32.mxu1 %vm18704_vm1, %v18705_v16 }
0x9be6   : > { %18289 = vmatprep.subr.bf16.mxu1 %v18703_v15 }
0x9be9   : > { %18291 = vmatpush3.bf16.msra.mxu1 %v18868_v18 }
0x9bea   : > { %18298 = vmatprep.subr.bf16.mxu1 %v18703_v15 }
0x9cb7   : > { %v13564_v59 = vpop.f32.mrb[178].mxu1 }
0x9cb8   : > { %v13565_v53 = vadd.f32 %v18832_v12, %v13564_v59  ;;  %v17266_v54 = vpop.f32.mrb[179].mxu1 }
0x9cba   : > { %v13568_v56 = vmul.f32 %v13565_v53, %v18931_v43 }
0x9cbc   : > { %v20421_v13 = vadd.f32 %v13568_v56, %v13344_v42 }
0x9cbe   : > { %17272 = vmatmul.mubr.msk.f32.vlgmr.msra.gmra.mrb[180].mxu0 %vm78_vm0, %v20421_v13 }
0x9cbf   : > { %18294 = vmatpush3.bf16.msra.mxu0 %v18881_v23  ;;  %17293 = vmatprep.mubr.msk.f32.mxu0 %vm18704_vm1, %v18705_v16 }
0x9cc0   : > { %18295 = vmatprep.subr.bf16.mxu0 %v18703_v15 }
0x9cc3   : > { %18297 = vmatpush3.bf16.msra.mxu0 %v18886_v24 }
0x9cc4   : > { %18301 = vmatprep.subr.bf16.mxu0 %v18703_v15 }
0x9d91   : > { %v13639_v57 = vpop.f32.mrb[180].mxu0 }
0x9d92   : > { %v13640_v58 = vadd.f32 %v18782_v2, %v13639_v57  ;;  %v17273_v60 = vpop.f32.mrb[181].mxu0 }
0x9d94   : > { %18607 = vtanh.f32 %v13640_v58 }
0x9d9e   : > { %v18608_v61 = vpop.eup %18607 }
0x9d9f   : > { %17283 = vmatmul.mubr.msk.f32.vlgmr.msra.gmra.mrb[180].mxu1 %vm166_vm2, %v18608_v61 }
0x9da0   : > { %18300 = vmatpush3.bf16.msra.mxu1 %v18847_v14  ;;  %17300 = vmatprep.mubr.msk.f32.mxu1 %vm18704_vm1, %v18705_v16 }
0x9da1   : > { %18307 = vmatprep.subr.bf16.mxu1 %v18703_v15 }
0x9e72   : > { %v13713_v62 = vpop.f32.mrb[180].mxu1 }
0x9e73   : > { %v13714_v19 = vadd.f32 %v18807_v7, %v13713_v62  ;;  %v17284_v20 = vpop.f32.mrb[181].mxu1 }
0x9e75   : > { %18609 = vtanh.f32 %v13714_v19 }
0x9e7f   : > { %v18610_v21 = vpop.eup %18609 }
0x9e80   : > { %17294 = vmatmul.mubr.msk.f32.vlgmr.msra.gmra.mrb[182].mxu0 %vm166_vm2, %v18610_v21 }
0x9e81   : > { %18303 = vmatpush3.bf16.msra.mxu0 %v18863_v17  ;;  %17311 = vmatprep.mubr.msk.f32.mxu0 %vm18704_vm1, %v18705_v16 }
0x9e82   : > { %18304 = vmatprep.subr.bf16.mxu0 %v18703_v15 }
0x9e85   : > { %18306 = vmatpush3.bf16.msra.mxu0 %v18868_v18 }
0x9e86   : > { %18313 = vmatprep.subr.bf16.mxu0 %v18703_v15 }
0x9f53   : > { %v13787_v22 = vpop.f32.mrb[182].mxu0 }
0x9f54   : > { %v13788_v25 = vadd.f32 %v18832_v12, %v13787_v22  ;;  %v17295_v26 = vpop.f32.mrb[183].mxu0 }
0x9f56   : > { %v13793_v27 = vmul.f32 %v13788_v25, %v18904_v30  ;;  %v13791_v37 = vmul.f32 %v13788_v25, %v18931_v43 }
0x9f58   : > { %v13794_v28 = vadd.f32 %v13793_v27, %v20421_v13  ;;  %v13792_v42 = vadd.f32 %v13791_v37, %v20421_v13 }
0x9f5a   : > { %17301 = vmatmul.mubr.msk.f32.vlgmr.msra.gmra.mrb[182].mxu1 %vm78_vm0, %v13794_v28 }
0x9f5b   : > { %18309 = vmatpush3.bf16.msra.mxu1 %v18881_v23  ;;  %17322 = vmatprep.mubr.msk.f32.mxu1 %vm18704_vm1, %v18705_v16 }
0x9f5c   : > { %18310 = vmatprep.subr.bf16.mxu1 %v18703_v15 }
0x9f5f   : > { %18312 = vmatpush3.bf16.msra.mxu1 %v18886_v24 }
0x9f60   : > { %18316 = vmatprep.subr.bf16.mxu1 %v18703_v15 }
0xa02d   : > { %v13864_v35 = vpop.f32.mrb[182].mxu1 }
0xa02e   : > { %v13865_v29 = vadd.f32 %v18782_v2, %v13864_v35  ;;  %v17302_v31 = vpop.f32.mrb[183].mxu1 }
0xa030   : > { %18611 = vtanh.f32 %v13865_v29 }
0xa03a   : > { %v18612_v32 = vpop.eup %18611 }
0xa03b   : > { %17312 = vmatmul.mubr.msk.f32.vlgmr.msra.gmra.mrb[184].mxu0 %vm166_vm2, %v18612_v32 }
0xa03c   : > { %18315 = vmatpush3.bf16.msra.mxu0 %v18847_v14  ;;  %17329 = vmatprep.mubr.msk.f32.mxu0 %vm18704_vm1, %v18705_v16 }
0xa03d   : > { %18322 = vmatprep.subr.bf16.mxu0 %v18703_v15 }
0xa10e   : > { %v13938_v39 = vpop.f32.mrb[184].mxu0 }
0xa10f   : > { %v13939_v33 = vadd.f32 %v18807_v7, %v13938_v39  ;;  %v17313_v34 = vpop.f32.mrb[185].mxu0 }
0xa111   : > { %18613 = vtanh.f32 %v13939_v33 }
0xa11b   : > { %v18614_v36 = vpop.eup %18613 }
0xa11c   : > { %17323 = vmatmul.mubr.msk.f32.vlgmr.msra.gmra.mrb[184].mxu1 %vm166_vm2, %v18614_v36 }
0xa11d   : > { %18318 = vmatpush3.bf16.msra.mxu1 %v18863_v17  ;;  %17340 = vmatprep.mubr.msk.f32.mxu1 %vm18704_vm1, %v18705_v16 }
0xa11e   : > { %18319 = vmatprep.subr.bf16.mxu1 %v18703_v15 }
0xa121   : > { %18321 = vmatpush3.bf16.msra.mxu1 %v18868_v18 }
0xa122   : > { %18328 = vmatprep.subr.bf16.mxu1 %v18703_v15 }
0xa1ef   : > { %v14012_v38 = vpop.f32.mrb[184].mxu1 }
0xa1f0   : > { %v14013_v40 = vadd.f32 %v18832_v12, %v14012_v38  ;;  %v17324_v41 = vpop.f32.mrb[185].mxu1 }
0xa1f2   : > { %v14016_v44 = vmul.f32 %v14013_v40, %v18935_v46  ;;  %v14018_v45 = vmul.f32 %v14013_v40, %v18904_v30 }
0xa1f4   : > { %v14017_v47 = vadd.f32 %v14016_v44, %v13792_v42  ;;  %v14019_v48 = vadd.f32 %v14018_v45, %v20421_v13 }
0xa1f6   : > { %17330 = vmatmul.mubr.msk.f32.vlgmr.msra.gmra.mrb[186].mxu0 %vm78_vm0, %v14019_v48 }
0xa1f7   : > { %18324 = vmatpush3.bf16.msra.mxu0 %v18881_v23  ;;  %17351 = vmatprep.mubr.msk.f32.mxu0 %vm18704_vm1, %v18705_v16 }
0xa1f8   : > { %18325 = vmatprep.subr.bf16.mxu0 %v18703_v15 }
0xa1fb   : > { %18327 = vmatpush3.bf16.msra.mxu0 %v18886_v24 }
0xa1fc   : > { %18331 = vmatprep.subr.bf16.mxu0 %v18703_v15 }
0xa2c9   : > { %v14089_v49 = vpop.f32.mrb[186].mxu0 }
0xa2ca   : > { %v14090_v55 = vadd.f32 %v18782_v2, %v14089_v49  ;;  %v17331_v30 = vpop.f32.mrb[187].mxu0 }
0xa2cc   : > { %18615 = vtanh.f32 %v14090_v55 }
0xa2d6   : > { %v18616_v50 = vpop.eup %18615 }
0xa2d7   : > { %17341 = vmatmul.mubr.msk.f32.vlgmr.msra.gmra.mrb[186].mxu1 %vm166_vm2, %v18616_v50 }
0xa2d8   : > { %18330 = vmatpush3.bf16.msra.mxu1 %v18847_v14  ;;  %17358 = vmatprep.mubr.msk.f32.mxu1 %vm18704_vm1, %v18705_v16 }
0xa2d9   : > { %18337 = vmatprep.subr.bf16.mxu1 %v18703_v15 }
0xa3aa   : > { %v14163_v51 = vpop.f32.mrb[186].mxu1 }
0xa3ab   : > { %v14164_v52 = vadd.f32 %v18807_v7, %v14163_v51  ;;  %v17342_v59 = vpop.f32.mrb[187].mxu1 }
0xa3ad   : > { %18617 = vtanh.f32 %v14164_v52 }
0xa3b7   : > { %v18618_v53 = vpop.eup %18617 }
0xa3b8   : > { %17352 = vmatmul.mubr.msk.f32.vlgmr.msra.gmra.mrb[188].mxu0 %vm166_vm2, %v18618_v53 }
0xa3b9   : > { %18333 = vmatpush3.bf16.msra.mxu0 %v18863_v17  ;;  %17369 = vmatprep.mubr.msk.f32.mxu0 %vm18704_vm1, %v18705_v16 }
0xa3ba   : > { %18334 = vmatprep.subr.bf16.mxu0 %v18703_v15 }
0xa3bd   : > { %18336 = vmatpush3.bf16.msra.mxu0 %v18868_v18 }
0xa48b   : > { %v14237_v14 = vpop.f32.mrb[188].mxu0 }
0xa48c   : > { %v14238_v54 = vadd.f32 %v18832_v12, %v14237_v14  ;;  %v17353_v56 = vpop.f32.mrb[189].mxu0 }
0xa48e   : > { %v14241_v57 = vmul.f32 %v14238_v54, %v18935_v46  ;;  %v14243_v58 = vmul.f32 %v14238_v54, %v18964_v63 }
0xa490   : > { %v14242_v60 = vadd.f32 %v14241_v57, %v14017_v47  ;;  %v14244_v61 = vadd.f32 %v14243_v58, %v20421_v13 }
0xa492   : > { %17359 = vmatmul.mubr.msk.f32.vlgmr.msra.gmra.mrb[188].mxu1 %vm78_vm0, %v14244_v61 }
0xa493   : > { %18339 = vmatpush3.bf16.msra.mxu1 %v18881_v23  ;;  %17380 = vmatprep.mubr.msk.f32.mxu1 %vm18704_vm1, %v18705_v16 }
0xa494   : > { %18340 = vmatprep.subr.bf16.mxu1 %v18703_v15 }
0xa497   : > { %18342 = vmatpush3.bf16.msra.mxu1 %v18886_v24 }
0xa565   : > { %v14314_v17 = vpop.f32.mrb[188].mxu1 }
0xa566   : > { %v14315_v18 = vadd.f32 %v18782_v2, %v14314_v17  ;;  %v17360_v46 = vpop.f32.mrb[189].mxu1 }
0xa568   : > { %18619 = vtanh.f32 %v14315_v18 }
0xa572   : > { %v18620_v63 = vpop.eup %18619 }
0xa573   : > { %17370 = vmatmul.mubr.msk.f32.vlgmr.msra.gmra.mrb[190].mxu0 %vm166_vm2, %v18620_v63 }
0xa646   : > { %v14388_v13 = vpop.f32.mrb[190].mxu0 }
0xa647   : > { %v14389_v62 = vadd.f32 %v18807_v7, %v14388_v13  ;;  %v17371_v23 = vpop.f32.mrb[191].mxu0 }
0xa649   : > { %18621 = vtanh.f32 %v14389_v62 }
0xa653   : > { %v18622_v19 = vpop.eup %18621 }
0xa654   : > { %17381 = vmatmul.mubr.msk.f32.vlgmr.msra.gmra.mrb[190].mxu1 %vm166_vm2, %v18622_v19 }
0xa727   : > { %v14462_v15 = vpop.f32.mrb[190].mxu1 }
0xa728   : > { %v14463_v16 = vadd.f32 %v18832_v12, %v14462_v15  ;;  %v17382_v24 = vpop.f32.mrb[191].mxu1  ;;  %84 = sbr.rel (!%p82_p13) target bundleno = 41 (0x29), region = 60 }
0xa72a   : > { %v14466_v20 = vmul.f32 %v14463_v16, %v18931_v43 }
0xa72c   : > { %v14467_v13 = vadd.f32 %v14466_v20, %v14242_v60  }
0xa72e   : > { %14470 = vst.msk [vmem:[%s14469_s27] sm:$0xff] %vm78_vm0, %v14467_v13 }
0xa72f   :  { %18668 = shalt.err (!%p18665_p4)
}
0xa730   :  { %s18669_s2 = scalar_lea.hbm %s20538_s8, 1024 }
0xa731   :  { %p18670_p5 = scmp.ne.s32.totalorder %s20538_s8, %s18669_s2  ;;  %p18673_p6 = scmp.lt.u32.totalorder %s18669_s2, %s20538_s8 }
0xa733   :  { %p18675_p7 = pnand %p18673_p6, %p18670_p5 }
0xa735   :  { %18678 = shalt.err (!%p18675_p7)
}
0xa736   :  { %s18707_s0 = smov 128   ;;  %s18708_s13 = smov 8  }
0xa737   :  { %14482 = dma.vmem_to_hbm [thread:$0]  %s14477_s1, 1024, %s20538_s8, [#allocation6], %s18707_s0, %s18707_s0, %s18708_s13  }
0xa738   :  { %18691 = dma.done.wait [#allocation6], 1024  }
0xa739   :  { %18692 = vsyncadd [#allocation6], 4294966272 }
0xa73a   :  { %14486 = vsyncpa [#allocation5], 1 }
0xa73b   :  { %14487 = vsyncpa [#allocation6], 1 }

</bundles_post_ra>
